<compile_context>
chip_gen: v6e
topology: v6e:2x2x1
jax: 0.10.0
libtpu: 0.0.40
codegen_flags: <defaults>
</compile_context>

<pallas_src>
import jax
import jax.numpy as jnp
from jax import lax
from jax.experimental import pallas as pl
from jax.experimental.pallas import tpu as pltpu

GRAD_REG_SCALES = 4                      # PearsonCorrDepthLoss default
NUM_GROUPS = 1 + 2 * GRAD_REG_SCALES     # full image + (x, y) gradients at 4 scales
NUM_STATS = 6                            # n, sum_x, sum_y, sum_xx, sum_yy, sum_xy
HALO = 8                                 # next-tile halo rows (max gradient step)


def _round_up(x, m):
    return (x + m - 1) // m * m


def _pick_tile_rows(H, W_pad):
    # ~0.5 MiB per (TH, W_pad) f32 plane keeps the ~15 live temporaries well under the
    # default scoped-VMEM limits while still amortizing per-grid-step overhead.
    target_elems = (512 * 1024) // 4
    th = (target_elems // W_pad) // 8 * 8
    th = max(8, min(256, th))
    return min(th, _round_up(H, 8))


def _sum_all(v):
    # Sublane / cross-vreg reduction first (plain VPU adds), then a single short lane
    # reduction on a (1, W) row (XLU): keeps the 2-3 XLU units off the critical path.
    return jnp.sum(jnp.sum(v, axis=0, keepdims=True), axis=1, keepdims=True)


def _masked_stats(sel, x, y):
    # [n, sx, sy, sxx, syy, sxy] with reused products -> 5 multiplies per element.
    a = sel * x
    b = sel * y
    return [_sum_all(sel), _sum_all(a), _sum_all(b),
            _sum_all(a * x), _sum_all(b * y), _sum_all(a * y)]


def _make_stats_kernel(TH, W_pad, H_valid, W_valid, n_tiles, padded):
    def kernel(shift_ref, pred_ref, gt_ref, ph_ref, gh_ref, out_ref):
        cp = shift_ref[0:1, 0:1]                               # (1,1) centring constants
        cg = shift_ref[0:1, 1:2]
        pred = pred_ref[...].astype(jnp.float32) - cp          # (TH, W_pad)
        gt = gt_ref[...].astype(jnp.float32) - cg
        ph = ph_ref[...].astype(jnp.float32) - cp              # (HALO, W_pad) next-tile halo
        gh = gh_ref[...].astype(jnp.float32) - cg

        t = pl.program_id(0)
        row0 = t * TH
        grow = row0 + lax.broadcasted_iota(jnp.int32, (TH, W_pad), 0)   # global row
        col = lax.broadcasted_iota(jnp.int32, (TH, W_pad), 1)           # global col
        in_bounds = (grow < H_valid) & (col < W_valid)

        groups = [None] * NUM_GROUPS

        # ---- group 0: raw depths over the whole (valid) image ------------------
        if padded:
            groups[0] = _masked_stats(in_bounds.astype(jnp.float32), pred, gt)
        else:
            groups[0] = [jnp.full((1, 1), float(TH * W_pad), jnp.float32),
                         _sum_all(pred), _sum_all(gt),
                         _sum_all(pred * pred), _sum_all(gt * gt),
                         _sum_all(pred * gt)]

        # ---- extended planes for y gradients (aligned sublane concat, built once)
        pred_ext = jnp.concatenate([pred, ph], axis=0)          # (TH+HALO, W_pad)
        gt_ext = jnp.concatenate([gt, gh], axis=0)
        ghrow = (t + 1) * TH + lax.broadcasted_iota(jnp.int32, (HALO, W_pad), 0)
        grow_ext = jnp.concatenate([grow, ghrow], axis=0)

        # ---- groups 1..8: gradients of the 2**s-subsampled image ----------------
        # The partner index is recovered by rolling the index planes with the SAME
        # rotation as the data, so the selection mask is independent of the roll
        # direction convention and automatically rejects lane/sublane wrap-around
        # and out-of-image / padded partners.
        on_grid = in_bounds
        for s in range(GRAD_REG_SCALES):
            step = 1 << s
            if s > 0:
                half = step >> 1
                on_grid = on_grid & ((grow & half) == 0) & ((col & half) == 0)

            # x direction (lane axis)
            sx_amt = W_pad - step                               # rotate by -step
            dpx = pltpu.roll(pred, sx_amt, axis=1) - pred
            dgx = pltpu.roll(gt, sx_amt, axis=1) - gt
            pcol = pltpu.roll(col, sx_amt, axis=1)
            selx = on_grid & (jnp.abs(pcol - col) == step) & (pcol < W_valid)
            groups[1 + 2 * s] = _masked_stats(selx.astype(jnp.float32), dpx, dgx)

            # y direction (sublane axis, uses the next-tile halo)
            sy_amt = (TH + HALO) - step                         # rotate by -step
            dpy = pltpu.roll(pred_ext, sy_amt, axis=0)[:TH, :] - pred
            dgy = pltpu.roll(gt_ext, sy_amt, axis=0)[:TH, :] - gt
            prow = pltpu.roll(grow_ext, sy_amt, axis=0)[:TH, :]
            sely = on_grid & (jnp.abs(prow - grow) == step) & (prow < H_valid)
            groups[2 + 2 * s] = _masked_stats(sely.astype(jnp.float32), dpy, dgy)

        # ---- assemble the (NUM_STATS, NUM_GROUPS) table, single store -----------
        srow = lax.broadcasted_iota(jnp.int32, (NUM_STATS, NUM_GROUPS), 0)
        gcol = lax.broadcasted_iota(jnp.int32, (NUM_STATS, NUM_GROUPS), 1)
        table = jnp.zeros((NUM_STATS, NUM_GROUPS), jnp.float32)
        for g in range(NUM_GROUPS):
            hit_g = gcol == g
            for j in range(NUM_STATS):
                table = table + jnp.where(hit_g & (srow == j), groups[g][j], 0.0)
        out_ref[0, :, :] = table

    return kernel


def _compute_stats(pred, gt):
    H, W = pred.shape
    W_pad = _round_up(W, 128)
    TH = _pick_tile_rows(H, W_pad)
    H_pad = _round_up(H, TH)
    n_tiles = H_pad // TH
    padded = (H_pad != H) or (W_pad != W)

    # Centring constants (Pearson is shift-invariant; centring avoids catastrophic
    # cancellation when forming cov/var from raw f32 moment sums on large images).
    shifts = jnp.zeros((1, 128), jnp.float32)
    shifts = shifts.at[0, 0].set(pred[0, 0].astype(jnp.float32))
    shifts = shifts.at[0, 1].set(gt[0, 0].astype(jnp.float32))

    if padded:
        pred = jnp.pad(pred, ((0, H_pad - H), (0, W_pad - W)))
        gt = jnp.pad(gt, ((0, H_pad - H), (0, W_pad - W)))

    kernel = _make_stats_kernel(TH, W_pad, H, W, n_tiles, padded)

    def tile_map(i):
        return (i, 0)

    def halo_map(i):
        # First HALO rows of the next row-tile; clamped for the last tile (its halo
        # rows are never selected because their partner row index is >= H).
        return (jnp.minimum(i + 1, n_tiles - 1) * (TH // HALO), 0)

    partials = pl.pallas_call(
        kernel,
        out_shape=jax.ShapeDtypeStruct((n_tiles, NUM_STATS, NUM_GROUPS), jnp.float32),
        grid=(n_tiles,),
        in_specs=[
            pl.BlockSpec((1, 128), lambda i: (0, 0)),       # centring constants
            pl.BlockSpec((TH, W_pad), tile_map),            # pred tile
            pl.BlockSpec((TH, W_pad), tile_map),            # gt tile
            pl.BlockSpec((HALO, W_pad), halo_map),          # pred halo (next tile)
            pl.BlockSpec((HALO, W_pad), halo_map),          # gt halo (next tile)
        ],
        out_specs=pl.BlockSpec((1, NUM_STATS, NUM_GROUPS), lambda i: (i, 0, 0)),
        compiler_params=pltpu.CompilerParams(
            dimension_semantics=("parallel",),
            vmem_limit_bytes=48 * 1024 * 1024,
        ),
    )(shifts, pred, gt, pred, gt)

    return jnp.sum(partials, axis=0)      # (NUM_STATS, NUM_GROUPS)


def _pearson_from_stats(col, eps=1e-12):
    n, sx, sy, sxx, syy, sxy = (col[k] for k in range(NUM_STATS))
    n_safe = jnp.maximum(n, 1.0)
    cxx = jnp.maximum(sxx - sx * sx / n_safe, 0.0)
    cyy = jnp.maximum(syy - sy * sy / n_safe, 0.0)
    cxy = sxy - sx * sy / n_safe
    return cxy / jnp.sqrt(jnp.maximum(cxx * cyy, eps))


def mono_depth_loss(depth_pred, depth_gt, mask_volume, *, w=1.0,
                    mask_pred_thresh=0.95, alpha_grad_reg=0.01):
    """MonoDepthLoss.forward with its default config (pearson loss, no ignore masks)."""
    depth_pred = jnp.asarray(depth_pred)
    depth_gt = jnp.asarray(depth_gt).reshape(depth_pred.shape)
    # With the default ignore_mask_list=[], remain_mask is all-True; mask_volume /
    # mask_pred_thresh would only matter for 'pred_not_occupied', so no mask is
    # DMA'd or multiplied in the kernel.
    del mask_volume, mask_pred_thresh
    # TODO(synk): non-default paths (ignore_mask_list, mask_erode/kornia erosion,
    # distant_mode, annealing, monosdf loss) are host-side config branches and are
    # not implemented here.

    stats = _compute_stats(depth_pred, depth_gt)    # (NUM_STATS, NUM_GROUPS)

    # depth term: 1 - pearson(pred[mask], gt[mask])
    loss_depth = 1.0 - _pearson_from_stats(stats[:, 0])

    # gradient regularization: sum over 4 scales of (1 - corr_gx) + (1 - corr_gy)
    loss_reg = jnp.float32(0.0)
    for g in range(1, NUM_GROUPS):
        corr = _pearson_from_stats(stats[:, g])
        loss_reg = loss_reg + jnp.where(stats[0, g] > 0, 1.0 - corr, 0.0)
    loss_reg = alpha_grad_reg * loss_reg

    return {
        "loss_mono_depth.depth": w * loss_depth,
        "loss_mono_depth.reg": w * loss_reg,
    }


if __name__ == "__main__":
    key = jax.random.PRNGKey(0)
    k1, k2, k3 = jax.random.split(key, 3)
    H, W = 16, 128  # small spatial size, lane-aligned last dim
    depth_pred = jax.random.uniform(k1, (H, W), jnp.float32, 0.5, 10.0)   # rendered depth_volume
    depth_gt = jax.random.uniform(k2, (H, W), jnp.float32, 0.0, 1.0)      # monocular depth prior
    mask_volume = jax.random.uniform(k3, (H, W), jnp.float32)             # rendered mask_volume

    out = mono_depth_loss(depth_pred, depth_gt, mask_volume)
    out = jax.block_until_ready(out)
    print("KERNEL_OK")
</pallas_src>

<mosaic_0001>
module attributes {stable_mosaic.version = 11 : i64} {
  func.func @kernel(%arg0: i32, %arg1: memref<1x128xf32, #tpu.memory_space<vmem>>, %arg2: memref<16x128xf32, #tpu.memory_space<vmem>>, %arg3: memref<16x128xf32, #tpu.memory_space<vmem>>, %arg4: memref<8x128xf32, #tpu.memory_space<vmem>>, %arg5: memref<8x128xf32, #tpu.memory_space<vmem>>, %arg6: memref<1x6x9xf32, #tpu.memory_space<vmem>>) attributes {dimension_semantics = [#tpu.dimension_semantics<parallel>], iteration_bounds = array<i64: 1>, scalar_prefetch = 0 : i64, scratch_operands = 0 : i64, tpu.core_type = #tpu.core_type<tc>, window_params = [{pipeline_mode = #tpu.pipeline_mode<synchronous>, transform_indices = @transform_0, window_bounds = array<i64: 1, 128>}, {transform_indices = @transform_1, window_bounds = array<i64: 16, 128>}, {transform_indices = @transform_2, window_bounds = array<i64: 16, 128>}, {transform_indices = @transform_3, window_bounds = array<i64: 8, 128>}, {transform_indices = @transform_4, window_bounds = array<i64: 8, 128>}, {transform_indices = @transform_5, window_bounds = array<i64: 1, 6, 9>}]} {
    %c0 = arith.constant 0 : index
    %c0_0 = arith.constant 0 : index
    %0 = vector.load %arg1[%c0, %c0_0] : memref<1x128xf32, #tpu.memory_space<vmem>>, vector<1x1xf32>
    %c0_1 = arith.constant 0 : index
    %c1 = arith.constant 1 : index
    %1 = vector.load %arg1[%c0_1, %c1] : memref<1x128xf32, #tpu.memory_space<vmem>>, vector<1x1xf32>
    %c0_2 = arith.constant 0 : index
    %c0_3 = arith.constant 0 : index
    %2 = vector.load %arg2[%c0_2, %c0_3] : memref<16x128xf32, #tpu.memory_space<vmem>>, vector<16x128xf32>
    %3 = vector.broadcast %0 : vector<1x1xf32> to vector<16x128xf32>
    %4 = arith.subf %2, %3 : vector<16x128xf32>
    %c0_4 = arith.constant 0 : index
    %c0_5 = arith.constant 0 : index
    %5 = vector.load %arg3[%c0_4, %c0_5] : memref<16x128xf32, #tpu.memory_space<vmem>>, vector<16x128xf32>
    %6 = vector.broadcast %1 : vector<1x1xf32> to vector<16x128xf32>
    %7 = arith.subf %5, %6 : vector<16x128xf32>
    %c0_6 = arith.constant 0 : index
    %c0_7 = arith.constant 0 : index
    %8 = vector.load %arg4[%c0_6, %c0_7] : memref<8x128xf32, #tpu.memory_space<vmem>>, vector<8x128xf32>
    %9 = vector.broadcast %0 : vector<1x1xf32> to vector<8x128xf32>
    %10 = arith.subf %8, %9 : vector<8x128xf32>
    %c0_8 = arith.constant 0 : index
    %c0_9 = arith.constant 0 : index
    %11 = vector.load %arg5[%c0_8, %c0_9] : memref<8x128xf32, #tpu.memory_space<vmem>>, vector<8x128xf32>
    %12 = vector.broadcast %1 : vector<1x1xf32> to vector<8x128xf32>
    %13 = arith.subf %11, %12 : vector<8x128xf32>
    %c16_i32 = arith.constant 16 : i32
    %14 = arith.muli %arg0, %c16_i32 : i32
    %15 = tpu.iota {dimensions = array<i32: 0>} : vector<16x128xi32>
    %16 = vector.broadcast %14 : i32 to vector<16x128xi32>
    %17 = arith.addi %16, %15 : vector<16x128xi32>
    %18 = tpu.iota {dimensions = array<i32: 1>} : vector<16x128xi32>
    %c16_i32_10 = arith.constant 16 : i32
    %19 = vector.broadcast %c16_i32_10 : i32 to vector<16x128xi32>
    %20 = arith.cmpi slt, %17, %19 : vector<16x128xi32>
    %c128_i32 = arith.constant 128 : i32
    %21 = vector.broadcast %c128_i32 : i32 to vector<16x128xi32>
    %22 = arith.cmpi slt, %18, %21 : vector<16x128xi32>
    %23 = arith.andi %20, %22 : vector<16x128xi1>
    %cst = arith.constant 2.048000e+03 : f32
    %24 = vector.broadcast %cst : f32 to vector<1x1xf32>
    %cst_11 = arith.constant dense<0.000000e+00> : vector<128xf32>
    %25 = vector.multi_reduction <add>, %4, %cst_11 [0] : vector<16x128xf32> to vector<128xf32>
    %26 = vector.shape_cast %25 : vector<128xf32> to vector<1x128xf32>
    %cst_12 = arith.constant dense<0.000000e+00> : vector<1xf32>
    %27 = vector.multi_reduction <add>, %26, %cst_12 [1] : vector<1x128xf32> to vector<1xf32>
    %28 = vector.shape_cast %27 : vector<1xf32> to vector<1x1xf32>
    %cst_13 = arith.constant dense<0.000000e+00> : vector<128xf32>
    %29 = vector.multi_reduction <add>, %7, %cst_13 [0] : vector<16x128xf32> to vector<128xf32>
    %30 = vector.shape_cast %29 : vector<128xf32> to vector<1x128xf32>
    %cst_14 = arith.constant dense<0.000000e+00> : vector<1xf32>
    %31 = vector.multi_reduction <add>, %30, %cst_14 [1] : vector<1x128xf32> to vector<1xf32>
    %32 = vector.shape_cast %31 : vector<1xf32> to vector<1x1xf32>
    %33 = arith.mulf %4, %4 : vector<16x128xf32>
    %cst_15 = arith.constant dense<0.000000e+00> : vector<128xf32>
    %34 = vector.multi_reduction <add>, %33, %cst_15 [0] : vector<16x128xf32> to vector<128xf32>
    %35 = vector.shape_cast %34 : vector<128xf32> to vector<1x128xf32>
    %cst_16 = arith.constant dense<0.000000e+00> : vector<1xf32>
    %36 = vector.multi_reduction <add>, %35, %cst_16 [1] : vector<1x128xf32> to vector<1xf32>
    %37 = vector.shape_cast %36 : vector<1xf32> to vector<1x1xf32>
    %38 = arith.mulf %7, %7 : vector<16x128xf32>
    %cst_17 = arith.constant dense<0.000000e+00> : vector<128xf32>
    %39 = vector.multi_reduction <add>, %38, %cst_17 [0] : vector<16x128xf32> to vector<128xf32>
    %40 = vector.shape_cast %39 : vector<128xf32> to vector<1x128xf32>
    %cst_18 = arith.constant dense<0.000000e+00> : vector<1xf32>
    %41 = vector.multi_reduction <add>, %40, %cst_18 [1] : vector<1x128xf32> to vector<1xf32>
    %42 = vector.shape_cast %41 : vector<1xf32> to vector<1x1xf32>
    %43 = arith.mulf %4, %7 : vector<16x128xf32>
    %cst_19 = arith.constant dense<0.000000e+00> : vector<128xf32>
    %44 = vector.multi_reduction <add>, %43, %cst_19 [0] : vector<16x128xf32> to vector<128xf32>
    %45 = vector.shape_cast %44 : vector<128xf32> to vector<1x128xf32>
    %cst_20 = arith.constant dense<0.000000e+00> : vector<1xf32>
    %46 = vector.multi_reduction <add>, %45, %cst_20 [1] : vector<1x128xf32> to vector<1xf32>
    %47 = vector.shape_cast %46 : vector<1xf32> to vector<1x1xf32>
    %48 = tpu.concatenate %4, %10 in 0 : vector<16x128xf32>, vector<8x128xf32> -> vector<24x128xf32>
    %49 = tpu.concatenate %7, %13 in 0 : vector<16x128xf32>, vector<8x128xf32> -> vector<24x128xf32>
    %c1_i32 = arith.constant 1 : i32
    %50 = arith.addi %arg0, %c1_i32 : i32
    %c16_i32_21 = arith.constant 16 : i32
    %51 = arith.muli %50, %c16_i32_21 : i32
    %52 = tpu.iota {dimensions = array<i32: 0>} : vector<8x128xi32>
    %53 = vector.broadcast %51 : i32 to vector<8x128xi32>
    %54 = arith.addi %53, %52 : vector<8x128xi32>
    %55 = tpu.concatenate %17, %54 in 0 : vector<16x128xi32>, vector<8x128xi32> -> vector<24x128xi32>
    %c127_i32 = arith.constant 127 : i32
    %56 = tpu.dynamic_rotate %4 by %c127_i32 dim 1 : vector<16x128xf32>, i32 -> vector<16x128xf32>
    %57 = arith.subf %56, %4 : vector<16x128xf32>
    %c127_i32_22 = arith.constant 127 : i32
    %58 = tpu.dynamic_rotate %7 by %c127_i32_22 dim 1 : vector<16x128xf32>, i32 -> vector<16x128xf32>
    %59 = arith.subf %58, %7 : vector<16x128xf32>
    %c127_i32_23 = arith.constant 127 : i32
    %60 = tpu.dynamic_rotate %18 by %c127_i32_23 dim 1 : vector<16x128xi32>, i32 -> vector<16x128xi32>
    %61 = arith.subi %60, %18 : vector<16x128xi32>
    %62 = math.absi %61 : vector<16x128xi32>
    %c1_i32_24 = arith.constant 1 : i32
    %63 = vector.broadcast %c1_i32_24 : i32 to vector<16x128xi32>
    %64 = arith.cmpi eq, %62, %63 : vector<16x128xi32>
    %65 = arith.andi %23, %64 : vector<16x128xi1>
    %c128_i32_25 = arith.constant 128 : i32
    %66 = vector.broadcast %c128_i32_25 : i32 to vector<16x128xi32>
    %67 = arith.cmpi slt, %60, %66 : vector<16x128xi32>
    %68 = arith.andi %65, %67 : vector<16x128xi1>
    %69 = arith.extui %68 : vector<16x128xi1> to vector<16x128xi32>
    %70 = arith.sitofp %69 : vector<16x128xi32> to vector<16x128xf32>
    %71 = arith.mulf %70, %57 : vector<16x128xf32>
    %72 = arith.mulf %70, %59 : vector<16x128xf32>
    %cst_26 = arith.constant dense<0.000000e+00> : vector<128xf32>
    %73 = vector.multi_reduction <add>, %70, %cst_26 [0] : vector<16x128xf32> to vector<128xf32>
    %74 = vector.shape_cast %73 : vector<128xf32> to vector<1x128xf32>
    %cst_27 = arith.constant dense<0.000000e+00> : vector<1xf32>
    %75 = vector.multi_reduction <add>, %74, %cst_27 [1] : vector<1x128xf32> to vector<1xf32>
    %76 = vector.shape_cast %75 : vector<1xf32> to vector<1x1xf32>
    %cst_28 = arith.constant dense<0.000000e+00> : vector<128xf32>
    %77 = vector.multi_reduction <add>, %71, %cst_28 [0] : vector<16x128xf32> to vector<128xf32>
    %78 = vector.shape_cast %77 : vector<128xf32> to vector<1x128xf32>
    %cst_29 = arith.constant dense<0.000000e+00> : vector<1xf32>
    %79 = vector.multi_reduction <add>, %78, %cst_29 [1] : vector<1x128xf32> to vector<1xf32>
    %80 = vector.shape_cast %79 : vector<1xf32> to vector<1x1xf32>
    %cst_30 = arith.constant dense<0.000000e+00> : vector<128xf32>
    %81 = vector.multi_reduction <add>, %72, %cst_30 [0] : vector<16x128xf32> to vector<128xf32>
    %82 = vector.shape_cast %81 : vector<128xf32> to vector<1x128xf32>
    %cst_31 = arith.constant dense<0.000000e+00> : vector<1xf32>
    %83 = vector.multi_reduction <add>, %82, %cst_31 [1] : vector<1x128xf32> to vector<1xf32>
    %84 = vector.shape_cast %83 : vector<1xf32> to vector<1x1xf32>
    %85 = arith.mulf %71, %57 : vector<16x128xf32>
    %cst_32 = arith.constant dense<0.000000e+00> : vector<128xf32>
    %86 = vector.multi_reduction <add>, %85, %cst_32 [0] : vector<16x128xf32> to vector<128xf32>
    %87 = vector.shape_cast %86 : vector<128xf32> to vector<1x128xf32>
    %cst_33 = arith.constant dense<0.000000e+00> : vector<1xf32>
    %88 = vector.multi_reduction <add>, %87, %cst_33 [1] : vector<1x128xf32> to vector<1xf32>
    %89 = vector.shape_cast %88 : vector<1xf32> to vector<1x1xf32>
    %90 = arith.mulf %72, %59 : vector<16x128xf32>
    %cst_34 = arith.constant dense<0.000000e+00> : vector<128xf32>
    %91 = vector.multi_reduction <add>, %90, %cst_34 [0] : vector<16x128xf32> to vector<128xf32>
    %92 = vector.shape_cast %91 : vector<128xf32> to vector<1x128xf32>
    %cst_35 = arith.constant dense<0.000000e+00> : vector<1xf32>
    %93 = vector.multi_reduction <add>, %92, %cst_35 [1] : vector<1x128xf32> to vector<1xf32>
    %94 = vector.shape_cast %93 : vector<1xf32> to vector<1x1xf32>
    %95 = arith.mulf %71, %59 : vector<16x128xf32>
    %cst_36 = arith.constant dense<0.000000e+00> : vector<128xf32>
    %96 = vector.multi_reduction <add>, %95, %cst_36 [0] : vector<16x128xf32> to vector<128xf32>
    %97 = vector.shape_cast %96 : vector<128xf32> to vector<1x128xf32>
    %cst_37 = arith.constant dense<0.000000e+00> : vector<1xf32>
    %98 = vector.multi_reduction <add>, %97, %cst_37 [1] : vector<1x128xf32> to vector<1xf32>
    %99 = vector.shape_cast %98 : vector<1xf32> to vector<1x1xf32>
    %c23_i32 = arith.constant 23 : i32
    %100 = tpu.dynamic_rotate %48 by %c23_i32 dim 0 : vector<24x128xf32>, i32 -> vector<24x128xf32>
    %101 = vector.extract_strided_slice %100 {offsets = [0, 0], sizes = [16, 128], strides = [1, 1]} : vector<24x128xf32> to vector<16x128xf32>
    %102 = arith.subf %101, %4 : vector<16x128xf32>
    %c23_i32_38 = arith.constant 23 : i32
    %103 = tpu.dynamic_rotate %49 by %c23_i32_38 dim 0 : vector<24x128xf32>, i32 -> vector<24x128xf32>
    %104 = vector.extract_strided_slice %103 {offsets = [0, 0], sizes = [16, 128], strides = [1, 1]} : vector<24x128xf32> to vector<16x128xf32>
    %105 = arith.subf %104, %7 : vector<16x128xf32>
    %c23_i32_39 = arith.constant 23 : i32
    %106 = tpu.dynamic_rotate %55 by %c23_i32_39 dim 0 : vector<24x128xi32>, i32 -> vector<24x128xi32>
    %107 = vector.extract_strided_slice %106 {offsets = [0, 0], sizes = [16, 128], strides = [1, 1]} : vector<24x128xi32> to vector<16x128xi32>
    %108 = arith.subi %107, %17 : vector<16x128xi32>
    %109 = math.absi %108 : vector<16x128xi32>
    %c1_i32_40 = arith.constant 1 : i32
    %110 = vector.broadcast %c1_i32_40 : i32 to vector<16x128xi32>
    %111 = arith.cmpi eq, %109, %110 : vector<16x128xi32>
    %112 = arith.andi %23, %111 : vector<16x128xi1>
    %c16_i32_41 = arith.constant 16 : i32
    %113 = vector.broadcast %c16_i32_41 : i32 to vector<16x128xi32>
    %114 = arith.cmpi slt, %107, %113 : vector<16x128xi32>
    %115 = arith.andi %112, %114 : vector<16x128xi1>
    %116 = arith.extui %115 : vector<16x128xi1> to vector<16x128xi32>
    %117 = arith.sitofp %116 : vector<16x128xi32> to vector<16x128xf32>
    %118 = arith.mulf %117, %102 : vector<16x128xf32>
    %119 = arith.mulf %117, %105 : vector<16x128xf32>
    %cst_42 = arith.constant dense<0.000000e+00> : vector<128xf32>
    %120 = vector.multi_reduction <add>, %117, %cst_42 [0] : vector<16x128xf32> to vector<128xf32>
    %121 = vector.shape_cast %120 : vector<128xf32> to vector<1x128xf32>
    %cst_43 = arith.constant dense<0.000000e+00> : vector<1xf32>
    %122 = vector.multi_reduction <add>, %121, %cst_43 [1] : vector<1x128xf32> to vector<1xf32>
    %123 = vector.shape_cast %122 : vector<1xf32> to vector<1x1xf32>
    %cst_44 = arith.constant dense<0.000000e+00> : vector<128xf32>
    %124 = vector.multi_reduction <add>, %118, %cst_44 [0] : vector<16x128xf32> to vector<128xf32>
    %125 = vector.shape_cast %124 : vector<128xf32> to vector<1x128xf32>
    %cst_45 = arith.constant dense<0.000000e+00> : vector<1xf32>
    %126 = vector.multi_reduction <add>, %125, %cst_45 [1] : vector<1x128xf32> to vector<1xf32>
    %127 = vector.shape_cast %126 : vector<1xf32> to vector<1x1xf32>
    %cst_46 = arith.constant dense<0.000000e+00> : vector<128xf32>
    %128 = vector.multi_reduction <add>, %119, %cst_46 [0] : vector<16x128xf32> to vector<128xf32>
    %129 = vector.shape_cast %128 : vector<128xf32> to vector<1x128xf32>
    %cst_47 = arith.constant dense<0.000000e+00> : vector<1xf32>
    %130 = vector.multi_reduction <add>, %129, %cst_47 [1] : vector<1x128xf32> to vector<1xf32>
    %131 = vector.shape_cast %130 : vector<1xf32> to vector<1x1xf32>
    %132 = arith.mulf %118, %102 : vector<16x128xf32>
    %cst_48 = arith.constant dense<0.000000e+00> : vector<128xf32>
    %133 = vector.multi_reduction <add>, %132, %cst_48 [0] : vector<16x128xf32> to vector<128xf32>
    %134 = vector.shape_cast %133 : vector<128xf32> to vector<1x128xf32>
    %cst_49 = arith.constant dense<0.000000e+00> : vector<1xf32>
    %135 = vector.multi_reduction <add>, %134, %cst_49 [1] : vector<1x128xf32> to vector<1xf32>
    %136 = vector.shape_cast %135 : vector<1xf32> to vector<1x1xf32>
    %137 = arith.mulf %119, %105 : vector<16x128xf32>
    %cst_50 = arith.constant dense<0.000000e+00> : vector<128xf32>
    %138 = vector.multi_reduction <add>, %137, %cst_50 [0] : vector<16x128xf32> to vector<128xf32>
    %139 = vector.shape_cast %138 : vector<128xf32> to vector<1x128xf32>
    %cst_51 = arith.constant dense<0.000000e+00> : vector<1xf32>
    %140 = vector.multi_reduction <add>, %139, %cst_51 [1] : vector<1x128xf32> to vector<1xf32>
    %141 = vector.shape_cast %140 : vector<1xf32> to vector<1x1xf32>
    %142 = arith.mulf %118, %105 : vector<16x128xf32>
    %cst_52 = arith.constant dense<0.000000e+00> : vector<128xf32>
    %143 = vector.multi_reduction <add>, %142, %cst_52 [0] : vector<16x128xf32> to vector<128xf32>
    %144 = vector.shape_cast %143 : vector<128xf32> to vector<1x128xf32>
    %cst_53 = arith.constant dense<0.000000e+00> : vector<1xf32>
    %145 = vector.multi_reduction <add>, %144, %cst_53 [1] : vector<1x128xf32> to vector<1xf32>
    %146 = vector.shape_cast %145 : vector<1xf32> to vector<1x1xf32>
    %c1_i32_54 = arith.constant 1 : i32
    %147 = vector.broadcast %c1_i32_54 : i32 to vector<16x128xi32>
    %148 = arith.andi %17, %147 : vector<16x128xi32>
    %c0_i32 = arith.constant 0 : i32
    %149 = vector.broadcast %c0_i32 : i32 to vector<16x128xi32>
    %150 = arith.cmpi eq, %148, %149 : vector<16x128xi32>
    %151 = arith.andi %23, %150 : vector<16x128xi1>
    %c1_i32_55 = arith.constant 1 : i32
    %152 = vector.broadcast %c1_i32_55 : i32 to vector<16x128xi32>
    %153 = arith.andi %18, %152 : vector<16x128xi32>
    %c0_i32_56 = arith.constant 0 : i32
    %154 = vector.broadcast %c0_i32_56 : i32 to vector<16x128xi32>
    %155 = arith.cmpi eq, %153, %154 : vector<16x128xi32>
    %156 = arith.andi %151, %155 : vector<16x128xi1>
    %c126_i32 = arith.constant 126 : i32
    %157 = tpu.dynamic_rotate %4 by %c126_i32 dim 1 : vector<16x128xf32>, i32 -> vector<16x128xf32>
    %158 = arith.subf %157, %4 : vector<16x128xf32>
    %c126_i32_57 = arith.constant 126 : i32
    %159 = tpu.dynamic_rotate %7 by %c126_i32_57 dim 1 : vector<16x128xf32>, i32 -> vector<16x128xf32>
    %160 = arith.subf %159, %7 : vector<16x128xf32>
    %c126_i32_58 = arith.constant 126 : i32
    %161 = tpu.dynamic_rotate %18 by %c126_i32_58 dim 1 : vector<16x128xi32>, i32 -> vector<16x128xi32>
    %162 = arith.subi %161, %18 : vector<16x128xi32>
    %163 = math.absi %162 : vector<16x128xi32>
    %c2_i32 = arith.constant 2 : i32
    %164 = vector.broadcast %c2_i32 : i32 to vector<16x128xi32>
    %165 = arith.cmpi eq, %163, %164 : vector<16x128xi32>
    %166 = arith.andi %156, %165 : vector<16x128xi1>
    %c128_i32_59 = arith.constant 128 : i32
    %167 = vector.broadcast %c128_i32_59 : i32 to vector<16x128xi32>
    %168 = arith.cmpi slt, %161, %167 : vector<16x128xi32>
    %169 = arith.andi %166, %168 : vector<16x128xi1>
    %170 = arith.extui %169 : vector<16x128xi1> to vector<16x128xi32>
    %171 = arith.sitofp %170 : vector<16x128xi32> to vector<16x128xf32>
    %172 = arith.mulf %171, %158 : vector<16x128xf32>
    %173 = arith.mulf %171, %160 : vector<16x128xf32>
    %cst_60 = arith.constant dense<0.000000e+00> : vector<128xf32>
    %174 = vector.multi_reduction <add>, %171, %cst_60 [0] : vector<16x128xf32> to vector<128xf32>
    %175 = vector.shape_cast %174 : vector<128xf32> to vector<1x128xf32>
    %cst_61 = arith.constant dense<0.000000e+00> : vector<1xf32>
    %176 = vector.multi_reduction <add>, %175, %cst_61 [1] : vector<1x128xf32> to vector<1xf32>
    %177 = vector.shape_cast %176 : vector<1xf32> to vector<1x1xf32>
    %cst_62 = arith.constant dense<0.000000e+00> : vector<128xf32>
    %178 = vector.multi_reduction <add>, %172, %cst_62 [0] : vector<16x128xf32> to vector<128xf32>
    %179 = vector.shape_cast %178 : vector<128xf32> to vector<1x128xf32>
    %cst_63 = arith.constant dense<0.000000e+00> : vector<1xf32>
    %180 = vector.multi_reduction <add>, %179, %cst_63 [1] : vector<1x128xf32> to vector<1xf32>
    %181 = vector.shape_cast %180 : vector<1xf32> to vector<1x1xf32>
    %cst_64 = arith.constant dense<0.000000e+00> : vector<128xf32>
    %182 = vector.multi_reduction <add>, %173, %cst_64 [0] : vector<16x128xf32> to vector<128xf32>
    %183 = vector.shape_cast %182 : vector<128xf32> to vector<1x128xf32>
    %cst_65 = arith.constant dense<0.000000e+00> : vector<1xf32>
    %184 = vector.multi_reduction <add>, %183, %cst_65 [1] : vector<1x128xf32> to vector<1xf32>
    %185 = vector.shape_cast %184 : vector<1xf32> to vector<1x1xf32>
    %186 = arith.mulf %172, %158 : vector<16x128xf32>
    %cst_66 = arith.constant dense<0.000000e+00> : vector<128xf32>
    %187 = vector.multi_reduction <add>, %186, %cst_66 [0] : vector<16x128xf32> to vector<128xf32>
    %188 = vector.shape_cast %187 : vector<128xf32> to vector<1x128xf32>
    %cst_67 = arith.constant dense<0.000000e+00> : vector<1xf32>
    %189 = vector.multi_reduction <add>, %188, %cst_67 [1] : vector<1x128xf32> to vector<1xf32>
    %190 = vector.shape_cast %189 : vector<1xf32> to vector<1x1xf32>
    %191 = arith.mulf %173, %160 : vector<16x128xf32>
    %cst_68 = arith.constant dense<0.000000e+00> : vector<128xf32>
    %192 = vector.multi_reduction <add>, %191, %cst_68 [0] : vector<16x128xf32> to vector<128xf32>
    %193 = vector.shape_cast %192 : vector<128xf32> to vector<1x128xf32>
    %cst_69 = arith.constant dense<0.000000e+00> : vector<1xf32>
    %194 = vector.multi_reduction <add>, %193, %cst_69 [1] : vector<1x128xf32> to vector<1xf32>
    %195 = vector.shape_cast %194 : vector<1xf32> to vector<1x1xf32>
    %196 = arith.mulf %172, %160 : vector<16x128xf32>
    %cst_70 = arith.constant dense<0.000000e+00> : vector<128xf32>
    %197 = vector.multi_reduction <add>, %196, %cst_70 [0] : vector<16x128xf32> to vector<128xf32>
    %198 = vector.shape_cast %197 : vector<128xf32> to vector<1x128xf32>
    %cst_71 = arith.constant dense<0.000000e+00> : vector<1xf32>
    %199 = vector.multi_reduction <add>, %198, %cst_71 [1] : vector<1x128xf32> to vector<1xf32>
    %200 = vector.shape_cast %199 : vector<1xf32> to vector<1x1xf32>
    %c22_i32 = arith.constant 22 : i32
    %201 = tpu.dynamic_rotate %48 by %c22_i32 dim 0 : vector<24x128xf32>, i32 -> vector<24x128xf32>
    %202 = vector.extract_strided_slice %201 {offsets = [0, 0], sizes = [16, 128], strides = [1, 1]} : vector<24x128xf32> to vector<16x128xf32>
    %203 = arith.subf %202, %4 : vector<16x128xf32>
    %c22_i32_72 = arith.constant 22 : i32
    %204 = tpu.dynamic_rotate %49 by %c22_i32_72 dim 0 : vector<24x128xf32>, i32 -> vector<24x128xf32>
    %205 = vector.extract_strided_slice %204 {offsets = [0, 0], sizes = [16, 128], strides = [1, 1]} : vector<24x128xf32> to vector<16x128xf32>
    %206 = arith.subf %205, %7 : vector<16x128xf32>
    %c22_i32_73 = arith.constant 22 : i32
    %207 = tpu.dynamic_rotate %55 by %c22_i32_73 dim 0 : vector<24x128xi32>, i32 -> vector<24x128xi32>
    %208 = vector.extract_strided_slice %207 {offsets = [0, 0], sizes = [16, 128], strides = [1, 1]} : vector<24x128xi32> to vector<16x128xi32>
    %209 = arith.subi %208, %17 : vector<16x128xi32>
    %210 = math.absi %209 : vector<16x128xi32>
    %c2_i32_74 = arith.constant 2 : i32
    %211 = vector.broadcast %c2_i32_74 : i32 to vector<16x128xi32>
    %212 = arith.cmpi eq, %210, %211 : vector<16x128xi32>
    %213 = arith.andi %156, %212 : vector<16x128xi1>
    %c16_i32_75 = arith.constant 16 : i32
    %214 = vector.broadcast %c16_i32_75 : i32 to vector<16x128xi32>
    %215 = arith.cmpi slt, %208, %214 : vector<16x128xi32>
    %216 = arith.andi %213, %215 : vector<16x128xi1>
    %217 = arith.extui %216 : vector<16x128xi1> to vector<16x128xi32>
    %218 = arith.sitofp %217 : vector<16x128xi32> to vector<16x128xf32>
    %219 = arith.mulf %218, %203 : vector<16x128xf32>
    %220 = arith.mulf %218, %206 : vector<16x128xf32>
    %cst_76 = arith.constant dense<0.000000e+00> : vector<128xf32>
    %221 = vector.multi_reduction <add>, %218, %cst_76 [0] : vector<16x128xf32> to vector<128xf32>
    %222 = vector.shape_cast %221 : vector<128xf32> to vector<1x128xf32>
    %cst_77 = arith.constant dense<0.000000e+00> : vector<1xf32>
    %223 = vector.multi_reduction <add>, %222, %cst_77 [1] : vector<1x128xf32> to vector<1xf32>
    %224 = vector.shape_cast %223 : vector<1xf32> to vector<1x1xf32>
    %cst_78 = arith.constant dense<0.000000e+00> : vector<128xf32>
    %225 = vector.multi_reduction <add>, %219, %cst_78 [0] : vector<16x128xf32> to vector<128xf32>
    %226 = vector.shape_cast %225 : vector<128xf32> to vector<1x128xf32>
    %cst_79 = arith.constant dense<0.000000e+00> : vector<1xf32>
    %227 = vector.multi_reduction <add>, %226, %cst_79 [1] : vector<1x128xf32> to vector<1xf32>
    %228 = vector.shape_cast %227 : vector<1xf32> to vector<1x1xf32>
    %cst_80 = arith.constant dense<0.000000e+00> : vector<128xf32>
    %229 = vector.multi_reduction <add>, %220, %cst_80 [0] : vector<16x128xf32> to vector<128xf32>
    %230 = vector.shape_cast %229 : vector<128xf32> to vector<1x128xf32>
    %cst_81 = arith.constant dense<0.000000e+00> : vector<1xf32>
    %231 = vector.multi_reduction <add>, %230, %cst_81 [1] : vector<1x128xf32> to vector<1xf32>
    %232 = vector.shape_cast %231 : vector<1xf32> to vector<1x1xf32>
    %233 = arith.mulf %219, %203 : vector<16x128xf32>
    %cst_82 = arith.constant dense<0.000000e+00> : vector<128xf32>
    %234 = vector.multi_reduction <add>, %233, %cst_82 [0] : vector<16x128xf32> to vector<128xf32>
    %235 = vector.shape_cast %234 : vector<128xf32> to vector<1x128xf32>
    %cst_83 = arith.constant dense<0.000000e+00> : vector<1xf32>
    %236 = vector.multi_reduction <add>, %235, %cst_83 [1] : vector<1x128xf32> to vector<1xf32>
    %237 = vector.shape_cast %236 : vector<1xf32> to vector<1x1xf32>
    %238 = arith.mulf %220, %206 : vector<16x128xf32>
    %cst_84 = arith.constant dense<0.000000e+00> : vector<128xf32>
    %239 = vector.multi_reduction <add>, %238, %cst_84 [0] : vector<16x128xf32> to vector<128xf32>
    %240 = vector.shape_cast %239 : vector<128xf32> to vector<1x128xf32>
    %cst_85 = arith.constant dense<0.000000e+00> : vector<1xf32>
    %241 = vector.multi_reduction <add>, %240, %cst_85 [1] : vector<1x128xf32> to vector<1xf32>
    %242 = vector.shape_cast %241 : vector<1xf32> to vector<1x1xf32>
    %243 = arith.mulf %219, %206 : vector<16x128xf32>
    %cst_86 = arith.constant dense<0.000000e+00> : vector<128xf32>
    %244 = vector.multi_reduction <add>, %243, %cst_86 [0] : vector<16x128xf32> to vector<128xf32>
    %245 = vector.shape_cast %244 : vector<128xf32> to vector<1x128xf32>
    %cst_87 = arith.constant dense<0.000000e+00> : vector<1xf32>
    %246 = vector.multi_reduction <add>, %245, %cst_87 [1] : vector<1x128xf32> to vector<1xf32>
    %247 = vector.shape_cast %246 : vector<1xf32> to vector<1x1xf32>
    %c2_i32_88 = arith.constant 2 : i32
    %248 = vector.broadcast %c2_i32_88 : i32 to vector<16x128xi32>
    %249 = arith.andi %17, %248 : vector<16x128xi32>
    %c0_i32_89 = arith.constant 0 : i32
    %250 = vector.broadcast %c0_i32_89 : i32 to vector<16x128xi32>
    %251 = arith.cmpi eq, %249, %250 : vector<16x128xi32>
    %252 = arith.andi %156, %251 : vector<16x128xi1>
    %c2_i32_90 = arith.constant 2 : i32
    %253 = vector.broadcast %c2_i32_90 : i32 to vector<16x128xi32>
    %254 = arith.andi %18, %253 : vector<16x128xi32>
    %c0_i32_91 = arith.constant 0 : i32
    %255 = vector.broadcast %c0_i32_91 : i32 to vector<16x128xi32>
    %256 = arith.cmpi eq, %254, %255 : vector<16x128xi32>
    %257 = arith.andi %252, %256 : vector<16x128xi1>
    %c124_i32 = arith.constant 124 : i32
    %258 = tpu.dynamic_rotate %4 by %c124_i32 dim 1 : vector<16x128xf32>, i32 -> vector<16x128xf32>
    %259 = arith.subf %258, %4 : vector<16x128xf32>
    %c124_i32_92 = arith.constant 124 : i32
    %260 = tpu.dynamic_rotate %7 by %c124_i32_92 dim 1 : vector<16x128xf32>, i32 -> vector<16x128xf32>
    %261 = arith.subf %260, %7 : vector<16x128xf32>
    %c124_i32_93 = arith.constant 124 : i32
    %262 = tpu.dynamic_rotate %18 by %c124_i32_93 dim 1 : vector<16x128xi32>, i32 -> vector<16x128xi32>
    %263 = arith.subi %262, %18 : vector<16x128xi32>
    %264 = math.absi %263 : vector<16x128xi32>
    %c4_i32 = arith.constant 4 : i32
    %265 = vector.broadcast %c4_i32 : i32 to vector<16x128xi32>
    %266 = arith.cmpi eq, %264, %265 : vector<16x128xi32>
    %267 = arith.andi %257, %266 : vector<16x128xi1>
    %c128_i32_94 = arith.constant 128 : i32
    %268 = vector.broadcast %c128_i32_94 : i32 to vector<16x128xi32>
    %269 = arith.cmpi slt, %262, %268 : vector<16x128xi32>
    %270 = arith.andi %267, %269 : vector<16x128xi1>
    %271 = arith.extui %270 : vector<16x128xi1> to vector<16x128xi32>
    %272 = arith.sitofp %271 : vector<16x128xi32> to vector<16x128xf32>
    %273 = arith.mulf %272, %259 : vector<16x128xf32>
    %274 = arith.mulf %272, %261 : vector<16x128xf32>
    %cst_95 = arith.constant dense<0.000000e+00> : vector<128xf32>
    %275 = vector.multi_reduction <add>, %272, %cst_95 [0] : vector<16x128xf32> to vector<128xf32>
    %276 = vector.shape_cast %275 : vector<128xf32> to vector<1x128xf32>
    %cst_96 = arith.constant dense<0.000000e+00> : vector<1xf32>
    %277 = vector.multi_reduction <add>, %276, %cst_96 [1] : vector<1x128xf32> to vector<1xf32>
    %278 = vector.shape_cast %277 : vector<1xf32> to vector<1x1xf32>
    %cst_97 = arith.constant dense<0.000000e+00> : vector<128xf32>
    %279 = vector.multi_reduction <add>, %273, %cst_97 [0] : vector<16x128xf32> to vector<128xf32>
    %280 = vector.shape_cast %279 : vector<128xf32> to vector<1x128xf32>
    %cst_98 = arith.constant dense<0.000000e+00> : vector<1xf32>
    %281 = vector.multi_reduction <add>, %280, %cst_98 [1] : vector<1x128xf32> to vector<1xf32>
    %282 = vector.shape_cast %281 : vector<1xf32> to vector<1x1xf32>
    %cst_99 = arith.constant dense<0.000000e+00> : vector<128xf32>
    %283 = vector.multi_reduction <add>, %274, %cst_99 [0] : vector<16x128xf32> to vector<128xf32>
    %284 = vector.shape_cast %283 : vector<128xf32> to vector<1x128xf32>
    %cst_100 = arith.constant dense<0.000000e+00> : vector<1xf32>
    %285 = vector.multi_reduction <add>, %284, %cst_100 [1] : vector<1x128xf32> to vector<1xf32>
    %286 = vector.shape_cast %285 : vector<1xf32> to vector<1x1xf32>
    %287 = arith.mulf %273, %259 : vector<16x128xf32>
    %cst_101 = arith.constant dense<0.000000e+00> : vector<128xf32>
    %288 = vector.multi_reduction <add>, %287, %cst_101 [0] : vector<16x128xf32> to vector<128xf32>
    %289 = vector.shape_cast %288 : vector<128xf32> to vector<1x128xf32>
    %cst_102 = arith.constant dense<0.000000e+00> : vector<1xf32>
    %290 = vector.multi_reduction <add>, %289, %cst_102 [1] : vector<1x128xf32> to vector<1xf32>
    %291 = vector.shape_cast %290 : vector<1xf32> to vector<1x1xf32>
    %292 = arith.mulf %274, %261 : vector<16x128xf32>
    %cst_103 = arith.constant dense<0.000000e+00> : vector<128xf32>
    %293 = vector.multi_reduction <add>, %292, %cst_103 [0] : vector<16x128xf32> to vector<128xf32>
    %294 = vector.shape_cast %293 : vector<128xf32> to vector<1x128xf32>
    %cst_104 = arith.constant dense<0.000000e+00> : vector<1xf32>
    %295 = vector.multi_reduction <add>, %294, %cst_104 [1] : vector<1x128xf32> to vector<1xf32>
    %296 = vector.shape_cast %295 : vector<1xf32> to vector<1x1xf32>
    %297 = arith.mulf %273, %261 : vector<16x128xf32>
    %cst_105 = arith.constant dense<0.000000e+00> : vector<128xf32>
    %298 = vector.multi_reduction <add>, %297, %cst_105 [0] : vector<16x128xf32> to vector<128xf32>
    %299 = vector.shape_cast %298 : vector<128xf32> to vector<1x128xf32>
    %cst_106 = arith.constant dense<0.000000e+00> : vector<1xf32>
    %300 = vector.multi_reduction <add>, %299, %cst_106 [1] : vector<1x128xf32> to vector<1xf32>
    %301 = vector.shape_cast %300 : vector<1xf32> to vector<1x1xf32>
    %c20_i32 = arith.constant 20 : i32
    %302 = tpu.dynamic_rotate %48 by %c20_i32 dim 0 : vector<24x128xf32>, i32 -> vector<24x128xf32>
    %303 = vector.extract_strided_slice %302 {offsets = [0, 0], sizes = [16, 128], strides = [1, 1]} : vector<24x128xf32> to vector<16x128xf32>
    %304 = arith.subf %303, %4 : vector<16x128xf32>
    %c20_i32_107 = arith.constant 20 : i32
    %305 = tpu.dynamic_rotate %49 by %c20_i32_107 dim 0 : vector<24x128xf32>, i32 -> vector<24x128xf32>
    %306 = vector.extract_strided_slice %305 {offsets = [0, 0], sizes = [16, 128], strides = [1, 1]} : vector<24x128xf32> to vector<16x128xf32>
    %307 = arith.subf %306, %7 : vector<16x128xf32>
    %c20_i32_108 = arith.constant 20 : i32
    %308 = tpu.dynamic_rotate %55 by %c20_i32_108 dim 0 : vector<24x128xi32>, i32 -> vector<24x128xi32>
    %309 = vector.extract_strided_slice %308 {offsets = [0, 0], sizes = [16, 128], strides = [1, 1]} : vector<24x128xi32> to vector<16x128xi32>
    %310 = arith.subi %309, %17 : vector<16x128xi32>
    %311 = math.absi %310 : vector<16x128xi32>
    %c4_i32_109 = arith.constant 4 : i32
    %312 = vector.broadcast %c4_i32_109 : i32 to vector<16x128xi32>
    %313 = arith.cmpi eq, %311, %312 : vector<16x128xi32>
    %314 = arith.andi %257, %313 : vector<16x128xi1>
    %c16_i32_110 = arith.constant 16 : i32
    %315 = vector.broadcast %c16_i32_110 : i32 to vector<16x128xi32>
    %316 = arith.cmpi slt, %309, %315 : vector<16x128xi32>
    %317 = arith.andi %314, %316 : vector<16x128xi1>
    %318 = arith.extui %317 : vector<16x128xi1> to vector<16x128xi32>
    %319 = arith.sitofp %318 : vector<16x128xi32> to vector<16x128xf32>
    %320 = arith.mulf %319, %304 : vector<16x128xf32>
    %321 = arith.mulf %319, %307 : vector<16x128xf32>
    %cst_111 = arith.constant dense<0.000000e+00> : vector<128xf32>
    %322 = vector.multi_reduction <add>, %319, %cst_111 [0] : vector<16x128xf32> to vector<128xf32>
    %323 = vector.shape_cast %322 : vector<128xf32> to vector<1x128xf32>
    %cst_112 = arith.constant dense<0.000000e+00> : vector<1xf32>
    %324 = vector.multi_reduction <add>, %323, %cst_112 [1] : vector<1x128xf32> to vector<1xf32>
    %325 = vector.shape_cast %324 : vector<1xf32> to vector<1x1xf32>
    %cst_113 = arith.constant dense<0.000000e+00> : vector<128xf32>
    %326 = vector.multi_reduction <add>, %320, %cst_113 [0] : vector<16x128xf32> to vector<128xf32>
    %327 = vector.shape_cast %326 : vector<128xf32> to vector<1x128xf32>
    %cst_114 = arith.constant dense<0.000000e+00> : vector<1xf32>
    %328 = vector.multi_reduction <add>, %327, %cst_114 [1] : vector<1x128xf32> to vector<1xf32>
    %329 = vector.shape_cast %328 : vector<1xf32> to vector<1x1xf32>
    %cst_115 = arith.constant dense<0.000000e+00> : vector<128xf32>
    %330 = vector.multi_reduction <add>, %321, %cst_115 [0] : vector<16x128xf32> to vector<128xf32>
    %331 = vector.shape_cast %330 : vector<128xf32> to vector<1x128xf32>
    %cst_116 = arith.constant dense<0.000000e+00> : vector<1xf32>
    %332 = vector.multi_reduction <add>, %331, %cst_116 [1] : vector<1x128xf32> to vector<1xf32>
    %333 = vector.shape_cast %332 : vector<1xf32> to vector<1x1xf32>
    %334 = arith.mulf %320, %304 : vector<16x128xf32>
    %cst_117 = arith.constant dense<0.000000e+00> : vector<128xf32>
    %335 = vector.multi_reduction <add>, %334, %cst_117 [0] : vector<16x128xf32> to vector<128xf32>
    %336 = vector.shape_cast %335 : vector<128xf32> to vector<1x128xf32>
    %cst_118 = arith.constant dense<0.000000e+00> : vector<1xf32>
    %337 = vector.multi_reduction <add>, %336, %cst_118 [1] : vector<1x128xf32> to vector<1xf32>
    %338 = vector.shape_cast %337 : vector<1xf32> to vector<1x1xf32>
    %339 = arith.mulf %321, %307 : vector<16x128xf32>
    %cst_119 = arith.constant dense<0.000000e+00> : vector<128xf32>
    %340 = vector.multi_reduction <add>, %339, %cst_119 [0] : vector<16x128xf32> to vector<128xf32>
    %341 = vector.shape_cast %340 : vector<128xf32> to vector<1x128xf32>
    %cst_120 = arith.constant dense<0.000000e+00> : vector<1xf32>
    %342 = vector.multi_reduction <add>, %341, %cst_120 [1] : vector<1x128xf32> to vector<1xf32>
    %343 = vector.shape_cast %342 : vector<1xf32> to vector<1x1xf32>
    %344 = arith.mulf %320, %307 : vector<16x128xf32>
    %cst_121 = arith.constant dense<0.000000e+00> : vector<128xf32>
    %345 = vector.multi_reduction <add>, %344, %cst_121 [0] : vector<16x128xf32> to vector<128xf32>
    %346 = vector.shape_cast %345 : vector<128xf32> to vector<1x128xf32>
    %cst_122 = arith.constant dense<0.000000e+00> : vector<1xf32>
    %347 = vector.multi_reduction <add>, %346, %cst_122 [1] : vector<1x128xf32> to vector<1xf32>
    %348 = vector.shape_cast %347 : vector<1xf32> to vector<1x1xf32>
    %c4_i32_123 = arith.constant 4 : i32
    %349 = vector.broadcast %c4_i32_123 : i32 to vector<16x128xi32>
    %350 = arith.andi %17, %349 : vector<16x128xi32>
    %c0_i32_124 = arith.constant 0 : i32
    %351 = vector.broadcast %c0_i32_124 : i32 to vector<16x128xi32>
    %352 = arith.cmpi eq, %350, %351 : vector<16x128xi32>
    %353 = arith.andi %257, %352 : vector<16x128xi1>
    %c4_i32_125 = arith.constant 4 : i32
    %354 = vector.broadcast %c4_i32_125 : i32 to vector<16x128xi32>
    %355 = arith.andi %18, %354 : vector<16x128xi32>
    %c0_i32_126 = arith.constant 0 : i32
    %356 = vector.broadcast %c0_i32_126 : i32 to vector<16x128xi32>
    %357 = arith.cmpi eq, %355, %356 : vector<16x128xi32>
    %358 = arith.andi %353, %357 : vector<16x128xi1>
    %c120_i32 = arith.constant 120 : i32
    %359 = tpu.dynamic_rotate %4 by %c120_i32 dim 1 : vector<16x128xf32>, i32 -> vector<16x128xf32>
    %360 = arith.subf %359, %4 : vector<16x128xf32>
    %c120_i32_127 = arith.constant 120 : i32
    %361 = tpu.dynamic_rotate %7 by %c120_i32_127 dim 1 : vector<16x128xf32>, i32 -> vector<16x128xf32>
    %362 = arith.subf %361, %7 : vector<16x128xf32>
    %c120_i32_128 = arith.constant 120 : i32
    %363 = tpu.dynamic_rotate %18 by %c120_i32_128 dim 1 : vector<16x128xi32>, i32 -> vector<16x128xi32>
    %364 = arith.subi %363, %18 : vector<16x128xi32>
    %365 = math.absi %364 : vector<16x128xi32>
    %c8_i32 = arith.constant 8 : i32
    %366 = vector.broadcast %c8_i32 : i32 to vector<16x128xi32>
    %367 = arith.cmpi eq, %365, %366 : vector<16x128xi32>
    %368 = arith.andi %358, %367 : vector<16x128xi1>
    %c128_i32_129 = arith.constant 128 : i32
    %369 = vector.broadcast %c128_i32_129 : i32 to vector<16x128xi32>
    %370 = arith.cmpi slt, %363, %369 : vector<16x128xi32>
    %371 = arith.andi %368, %370 : vector<16x128xi1>
    %372 = arith.extui %371 : vector<16x128xi1> to vector<16x128xi32>
    %373 = arith.sitofp %372 : vector<16x128xi32> to vector<16x128xf32>
    %374 = arith.mulf %373, %360 : vector<16x128xf32>
    %375 = arith.mulf %373, %362 : vector<16x128xf32>
    %cst_130 = arith.constant dense<0.000000e+00> : vector<128xf32>
    %376 = vector.multi_reduction <add>, %373, %cst_130 [0] : vector<16x128xf32> to vector<128xf32>
    %377 = vector.shape_cast %376 : vector<128xf32> to vector<1x128xf32>
    %cst_131 = arith.constant dense<0.000000e+00> : vector<1xf32>
    %378 = vector.multi_reduction <add>, %377, %cst_131 [1] : vector<1x128xf32> to vector<1xf32>
    %379 = vector.shape_cast %378 : vector<1xf32> to vector<1x1xf32>
    %cst_132 = arith.constant dense<0.000000e+00> : vector<128xf32>
    %380 = vector.multi_reduction <add>, %374, %cst_132 [0] : vector<16x128xf32> to vector<128xf32>
    %381 = vector.shape_cast %380 : vector<128xf32> to vector<1x128xf32>
    %cst_133 = arith.constant dense<0.000000e+00> : vector<1xf32>
    %382 = vector.multi_reduction <add>, %381, %cst_133 [1] : vector<1x128xf32> to vector<1xf32>
    %383 = vector.shape_cast %382 : vector<1xf32> to vector<1x1xf32>
    %cst_134 = arith.constant dense<0.000000e+00> : vector<128xf32>
    %384 = vector.multi_reduction <add>, %375, %cst_134 [0] : vector<16x128xf32> to vector<128xf32>
    %385 = vector.shape_cast %384 : vector<128xf32> to vector<1x128xf32>
    %cst_135 = arith.constant dense<0.000000e+00> : vector<1xf32>
    %386 = vector.multi_reduction <add>, %385, %cst_135 [1] : vector<1x128xf32> to vector<1xf32>
    %387 = vector.shape_cast %386 : vector<1xf32> to vector<1x1xf32>
    %388 = arith.mulf %374, %360 : vector<16x128xf32>
    %cst_136 = arith.constant dense<0.000000e+00> : vector<128xf32>
    %389 = vector.multi_reduction <add>, %388, %cst_136 [0] : vector<16x128xf32> to vector<128xf32>
    %390 = vector.shape_cast %389 : vector<128xf32> to vector<1x128xf32>
    %cst_137 = arith.constant dense<0.000000e+00> : vector<1xf32>
    %391 = vector.multi_reduction <add>, %390, %cst_137 [1] : vector<1x128xf32> to vector<1xf32>
    %392 = vector.shape_cast %391 : vector<1xf32> to vector<1x1xf32>
    %393 = arith.mulf %375, %362 : vector<16x128xf32>
    %cst_138 = arith.constant dense<0.000000e+00> : vector<128xf32>
    %394 = vector.multi_reduction <add>, %393, %cst_138 [0] : vector<16x128xf32> to vector<128xf32>
    %395 = vector.shape_cast %394 : vector<128xf32> to vector<1x128xf32>
    %cst_139 = arith.constant dense<0.000000e+00> : vector<1xf32>
    %396 = vector.multi_reduction <add>, %395, %cst_139 [1] : vector<1x128xf32> to vector<1xf32>
    %397 = vector.shape_cast %396 : vector<1xf32> to vector<1x1xf32>
    %398 = arith.mulf %374, %362 : vector<16x128xf32>
    %cst_140 = arith.constant dense<0.000000e+00> : vector<128xf32>
    %399 = vector.multi_reduction <add>, %398, %cst_140 [0] : vector<16x128xf32> to vector<128xf32>
    %400 = vector.shape_cast %399 : vector<128xf32> to vector<1x128xf32>
    %cst_141 = arith.constant dense<0.000000e+00> : vector<1xf32>
    %401 = vector.multi_reduction <add>, %400, %cst_141 [1] : vector<1x128xf32> to vector<1xf32>
    %402 = vector.shape_cast %401 : vector<1xf32> to vector<1x1xf32>
    %c16_i32_142 = arith.constant 16 : i32
    %403 = tpu.dynamic_rotate %48 by %c16_i32_142 dim 0 : vector<24x128xf32>, i32 -> vector<24x128xf32>
    %404 = vector.extract_strided_slice %403 {offsets = [0, 0], sizes = [16, 128], strides = [1, 1]} : vector<24x128xf32> to vector<16x128xf32>
    %405 = arith.subf %404, %4 : vector<16x128xf32>
    %c16_i32_143 = arith.constant 16 : i32
    %406 = tpu.dynamic_rotate %49 by %c16_i32_143 dim 0 : vector<24x128xf32>, i32 -> vector<24x128xf32>
    %407 = vector.extract_strided_slice %406 {offsets = [0, 0], sizes = [16, 128], strides = [1, 1]} : vector<24x128xf32> to vector<16x128xf32>
    %408 = arith.subf %407, %7 : vector<16x128xf32>
    %c16_i32_144 = arith.constant 16 : i32
    %409 = tpu.dynamic_rotate %55 by %c16_i32_144 dim 0 : vector<24x128xi32>, i32 -> vector<24x128xi32>
    %410 = vector.extract_strided_slice %409 {offsets = [0, 0], sizes = [16, 128], strides = [1, 1]} : vector<24x128xi32> to vector<16x128xi32>
    %411 = arith.subi %410, %17 : vector<16x128xi32>
    %412 = math.absi %411 : vector<16x128xi32>
    %c8_i32_145 = arith.constant 8 : i32
    %413 = vector.broadcast %c8_i32_145 : i32 to vector<16x128xi32>
    %414 = arith.cmpi eq, %412, %413 : vector<16x128xi32>
    %415 = arith.andi %358, %414 : vector<16x128xi1>
    %c16_i32_146 = arith.constant 16 : i32
    %416 = vector.broadcast %c16_i32_146 : i32 to vector<16x128xi32>
    %417 = arith.cmpi slt, %410, %416 : vector<16x128xi32>
    %418 = arith.andi %415, %417 : vector<16x128xi1>
    %419 = arith.extui %418 : vector<16x128xi1> to vector<16x128xi32>
    %420 = arith.sitofp %419 : vector<16x128xi32> to vector<16x128xf32>
    %421 = arith.mulf %420, %405 : vector<16x128xf32>
    %422 = arith.mulf %420, %408 : vector<16x128xf32>
    %cst_147 = arith.constant dense<0.000000e+00> : vector<128xf32>
    %423 = vector.multi_reduction <add>, %420, %cst_147 [0] : vector<16x128xf32> to vector<128xf32>
    %424 = vector.shape_cast %423 : vector<128xf32> to vector<1x128xf32>
    %cst_148 = arith.constant dense<0.000000e+00> : vector<1xf32>
    %425 = vector.multi_reduction <add>, %424, %cst_148 [1] : vector<1x128xf32> to vector<1xf32>
    %426 = vector.shape_cast %425 : vector<1xf32> to vector<1x1xf32>
    %cst_149 = arith.constant dense<0.000000e+00> : vector<128xf32>
    %427 = vector.multi_reduction <add>, %421, %cst_149 [0] : vector<16x128xf32> to vector<128xf32>
    %428 = vector.shape_cast %427 : vector<128xf32> to vector<1x128xf32>
    %cst_150 = arith.constant dense<0.000000e+00> : vector<1xf32>
    %429 = vector.multi_reduction <add>, %428, %cst_150 [1] : vector<1x128xf32> to vector<1xf32>
    %430 = vector.shape_cast %429 : vector<1xf32> to vector<1x1xf32>
    %cst_151 = arith.constant dense<0.000000e+00> : vector<128xf32>
    %431 = vector.multi_reduction <add>, %422, %cst_151 [0] : vector<16x128xf32> to vector<128xf32>
    %432 = vector.shape_cast %431 : vector<128xf32> to vector<1x128xf32>
    %cst_152 = arith.constant dense<0.000000e+00> : vector<1xf32>
    %433 = vector.multi_reduction <add>, %432, %cst_152 [1] : vector<1x128xf32> to vector<1xf32>
    %434 = vector.shape_cast %433 : vector<1xf32> to vector<1x1xf32>
    %435 = arith.mulf %421, %405 : vector<16x128xf32>
    %cst_153 = arith.constant dense<0.000000e+00> : vector<128xf32>
    %436 = vector.multi_reduction <add>, %435, %cst_153 [0] : vector<16x128xf32> to vector<128xf32>
    %437 = vector.shape_cast %436 : vector<128xf32> to vector<1x128xf32>
    %cst_154 = arith.constant dense<0.000000e+00> : vector<1xf32>
    %438 = vector.multi_reduction <add>, %437, %cst_154 [1] : vector<1x128xf32> to vector<1xf32>
    %439 = vector.shape_cast %438 : vector<1xf32> to vector<1x1xf32>
    %440 = arith.mulf %422, %408 : vector<16x128xf32>
    %cst_155 = arith.constant dense<0.000000e+00> : vector<128xf32>
    %441 = vector.multi_reduction <add>, %440, %cst_155 [0] : vector<16x128xf32> to vector<128xf32>
    %442 = vector.shape_cast %441 : vector<128xf32> to vector<1x128xf32>
    %cst_156 = arith.constant dense<0.000000e+00> : vector<1xf32>
    %443 = vector.multi_reduction <add>, %442, %cst_156 [1] : vector<1x128xf32> to vector<1xf32>
    %444 = vector.shape_cast %443 : vector<1xf32> to vector<1x1xf32>
    %445 = arith.mulf %421, %408 : vector<16x128xf32>
    %cst_157 = arith.constant dense<0.000000e+00> : vector<128xf32>
    %446 = vector.multi_reduction <add>, %445, %cst_157 [0] : vector<16x128xf32> to vector<128xf32>
    %447 = vector.shape_cast %446 : vector<128xf32> to vector<1x128xf32>
    %cst_158 = arith.constant dense<0.000000e+00> : vector<1xf32>
    %448 = vector.multi_reduction <add>, %447, %cst_158 [1] : vector<1x128xf32> to vector<1xf32>
    %449 = vector.shape_cast %448 : vector<1xf32> to vector<1x1xf32>
    %450 = tpu.iota {dimensions = array<i32: 0>} : vector<6x9xi32>
    %451 = tpu.iota {dimensions = array<i32: 1>} : vector<6x9xi32>
    %cst_159 = arith.constant 0.000000e+00 : f32
    %452 = vector.broadcast %cst_159 : f32 to vector<6x9xf32>
    %c0_i32_160 = arith.constant 0 : i32
    %453 = vector.broadcast %c0_i32_160 : i32 to vector<6x9xi32>
    %454 = arith.cmpi eq, %451, %453 : vector<6x9xi32>
    %c0_i32_161 = arith.constant 0 : i32
    %455 = vector.broadcast %c0_i32_161 : i32 to vector<6x9xi32>
    %456 = arith.cmpi eq, %450, %455 : vector<6x9xi32>
    %457 = arith.andi %454, %456 : vector<6x9xi1>
    %cst_162 = arith.constant 0.000000e+00 : f32
    %458 = vector.shape_cast %24 : vector<1x1xf32> to vector<1x1xf32>
    %459 = vector.broadcast %458 : vector<1x1xf32> to vector<6x9xf32>
    %460 = vector.broadcast %cst_162 : f32 to vector<6x9xf32>
    %461 = arith.select %457, %459, %460 : vector<6x9xi1>, vector<6x9xf32>
    %462 = arith.addf %452, %461 : vector<6x9xf32>
    %c1_i32_163 = arith.constant 1 : i32
    %463 = vector.broadcast %c1_i32_163 : i32 to vector<6x9xi32>
    %464 = arith.cmpi eq, %450, %463 : vector<6x9xi32>
    %465 = arith.andi %454, %464 : vector<6x9xi1>
    %cst_164 = arith.constant 0.000000e+00 : f32
    %466 = vector.shape_cast %28 : vector<1x1xf32> to vector<1x1xf32>
    %467 = vector.broadcast %466 : vector<1x1xf32> to vector<6x9xf32>
    %468 = vector.broadcast %cst_164 : f32 to vector<6x9xf32>
    %469 = arith.select %465, %467, %468 : vector<6x9xi1>, vector<6x9xf32>
    %470 = arith.addf %462, %469 : vector<6x9xf32>
    %c2_i32_165 = arith.constant 2 : i32
    %471 = vector.broadcast %c2_i32_165 : i32 to vector<6x9xi32>
    %472 = arith.cmpi eq, %450, %471 : vector<6x9xi32>
    %473 = arith.andi %454, %472 : vector<6x9xi1>
    %cst_166 = arith.constant 0.000000e+00 : f32
    %474 = vector.shape_cast %32 : vector<1x1xf32> to vector<1x1xf32>
    %475 = vector.broadcast %474 : vector<1x1xf32> to vector<6x9xf32>
    %476 = vector.broadcast %cst_166 : f32 to vector<6x9xf32>
    %477 = arith.select %473, %475, %476 : vector<6x9xi1>, vector<6x9xf32>
    %478 = arith.addf %470, %477 : vector<6x9xf32>
    %c3_i32 = arith.constant 3 : i32
    %479 = vector.broadcast %c3_i32 : i32 to vector<6x9xi32>
    %480 = arith.cmpi eq, %450, %479 : vector<6x9xi32>
    %481 = arith.andi %454, %480 : vector<6x9xi1>
    %cst_167 = arith.constant 0.000000e+00 : f32
    %482 = vector.shape_cast %37 : vector<1x1xf32> to vector<1x1xf32>
    %483 = vector.broadcast %482 : vector<1x1xf32> to vector<6x9xf32>
    %484 = vector.broadcast %cst_167 : f32 to vector<6x9xf32>
    %485 = arith.select %481, %483, %484 : vector<6x9xi1>, vector<6x9xf32>
    %486 = arith.addf %478, %485 : vector<6x9xf32>
    %c4_i32_168 = arith.constant 4 : i32
    %487 = vector.broadcast %c4_i32_168 : i32 to vector<6x9xi32>
    %488 = arith.cmpi eq, %450, %487 : vector<6x9xi32>
    %489 = arith.andi %454, %488 : vector<6x9xi1>
    %cst_169 = arith.constant 0.000000e+00 : f32
    %490 = vector.shape_cast %42 : vector<1x1xf32> to vector<1x1xf32>
    %491 = vector.broadcast %490 : vector<1x1xf32> to vector<6x9xf32>
    %492 = vector.broadcast %cst_169 : f32 to vector<6x9xf32>
    %493 = arith.select %489, %491, %492 : vector<6x9xi1>, vector<6x9xf32>
    %494 = arith.addf %486, %493 : vector<6x9xf32>
    %c5_i32 = arith.constant 5 : i32
    %495 = vector.broadcast %c5_i32 : i32 to vector<6x9xi32>
    %496 = arith.cmpi eq, %450, %495 : vector<6x9xi32>
    %497 = arith.andi %454, %496 : vector<6x9xi1>
    %cst_170 = arith.constant 0.000000e+00 : f32
    %498 = vector.shape_cast %47 : vector<1x1xf32> to vector<1x1xf32>
    %499 = vector.broadcast %498 : vector<1x1xf32> to vector<6x9xf32>
    %500 = vector.broadcast %cst_170 : f32 to vector<6x9xf32>
    %501 = arith.select %497, %499, %500 : vector<6x9xi1>, vector<6x9xf32>
    %502 = arith.addf %494, %501 : vector<6x9xf32>
    %c1_i32_171 = arith.constant 1 : i32
    %503 = vector.broadcast %c1_i32_171 : i32 to vector<6x9xi32>
    %504 = arith.cmpi eq, %451, %503 : vector<6x9xi32>
    %c0_i32_172 = arith.constant 0 : i32
    %505 = vector.broadcast %c0_i32_172 : i32 to vector<6x9xi32>
    %506 = arith.cmpi eq, %450, %505 : vector<6x9xi32>
    %507 = arith.andi %504, %506 : vector<6x9xi1>
    %cst_173 = arith.constant 0.000000e+00 : f32
    %508 = vector.shape_cast %76 : vector<1x1xf32> to vector<1x1xf32>
    %509 = vector.broadcast %508 : vector<1x1xf32> to vector<6x9xf32>
    %510 = vector.broadcast %cst_173 : f32 to vector<6x9xf32>
    %511 = arith.select %507, %509, %510 : vector<6x9xi1>, vector<6x9xf32>
    %512 = arith.addf %502, %511 : vector<6x9xf32>
    %c1_i32_174 = arith.constant 1 : i32
    %513 = vector.broadcast %c1_i32_174 : i32 to vector<6x9xi32>
    %514 = arith.cmpi eq, %450, %513 : vector<6x9xi32>
    %515 = arith.andi %504, %514 : vector<6x9xi1>
    %cst_175 = arith.constant 0.000000e+00 : f32
    %516 = vector.shape_cast %80 : vector<1x1xf32> to vector<1x1xf32>
    %517 = vector.broadcast %516 : vector<1x1xf32> to vector<6x9xf32>
    %518 = vector.broadcast %cst_175 : f32 to vector<6x9xf32>
    %519 = arith.select %515, %517, %518 : vector<6x9xi1>, vector<6x9xf32>
    %520 = arith.addf %512, %519 : vector<6x9xf32>
    %c2_i32_176 = arith.constant 2 : i32
    %521 = vector.broadcast %c2_i32_176 : i32 to vector<6x9xi32>
    %522 = arith.cmpi eq, %450, %521 : vector<6x9xi32>
    %523 = arith.andi %504, %522 : vector<6x9xi1>
    %cst_177 = arith.constant 0.000000e+00 : f32
    %524 = vector.shape_cast %84 : vector<1x1xf32> to vector<1x1xf32>
    %525 = vector.broadcast %524 : vector<1x1xf32> to vector<6x9xf32>
    %526 = vector.broadcast %cst_177 : f32 to vector<6x9xf32>
    %527 = arith.select %523, %525, %526 : vector<6x9xi1>, vector<6x9xf32>
    %528 = arith.addf %520, %527 : vector<6x9xf32>
    %c3_i32_178 = arith.constant 3 : i32
    %529 = vector.broadcast %c3_i32_178 : i32 to vector<6x9xi32>
    %530 = arith.cmpi eq, %450, %529 : vector<6x9xi32>
    %531 = arith.andi %504, %530 : vector<6x9xi1>
    %cst_179 = arith.constant 0.000000e+00 : f32
    %532 = vector.shape_cast %89 : vector<1x1xf32> to vector<1x1xf32>
    %533 = vector.broadcast %532 : vector<1x1xf32> to vector<6x9xf32>
    %534 = vector.broadcast %cst_179 : f32 to vector<6x9xf32>
    %535 = arith.select %531, %533, %534 : vector<6x9xi1>, vector<6x9xf32>
    %536 = arith.addf %528, %535 : vector<6x9xf32>
    %c4_i32_180 = arith.constant 4 : i32
    %537 = vector.broadcast %c4_i32_180 : i32 to vector<6x9xi32>
    %538 = arith.cmpi eq, %450, %537 : vector<6x9xi32>
    %539 = arith.andi %504, %538 : vector<6x9xi1>
    %cst_181 = arith.constant 0.000000e+00 : f32
    %540 = vector.shape_cast %94 : vector<1x1xf32> to vector<1x1xf32>
    %541 = vector.broadcast %540 : vector<1x1xf32> to vector<6x9xf32>
    %542 = vector.broadcast %cst_181 : f32 to vector<6x9xf32>
    %543 = arith.select %539, %541, %542 : vector<6x9xi1>, vector<6x9xf32>
    %544 = arith.addf %536, %543 : vector<6x9xf32>
    %c5_i32_182 = arith.constant 5 : i32
    %545 = vector.broadcast %c5_i32_182 : i32 to vector<6x9xi32>
    %546 = arith.cmpi eq, %450, %545 : vector<6x9xi32>
    %547 = arith.andi %504, %546 : vector<6x9xi1>
    %cst_183 = arith.constant 0.000000e+00 : f32
    %548 = vector.shape_cast %99 : vector<1x1xf32> to vector<1x1xf32>
    %549 = vector.broadcast %548 : vector<1x1xf32> to vector<6x9xf32>
    %550 = vector.broadcast %cst_183 : f32 to vector<6x9xf32>
    %551 = arith.select %547, %549, %550 : vector<6x9xi1>, vector<6x9xf32>
    %552 = arith.addf %544, %551 : vector<6x9xf32>
    %c2_i32_184 = arith.constant 2 : i32
    %553 = vector.broadcast %c2_i32_184 : i32 to vector<6x9xi32>
    %554 = arith.cmpi eq, %451, %553 : vector<6x9xi32>
    %c0_i32_185 = arith.constant 0 : i32
    %555 = vector.broadcast %c0_i32_185 : i32 to vector<6x9xi32>
    %556 = arith.cmpi eq, %450, %555 : vector<6x9xi32>
    %557 = arith.andi %554, %556 : vector<6x9xi1>
    %cst_186 = arith.constant 0.000000e+00 : f32
    %558 = vector.shape_cast %123 : vector<1x1xf32> to vector<1x1xf32>
    %559 = vector.broadcast %558 : vector<1x1xf32> to vector<6x9xf32>
    %560 = vector.broadcast %cst_186 : f32 to vector<6x9xf32>
    %561 = arith.select %557, %559, %560 : vector<6x9xi1>, vector<6x9xf32>
    %562 = arith.addf %552, %561 : vector<6x9xf32>
    %c1_i32_187 = arith.constant 1 : i32
    %563 = vector.broadcast %c1_i32_187 : i32 to vector<6x9xi32>
    %564 = arith.cmpi eq, %450, %563 : vector<6x9xi32>
    %565 = arith.andi %554, %564 : vector<6x9xi1>
    %cst_188 = arith.constant 0.000000e+00 : f32
    %566 = vector.shape_cast %127 : vector<1x1xf32> to vector<1x1xf32>
    %567 = vector.broadcast %566 : vector<1x1xf32> to vector<6x9xf32>
    %568 = vector.broadcast %cst_188 : f32 to vector<6x9xf32>
    %569 = arith.select %565, %567, %568 : vector<6x9xi1>, vector<6x9xf32>
    %570 = arith.addf %562, %569 : vector<6x9xf32>
    %c2_i32_189 = arith.constant 2 : i32
    %571 = vector.broadcast %c2_i32_189 : i32 to vector<6x9xi32>
    %572 = arith.cmpi eq, %450, %571 : vector<6x9xi32>
    %573 = arith.andi %554, %572 : vector<6x9xi1>
    %cst_190 = arith.constant 0.000000e+00 : f32
    %574 = vector.shape_cast %131 : vector<1x1xf32> to vector<1x1xf32>
    %575 = vector.broadcast %574 : vector<1x1xf32> to vector<6x9xf32>
    %576 = vector.broadcast %cst_190 : f32 to vector<6x9xf32>
    %577 = arith.select %573, %575, %576 : vector<6x9xi1>, vector<6x9xf32>
    %578 = arith.addf %570, %577 : vector<6x9xf32>
    %c3_i32_191 = arith.constant 3 : i32
    %579 = vector.broadcast %c3_i32_191 : i32 to vector<6x9xi32>
    %580 = arith.cmpi eq, %450, %579 : vector<6x9xi32>
    %581 = arith.andi %554, %580 : vector<6x9xi1>
    %cst_192 = arith.constant 0.000000e+00 : f32
    %582 = vector.shape_cast %136 : vector<1x1xf32> to vector<1x1xf32>
    %583 = vector.broadcast %582 : vector<1x1xf32> to vector<6x9xf32>
    %584 = vector.broadcast %cst_192 : f32 to vector<6x9xf32>
    %585 = arith.select %581, %583, %584 : vector<6x9xi1>, vector<6x9xf32>
    %586 = arith.addf %578, %585 : vector<6x9xf32>
    %c4_i32_193 = arith.constant 4 : i32
    %587 = vector.broadcast %c4_i32_193 : i32 to vector<6x9xi32>
    %588 = arith.cmpi eq, %450, %587 : vector<6x9xi32>
    %589 = arith.andi %554, %588 : vector<6x9xi1>
    %cst_194 = arith.constant 0.000000e+00 : f32
    %590 = vector.shape_cast %141 : vector<1x1xf32> to vector<1x1xf32>
    %591 = vector.broadcast %590 : vector<1x1xf32> to vector<6x9xf32>
    %592 = vector.broadcast %cst_194 : f32 to vector<6x9xf32>
    %593 = arith.select %589, %591, %592 : vector<6x9xi1>, vector<6x9xf32>
    %594 = arith.addf %586, %593 : vector<6x9xf32>
    %c5_i32_195 = arith.constant 5 : i32
    %595 = vector.broadcast %c5_i32_195 : i32 to vector<6x9xi32>
    %596 = arith.cmpi eq, %450, %595 : vector<6x9xi32>
    %597 = arith.andi %554, %596 : vector<6x9xi1>
    %cst_196 = arith.constant 0.000000e+00 : f32
    %598 = vector.shape_cast %146 : vector<1x1xf32> to vector<1x1xf32>
    %599 = vector.broadcast %598 : vector<1x1xf32> to vector<6x9xf32>
    %600 = vector.broadcast %cst_196 : f32 to vector<6x9xf32>
    %601 = arith.select %597, %599, %600 : vector<6x9xi1>, vector<6x9xf32>
    %602 = arith.addf %594, %601 : vector<6x9xf32>
    %c3_i32_197 = arith.constant 3 : i32
    %603 = vector.broadcast %c3_i32_197 : i32 to vector<6x9xi32>
    %604 = arith.cmpi eq, %451, %603 : vector<6x9xi32>
    %c0_i32_198 = arith.constant 0 : i32
    %605 = vector.broadcast %c0_i32_198 : i32 to vector<6x9xi32>
    %606 = arith.cmpi eq, %450, %605 : vector<6x9xi32>
    %607 = arith.andi %604, %606 : vector<6x9xi1>
    %cst_199 = arith.constant 0.000000e+00 : f32
    %608 = vector.shape_cast %177 : vector<1x1xf32> to vector<1x1xf32>
    %609 = vector.broadcast %608 : vector<1x1xf32> to vector<6x9xf32>
    %610 = vector.broadcast %cst_199 : f32 to vector<6x9xf32>
    %611 = arith.select %607, %609, %610 : vector<6x9xi1>, vector<6x9xf32>
    %612 = arith.addf %602, %611 : vector<6x9xf32>
    %c1_i32_200 = arith.constant 1 : i32
    %613 = vector.broadcast %c1_i32_200 : i32 to vector<6x9xi32>
    %614 = arith.cmpi eq, %450, %613 : vector<6x9xi32>
    %615 = arith.andi %604, %614 : vector<6x9xi1>
    %cst_201 = arith.constant 0.000000e+00 : f32
    %616 = vector.shape_cast %181 : vector<1x1xf32> to vector<1x1xf32>
    %617 = vector.broadcast %616 : vector<1x1xf32> to vector<6x9xf32>
    %618 = vector.broadcast %cst_201 : f32 to vector<6x9xf32>
    %619 = arith.select %615, %617, %618 : vector<6x9xi1>, vector<6x9xf32>
    %620 = arith.addf %612, %619 : vector<6x9xf32>
    %c2_i32_202 = arith.constant 2 : i32
    %621 = vector.broadcast %c2_i32_202 : i32 to vector<6x9xi32>
    %622 = arith.cmpi eq, %450, %621 : vector<6x9xi32>
    %623 = arith.andi %604, %622 : vector<6x9xi1>
    %cst_203 = arith.constant 0.000000e+00 : f32
    %624 = vector.shape_cast %185 : vector<1x1xf32> to vector<1x1xf32>
    %625 = vector.broadcast %624 : vector<1x1xf32> to vector<6x9xf32>
    %626 = vector.broadcast %cst_203 : f32 to vector<6x9xf32>
    %627 = arith.select %623, %625, %626 : vector<6x9xi1>, vector<6x9xf32>
    %628 = arith.addf %620, %627 : vector<6x9xf32>
    %c3_i32_204 = arith.constant 3 : i32
    %629 = vector.broadcast %c3_i32_204 : i32 to vector<6x9xi32>
    %630 = arith.cmpi eq, %450, %629 : vector<6x9xi32>
    %631 = arith.andi %604, %630 : vector<6x9xi1>
    %cst_205 = arith.constant 0.000000e+00 : f32
    %632 = vector.shape_cast %190 : vector<1x1xf32> to vector<1x1xf32>
    %633 = vector.broadcast %632 : vector<1x1xf32> to vector<6x9xf32>
    %634 = vector.broadcast %cst_205 : f32 to vector<6x9xf32>
    %635 = arith.select %631, %633, %634 : vector<6x9xi1>, vector<6x9xf32>
    %636 = arith.addf %628, %635 : vector<6x9xf32>
    %c4_i32_206 = arith.constant 4 : i32
    %637 = vector.broadcast %c4_i32_206 : i32 to vector<6x9xi32>
    %638 = arith.cmpi eq, %450, %637 : vector<6x9xi32>
    %639 = arith.andi %604, %638 : vector<6x9xi1>
    %cst_207 = arith.constant 0.000000e+00 : f32
    %640 = vector.shape_cast %195 : vector<1x1xf32> to vector<1x1xf32>
    %641 = vector.broadcast %640 : vector<1x1xf32> to vector<6x9xf32>
    %642 = vector.broadcast %cst_207 : f32 to vector<6x9xf32>
    %643 = arith.select %639, %641, %642 : vector<6x9xi1>, vector<6x9xf32>
    %644 = arith.addf %636, %643 : vector<6x9xf32>
    %c5_i32_208 = arith.constant 5 : i32
    %645 = vector.broadcast %c5_i32_208 : i32 to vector<6x9xi32>
    %646 = arith.cmpi eq, %450, %645 : vector<6x9xi32>
    %647 = arith.andi %604, %646 : vector<6x9xi1>
    %cst_209 = arith.constant 0.000000e+00 : f32
    %648 = vector.shape_cast %200 : vector<1x1xf32> to vector<1x1xf32>
    %649 = vector.broadcast %648 : vector<1x1xf32> to vector<6x9xf32>
    %650 = vector.broadcast %cst_209 : f32 to vector<6x9xf32>
    %651 = arith.select %647, %649, %650 : vector<6x9xi1>, vector<6x9xf32>
    %652 = arith.addf %644, %651 : vector<6x9xf32>
    %c4_i32_210 = arith.constant 4 : i32
    %653 = vector.broadcast %c4_i32_210 : i32 to vector<6x9xi32>
    %654 = arith.cmpi eq, %451, %653 : vector<6x9xi32>
    %c0_i32_211 = arith.constant 0 : i32
    %655 = vector.broadcast %c0_i32_211 : i32 to vector<6x9xi32>
    %656 = arith.cmpi eq, %450, %655 : vector<6x9xi32>
    %657 = arith.andi %654, %656 : vector<6x9xi1>
    %cst_212 = arith.constant 0.000000e+00 : f32
    %658 = vector.shape_cast %224 : vector<1x1xf32> to vector<1x1xf32>
    %659 = vector.broadcast %658 : vector<1x1xf32> to vector<6x9xf32>
    %660 = vector.broadcast %cst_212 : f32 to vector<6x9xf32>
    %661 = arith.select %657, %659, %660 : vector<6x9xi1>, vector<6x9xf32>
    %662 = arith.addf %652, %661 : vector<6x9xf32>
    %c1_i32_213 = arith.constant 1 : i32
    %663 = vector.broadcast %c1_i32_213 : i32 to vector<6x9xi32>
    %664 = arith.cmpi eq, %450, %663 : vector<6x9xi32>
    %665 = arith.andi %654, %664 : vector<6x9xi1>
    %cst_214 = arith.constant 0.000000e+00 : f32
    %666 = vector.shape_cast %228 : vector<1x1xf32> to vector<1x1xf32>
    %667 = vector.broadcast %666 : vector<1x1xf32> to vector<6x9xf32>
    %668 = vector.broadcast %cst_214 : f32 to vector<6x9xf32>
    %669 = arith.select %665, %667, %668 : vector<6x9xi1>, vector<6x9xf32>
    %670 = arith.addf %662, %669 : vector<6x9xf32>
    %c2_i32_215 = arith.constant 2 : i32
    %671 = vector.broadcast %c2_i32_215 : i32 to vector<6x9xi32>
    %672 = arith.cmpi eq, %450, %671 : vector<6x9xi32>
    %673 = arith.andi %654, %672 : vector<6x9xi1>
    %cst_216 = arith.constant 0.000000e+00 : f32
    %674 = vector.shape_cast %232 : vector<1x1xf32> to vector<1x1xf32>
    %675 = vector.broadcast %674 : vector<1x1xf32> to vector<6x9xf32>
    %676 = vector.broadcast %cst_216 : f32 to vector<6x9xf32>
    %677 = arith.select %673, %675, %676 : vector<6x9xi1>, vector<6x9xf32>
    %678 = arith.addf %670, %677 : vector<6x9xf32>
    %c3_i32_217 = arith.constant 3 : i32
    %679 = vector.broadcast %c3_i32_217 : i32 to vector<6x9xi32>
    %680 = arith.cmpi eq, %450, %679 : vector<6x9xi32>
    %681 = arith.andi %654, %680 : vector<6x9xi1>
    %cst_218 = arith.constant 0.000000e+00 : f32
    %682 = vector.shape_cast %237 : vector<1x1xf32> to vector<1x1xf32>
    %683 = vector.broadcast %682 : vector<1x1xf32> to vector<6x9xf32>
    %684 = vector.broadcast %cst_218 : f32 to vector<6x9xf32>
    %685 = arith.select %681, %683, %684 : vector<6x9xi1>, vector<6x9xf32>
    %686 = arith.addf %678, %685 : vector<6x9xf32>
    %c4_i32_219 = arith.constant 4 : i32
    %687 = vector.broadcast %c4_i32_219 : i32 to vector<6x9xi32>
    %688 = arith.cmpi eq, %450, %687 : vector<6x9xi32>
    %689 = arith.andi %654, %688 : vector<6x9xi1>
    %cst_220 = arith.constant 0.000000e+00 : f32
    %690 = vector.shape_cast %242 : vector<1x1xf32> to vector<1x1xf32>
    %691 = vector.broadcast %690 : vector<1x1xf32> to vector<6x9xf32>
    %692 = vector.broadcast %cst_220 : f32 to vector<6x9xf32>
    %693 = arith.select %689, %691, %692 : vector<6x9xi1>, vector<6x9xf32>
    %694 = arith.addf %686, %693 : vector<6x9xf32>
    %c5_i32_221 = arith.constant 5 : i32
    %695 = vector.broadcast %c5_i32_221 : i32 to vector<6x9xi32>
    %696 = arith.cmpi eq, %450, %695 : vector<6x9xi32>
    %697 = arith.andi %654, %696 : vector<6x9xi1>
    %cst_222 = arith.constant 0.000000e+00 : f32
    %698 = vector.shape_cast %247 : vector<1x1xf32> to vector<1x1xf32>
    %699 = vector.broadcast %698 : vector<1x1xf32> to vector<6x9xf32>
    %700 = vector.broadcast %cst_222 : f32 to vector<6x9xf32>
    %701 = arith.select %697, %699, %700 : vector<6x9xi1>, vector<6x9xf32>
    %702 = arith.addf %694, %701 : vector<6x9xf32>
    %c5_i32_223 = arith.constant 5 : i32
    %703 = vector.broadcast %c5_i32_223 : i32 to vector<6x9xi32>
    %704 = arith.cmpi eq, %451, %703 : vector<6x9xi32>
    %c0_i32_224 = arith.constant 0 : i32
    %705 = vector.broadcast %c0_i32_224 : i32 to vector<6x9xi32>
    %706 = arith.cmpi eq, %450, %705 : vector<6x9xi32>
    %707 = arith.andi %704, %706 : vector<6x9xi1>
    %cst_225 = arith.constant 0.000000e+00 : f32
    %708 = vector.shape_cast %278 : vector<1x1xf32> to vector<1x1xf32>
    %709 = vector.broadcast %708 : vector<1x1xf32> to vector<6x9xf32>
    %710 = vector.broadcast %cst_225 : f32 to vector<6x9xf32>
    %711 = arith.select %707, %709, %710 : vector<6x9xi1>, vector<6x9xf32>
    %712 = arith.addf %702, %711 : vector<6x9xf32>
    %c1_i32_226 = arith.constant 1 : i32
    %713 = vector.broadcast %c1_i32_226 : i32 to vector<6x9xi32>
    %714 = arith.cmpi eq, %450, %713 : vector<6x9xi32>
    %715 = arith.andi %704, %714 : vector<6x9xi1>
    %cst_227 = arith.constant 0.000000e+00 : f32
    %716 = vector.shape_cast %282 : vector<1x1xf32> to vector<1x1xf32>
    %717 = vector.broadcast %716 : vector<1x1xf32> to vector<6x9xf32>
    %718 = vector.broadcast %cst_227 : f32 to vector<6x9xf32>
    %719 = arith.select %715, %717, %718 : vector<6x9xi1>, vector<6x9xf32>
    %720 = arith.addf %712, %719 : vector<6x9xf32>
    %c2_i32_228 = arith.constant 2 : i32
    %721 = vector.broadcast %c2_i32_228 : i32 to vector<6x9xi32>
    %722 = arith.cmpi eq, %450, %721 : vector<6x9xi32>
    %723 = arith.andi %704, %722 : vector<6x9xi1>
    %cst_229 = arith.constant 0.000000e+00 : f32
    %724 = vector.shape_cast %286 : vector<1x1xf32> to vector<1x1xf32>
    %725 = vector.broadcast %724 : vector<1x1xf32> to vector<6x9xf32>
    %726 = vector.broadcast %cst_229 : f32 to vector<6x9xf32>
    %727 = arith.select %723, %725, %726 : vector<6x9xi1>, vector<6x9xf32>
    %728 = arith.addf %720, %727 : vector<6x9xf32>
    %c3_i32_230 = arith.constant 3 : i32
    %729 = vector.broadcast %c3_i32_230 : i32 to vector<6x9xi32>
    %730 = arith.cmpi eq, %450, %729 : vector<6x9xi32>
    %731 = arith.andi %704, %730 : vector<6x9xi1>
    %cst_231 = arith.constant 0.000000e+00 : f32
    %732 = vector.shape_cast %291 : vector<1x1xf32> to vector<1x1xf32>
    %733 = vector.broadcast %732 : vector<1x1xf32> to vector<6x9xf32>
    %734 = vector.broadcast %cst_231 : f32 to vector<6x9xf32>
    %735 = arith.select %731, %733, %734 : vector<6x9xi1>, vector<6x9xf32>
    %736 = arith.addf %728, %735 : vector<6x9xf32>
    %c4_i32_232 = arith.constant 4 : i32
    %737 = vector.broadcast %c4_i32_232 : i32 to vector<6x9xi32>
    %738 = arith.cmpi eq, %450, %737 : vector<6x9xi32>
    %739 = arith.andi %704, %738 : vector<6x9xi1>
    %cst_233 = arith.constant 0.000000e+00 : f32
    %740 = vector.shape_cast %296 : vector<1x1xf32> to vector<1x1xf32>
    %741 = vector.broadcast %740 : vector<1x1xf32> to vector<6x9xf32>
    %742 = vector.broadcast %cst_233 : f32 to vector<6x9xf32>
    %743 = arith.select %739, %741, %742 : vector<6x9xi1>, vector<6x9xf32>
    %744 = arith.addf %736, %743 : vector<6x9xf32>
    %c5_i32_234 = arith.constant 5 : i32
    %745 = vector.broadcast %c5_i32_234 : i32 to vector<6x9xi32>
    %746 = arith.cmpi eq, %450, %745 : vector<6x9xi32>
    %747 = arith.andi %704, %746 : vector<6x9xi1>
    %cst_235 = arith.constant 0.000000e+00 : f32
    %748 = vector.shape_cast %301 : vector<1x1xf32> to vector<1x1xf32>
    %749 = vector.broadcast %748 : vector<1x1xf32> to vector<6x9xf32>
    %750 = vector.broadcast %cst_235 : f32 to vector<6x9xf32>
    %751 = arith.select %747, %749, %750 : vector<6x9xi1>, vector<6x9xf32>
    %752 = arith.addf %744, %751 : vector<6x9xf32>
    %c6_i32 = arith.constant 6 : i32
    %753 = vector.broadcast %c6_i32 : i32 to vector<6x9xi32>
    %754 = arith.cmpi eq, %451, %753 : vector<6x9xi32>
    %c0_i32_236 = arith.constant 0 : i32
    %755 = vector.broadcast %c0_i32_236 : i32 to vector<6x9xi32>
    %756 = arith.cmpi eq, %450, %755 : vector<6x9xi32>
    %757 = arith.andi %754, %756 : vector<6x9xi1>
    %cst_237 = arith.constant 0.000000e+00 : f32
    %758 = vector.shape_cast %325 : vector<1x1xf32> to vector<1x1xf32>
    %759 = vector.broadcast %758 : vector<1x1xf32> to vector<6x9xf32>
    %760 = vector.broadcast %cst_237 : f32 to vector<6x9xf32>
    %761 = arith.select %757, %759, %760 : vector<6x9xi1>, vector<6x9xf32>
    %762 = arith.addf %752, %761 : vector<6x9xf32>
    %c1_i32_238 = arith.constant 1 : i32
    %763 = vector.broadcast %c1_i32_238 : i32 to vector<6x9xi32>
    %764 = arith.cmpi eq, %450, %763 : vector<6x9xi32>
    %765 = arith.andi %754, %764 : vector<6x9xi1>
    %cst_239 = arith.constant 0.000000e+00 : f32
    %766 = vector.shape_cast %329 : vector<1x1xf32> to vector<1x1xf32>
    %767 = vector.broadcast %766 : vector<1x1xf32> to vector<6x9xf32>
    %768 = vector.broadcast %cst_239 : f32 to vector<6x9xf32>
    %769 = arith.select %765, %767, %768 : vector<6x9xi1>, vector<6x9xf32>
    %770 = arith.addf %762, %769 : vector<6x9xf32>
    %c2_i32_240 = arith.constant 2 : i32
    %771 = vector.broadcast %c2_i32_240 : i32 to vector<6x9xi32>
    %772 = arith.cmpi eq, %450, %771 : vector<6x9xi32>
    %773 = arith.andi %754, %772 : vector<6x9xi1>
    %cst_241 = arith.constant 0.000000e+00 : f32
    %774 = vector.shape_cast %333 : vector<1x1xf32> to vector<1x1xf32>
    %775 = vector.broadcast %774 : vector<1x1xf32> to vector<6x9xf32>
    %776 = vector.broadcast %cst_241 : f32 to vector<6x9xf32>
    %777 = arith.select %773, %775, %776 : vector<6x9xi1>, vector<6x9xf32>
    %778 = arith.addf %770, %777 : vector<6x9xf32>
    %c3_i32_242 = arith.constant 3 : i32
    %779 = vector.broadcast %c3_i32_242 : i32 to vector<6x9xi32>
    %780 = arith.cmpi eq, %450, %779 : vector<6x9xi32>
    %781 = arith.andi %754, %780 : vector<6x9xi1>
    %cst_243 = arith.constant 0.000000e+00 : f32
    %782 = vector.shape_cast %338 : vector<1x1xf32> to vector<1x1xf32>
    %783 = vector.broadcast %782 : vector<1x1xf32> to vector<6x9xf32>
    %784 = vector.broadcast %cst_243 : f32 to vector<6x9xf32>
    %785 = arith.select %781, %783, %784 : vector<6x9xi1>, vector<6x9xf32>
    %786 = arith.addf %778, %785 : vector<6x9xf32>
    %c4_i32_244 = arith.constant 4 : i32
    %787 = vector.broadcast %c4_i32_244 : i32 to vector<6x9xi32>
    %788 = arith.cmpi eq, %450, %787 : vector<6x9xi32>
    %789 = arith.andi %754, %788 : vector<6x9xi1>
    %cst_245 = arith.constant 0.000000e+00 : f32
    %790 = vector.shape_cast %343 : vector<1x1xf32> to vector<1x1xf32>
    %791 = vector.broadcast %790 : vector<1x1xf32> to vector<6x9xf32>
    %792 = vector.broadcast %cst_245 : f32 to vector<6x9xf32>
    %793 = arith.select %789, %791, %792 : vector<6x9xi1>, vector<6x9xf32>
    %794 = arith.addf %786, %793 : vector<6x9xf32>
    %c5_i32_246 = arith.constant 5 : i32
    %795 = vector.broadcast %c5_i32_246 : i32 to vector<6x9xi32>
    %796 = arith.cmpi eq, %450, %795 : vector<6x9xi32>
    %797 = arith.andi %754, %796 : vector<6x9xi1>
    %cst_247 = arith.constant 0.000000e+00 : f32
    %798 = vector.shape_cast %348 : vector<1x1xf32> to vector<1x1xf32>
    %799 = vector.broadcast %798 : vector<1x1xf32> to vector<6x9xf32>
    %800 = vector.broadcast %cst_247 : f32 to vector<6x9xf32>
    %801 = arith.select %797, %799, %800 : vector<6x9xi1>, vector<6x9xf32>
    %802 = arith.addf %794, %801 : vector<6x9xf32>
    %c7_i32 = arith.constant 7 : i32
    %803 = vector.broadcast %c7_i32 : i32 to vector<6x9xi32>
    %804 = arith.cmpi eq, %451, %803 : vector<6x9xi32>
    %c0_i32_248 = arith.constant 0 : i32
    %805 = vector.broadcast %c0_i32_248 : i32 to vector<6x9xi32>
    %806 = arith.cmpi eq, %450, %805 : vector<6x9xi32>
    %807 = arith.andi %804, %806 : vector<6x9xi1>
    %cst_249 = arith.constant 0.000000e+00 : f32
    %808 = vector.shape_cast %379 : vector<1x1xf32> to vector<1x1xf32>
    %809 = vector.broadcast %808 : vector<1x1xf32> to vector<6x9xf32>
    %810 = vector.broadcast %cst_249 : f32 to vector<6x9xf32>
    %811 = arith.select %807, %809, %810 : vector<6x9xi1>, vector<6x9xf32>
    %812 = arith.addf %802, %811 : vector<6x9xf32>
    %c1_i32_250 = arith.constant 1 : i32
    %813 = vector.broadcast %c1_i32_250 : i32 to vector<6x9xi32>
    %814 = arith.cmpi eq, %450, %813 : vector<6x9xi32>
    %815 = arith.andi %804, %814 : vector<6x9xi1>
    %cst_251 = arith.constant 0.000000e+00 : f32
    %816 = vector.shape_cast %383 : vector<1x1xf32> to vector<1x1xf32>
    %817 = vector.broadcast %816 : vector<1x1xf32> to vector<6x9xf32>
    %818 = vector.broadcast %cst_251 : f32 to vector<6x9xf32>
    %819 = arith.select %815, %817, %818 : vector<6x9xi1>, vector<6x9xf32>
    %820 = arith.addf %812, %819 : vector<6x9xf32>
    %c2_i32_252 = arith.constant 2 : i32
    %821 = vector.broadcast %c2_i32_252 : i32 to vector<6x9xi32>
    %822 = arith.cmpi eq, %450, %821 : vector<6x9xi32>
    %823 = arith.andi %804, %822 : vector<6x9xi1>
    %cst_253 = arith.constant 0.000000e+00 : f32
    %824 = vector.shape_cast %387 : vector<1x1xf32> to vector<1x1xf32>
    %825 = vector.broadcast %824 : vector<1x1xf32> to vector<6x9xf32>
    %826 = vector.broadcast %cst_253 : f32 to vector<6x9xf32>
    %827 = arith.select %823, %825, %826 : vector<6x9xi1>, vector<6x9xf32>
    %828 = arith.addf %820, %827 : vector<6x9xf32>
    %c3_i32_254 = arith.constant 3 : i32
    %829 = vector.broadcast %c3_i32_254 : i32 to vector<6x9xi32>
    %830 = arith.cmpi eq, %450, %829 : vector<6x9xi32>
    %831 = arith.andi %804, %830 : vector<6x9xi1>
    %cst_255 = arith.constant 0.000000e+00 : f32
    %832 = vector.shape_cast %392 : vector<1x1xf32> to vector<1x1xf32>
    %833 = vector.broadcast %832 : vector<1x1xf32> to vector<6x9xf32>
    %834 = vector.broadcast %cst_255 : f32 to vector<6x9xf32>
    %835 = arith.select %831, %833, %834 : vector<6x9xi1>, vector<6x9xf32>
    %836 = arith.addf %828, %835 : vector<6x9xf32>
    %c4_i32_256 = arith.constant 4 : i32
    %837 = vector.broadcast %c4_i32_256 : i32 to vector<6x9xi32>
    %838 = arith.cmpi eq, %450, %837 : vector<6x9xi32>
    %839 = arith.andi %804, %838 : vector<6x9xi1>
    %cst_257 = arith.constant 0.000000e+00 : f32
    %840 = vector.shape_cast %397 : vector<1x1xf32> to vector<1x1xf32>
    %841 = vector.broadcast %840 : vector<1x1xf32> to vector<6x9xf32>
    %842 = vector.broadcast %cst_257 : f32 to vector<6x9xf32>
    %843 = arith.select %839, %841, %842 : vector<6x9xi1>, vector<6x9xf32>
    %844 = arith.addf %836, %843 : vector<6x9xf32>
    %c5_i32_258 = arith.constant 5 : i32
    %845 = vector.broadcast %c5_i32_258 : i32 to vector<6x9xi32>
    %846 = arith.cmpi eq, %450, %845 : vector<6x9xi32>
    %847 = arith.andi %804, %846 : vector<6x9xi1>
    %cst_259 = arith.constant 0.000000e+00 : f32
    %848 = vector.shape_cast %402 : vector<1x1xf32> to vector<1x1xf32>
    %849 = vector.broadcast %848 : vector<1x1xf32> to vector<6x9xf32>
    %850 = vector.broadcast %cst_259 : f32 to vector<6x9xf32>
    %851 = arith.select %847, %849, %850 : vector<6x9xi1>, vector<6x9xf32>
    %852 = arith.addf %844, %851 : vector<6x9xf32>
    %c8_i32_260 = arith.constant 8 : i32
    %853 = vector.broadcast %c8_i32_260 : i32 to vector<6x9xi32>
    %854 = arith.cmpi eq, %451, %853 : vector<6x9xi32>
    %c0_i32_261 = arith.constant 0 : i32
    %855 = vector.broadcast %c0_i32_261 : i32 to vector<6x9xi32>
    %856 = arith.cmpi eq, %450, %855 : vector<6x9xi32>
    %857 = arith.andi %854, %856 : vector<6x9xi1>
    %cst_262 = arith.constant 0.000000e+00 : f32
    %858 = vector.shape_cast %426 : vector<1x1xf32> to vector<1x1xf32>
    %859 = vector.broadcast %858 : vector<1x1xf32> to vector<6x9xf32>
    %860 = vector.broadcast %cst_262 : f32 to vector<6x9xf32>
    %861 = arith.select %857, %859, %860 : vector<6x9xi1>, vector<6x9xf32>
    %862 = arith.addf %852, %861 : vector<6x9xf32>
    %c1_i32_263 = arith.constant 1 : i32
    %863 = vector.broadcast %c1_i32_263 : i32 to vector<6x9xi32>
    %864 = arith.cmpi eq, %450, %863 : vector<6x9xi32>
    %865 = arith.andi %854, %864 : vector<6x9xi1>
    %cst_264 = arith.constant 0.000000e+00 : f32
    %866 = vector.shape_cast %430 : vector<1x1xf32> to vector<1x1xf32>
    %867 = vector.broadcast %866 : vector<1x1xf32> to vector<6x9xf32>
    %868 = vector.broadcast %cst_264 : f32 to vector<6x9xf32>
    %869 = arith.select %865, %867, %868 : vector<6x9xi1>, vector<6x9xf32>
    %870 = arith.addf %862, %869 : vector<6x9xf32>
    %c2_i32_265 = arith.constant 2 : i32
    %871 = vector.broadcast %c2_i32_265 : i32 to vector<6x9xi32>
    %872 = arith.cmpi eq, %450, %871 : vector<6x9xi32>
    %873 = arith.andi %854, %872 : vector<6x9xi1>
    %cst_266 = arith.constant 0.000000e+00 : f32
    %874 = vector.shape_cast %434 : vector<1x1xf32> to vector<1x1xf32>
    %875 = vector.broadcast %874 : vector<1x1xf32> to vector<6x9xf32>
    %876 = vector.broadcast %cst_266 : f32 to vector<6x9xf32>
    %877 = arith.select %873, %875, %876 : vector<6x9xi1>, vector<6x9xf32>
    %878 = arith.addf %870, %877 : vector<6x9xf32>
    %c3_i32_267 = arith.constant 3 : i32
    %879 = vector.broadcast %c3_i32_267 : i32 to vector<6x9xi32>
    %880 = arith.cmpi eq, %450, %879 : vector<6x9xi32>
    %881 = arith.andi %854, %880 : vector<6x9xi1>
    %cst_268 = arith.constant 0.000000e+00 : f32
    %882 = vector.shape_cast %439 : vector<1x1xf32> to vector<1x1xf32>
    %883 = vector.broadcast %882 : vector<1x1xf32> to vector<6x9xf32>
    %884 = vector.broadcast %cst_268 : f32 to vector<6x9xf32>
    %885 = arith.select %881, %883, %884 : vector<6x9xi1>, vector<6x9xf32>
    %886 = arith.addf %878, %885 : vector<6x9xf32>
    %c4_i32_269 = arith.constant 4 : i32
    %887 = vector.broadcast %c4_i32_269 : i32 to vector<6x9xi32>
    %888 = arith.cmpi eq, %450, %887 : vector<6x9xi32>
    %889 = arith.andi %854, %888 : vector<6x9xi1>
    %cst_270 = arith.constant 0.000000e+00 : f32
    %890 = vector.shape_cast %444 : vector<1x1xf32> to vector<1x1xf32>
    %891 = vector.broadcast %890 : vector<1x1xf32> to vector<6x9xf32>
    %892 = vector.broadcast %cst_270 : f32 to vector<6x9xf32>
    %893 = arith.select %889, %891, %892 : vector<6x9xi1>, vector<6x9xf32>
    %894 = arith.addf %886, %893 : vector<6x9xf32>
    %c5_i32_271 = arith.constant 5 : i32
    %895 = vector.broadcast %c5_i32_271 : i32 to vector<6x9xi32>
    %896 = arith.cmpi eq, %450, %895 : vector<6x9xi32>
    %897 = arith.andi %854, %896 : vector<6x9xi1>
    %cst_272 = arith.constant 0.000000e+00 : f32
    %898 = vector.shape_cast %449 : vector<1x1xf32> to vector<1x1xf32>
    %899 = vector.broadcast %898 : vector<1x1xf32> to vector<6x9xf32>
    %900 = vector.broadcast %cst_272 : f32 to vector<6x9xf32>
    %901 = arith.select %897, %899, %900 : vector<6x9xi1>, vector<6x9xf32>
    %902 = arith.addf %894, %901 : vector<6x9xf32>
    %c0_273 = arith.constant 0 : index
    %c0_274 = arith.constant 0 : index
    %c0_275 = arith.constant 0 : index
    %903 = vector.load %arg6[%c0_273, %c0_274, %c0_275] : memref<1x6x9xf32, #tpu.memory_space<vmem>>, vector<1x6x9xf32>
    %904 = vector.shape_cast %903 : vector<1x6x9xf32> to vector<6x9xf32>
    %905 = vector.shape_cast %902 : vector<6x9xf32> to vector<1x6x9xf32>
    tpu.vector_store %arg6[%c0_273, %c0_274, %c0_275], %905 {strides = array<i32>} : memref<1x6x9xf32, #tpu.memory_space<vmem>>, vector<1x6x9xf32>,
    return
  }
  func.func @transform_0(%arg0: i32) -> (i32, i32) {
    %c0_i32 = arith.constant 0 : i32
    %c0_i32_0 = arith.constant 0 : i32
    %c0_i32_1 = arith.constant 0 : i32
    return %c0_i32, %c0_i32_0 : i32, i32
  }
  func.func @transform_1(%arg0: i32) -> (i32, i32) {
    %c0_i32 = arith.constant 0 : i32
    %c0_i32_0 = arith.constant 0 : i32
    return %arg0, %c0_i32 : i32, i32
  }
  func.func @transform_2(%arg0: i32) -> (i32, i32) {
    %c0_i32 = arith.constant 0 : i32
    %c0_i32_0 = arith.constant 0 : i32
    return %arg0, %c0_i32 : i32, i32
  }
  func.func @transform_3(%arg0: i32) -> (i32, i32) {
    %c1_i32 = arith.constant 1 : i32
    %0 = arith.addi %arg0, %c1_i32 : i32
    %c0_i32 = arith.constant 0 : i32
    %1 = arith.minsi %0, %c0_i32 : i32
    %c2_i32 = arith.constant 2 : i32
    %2 = arith.muli %1, %c2_i32 : i32
    %c0_i32_0 = arith.constant 0 : i32
    %c0_i32_1 = arith.constant 0 : i32
    return %2, %c0_i32_0 : i32, i32
  }
  func.func @transform_4(%arg0: i32) -> (i32, i32) {
    %c1_i32 = arith.constant 1 : i32
    %0 = arith.addi %arg0, %c1_i32 : i32
    %c0_i32 = arith.constant 0 : i32
    %1 = arith.minsi %0, %c0_i32 : i32
    %c2_i32 = arith.constant 2 : i32
    %2 = arith.muli %1, %c2_i32 : i32
    %c0_i32_0 = arith.constant 0 : i32
    %c0_i32_1 = arith.constant 0 : i32
    return %2, %c0_i32_0 : i32, i32
  }
  func.func @transform_5(%arg0: i32) -> (i32, i32, i32) {
    %c0_i32 = arith.constant 0 : i32
    %c0_i32_0 = arith.constant 0 : i32
    %c0_i32_1 = arith.constant 0 : i32
    return %arg0, %c0_i32, %c0_i32_0 : i32, i32, i32
  }
}

</mosaic_0001>

<bundles_post_ra>
// kernel: tpu_custom_call.1
= control target key start
LH: loop header
LB: loop body
LE: loop exit
PB: predicated region body
PF: predicated region fallthrough
CT: control target
= control target key end

     0   :  { %10 = vsyncpa [#allocation3], 0  ;;  %s2265_s0 = inlined_call_operand.hbm [shape: f32[1,128], index: 0, kind: input, shape index: {}]   ;;  %s2266_s1 = inlined_call_operand.hbm [shape: f32[16,128], index: 1, kind: input, shape index: {}]   ;;  %s2267_s2 = inlined_call_operand.hbm [shape: f32[16,128], index: 2, kind: input, shape index: {}]   ;;  %s2268_s3 = inlined_call_operand.hbm [shape: f32[16,128], index: 3, kind: input, shape index: {}]   ;;  %s2269_s4 = inlined_call_operand.hbm [shape: f32[16,128], index: 4, kind: input, shape index: {}]   ;;  %s2270_s5 = inlined_call_operand.vmem [shape: f32[1,6,9], index: 5, kind: output, shape index: {}]  }
   0x1   :  { %11 = vsyncpa [#allocation5], 0 }
   0x2   :  { %12 = vsyncpa [#allocation8], 0  ;;  %s1332_s18 = smov [#allocation4]  }
   0x3   :  { %s28_s19 = sshll.u32 %s1332_s18, 4  ;;  %s29_s19 = int_to_ptr.vmem [resolvable:$true] %s28_s19 }
   0x4   :  { %s1234_s20 = scalar_lea.vmem %s29_s19, 256  ;;  %p1239_p1 = scmp.lt.s32.totalorder %s29_s19, %s29_s19 }
   0x5   :  { %p1235_p0 = scmp.ne.s32.totalorder %s29_s19, %s1234_s20  ;;  %p1240_p2 = scmp.lt.s32.totalorder %s1234_s20, %s1234_s20 }
   0x7   :  { %p1241_p3 = por %p1240_p2, %p1239_p1 }
   0x9   :  { %p1242_p4 = pnand %p1241_p3, %p1235_p0 }
   0xb   :  { %1245 = shalt.err (!%p1242_p4)
}
   0xc   :  { %s1333_s21 = smov 128   ;;  %s1334_s22 = smov 8  }
   0xd   :  { %34 = dma.hbm_to_vmem [thread:$0]  %s2266_s1, 256, %s29_s19, [#allocation5], %s1333_s21, %s1333_s21, %s1334_s22  }
   0xe   :  { %s1335_s25 = smov [#allocation7]   ;;  %s1336_s27 = smov [#allocation2]  }
   0xf   :  { %s59_s26 = sshll.u32 %s1335_s25, 4  ;;  %s19_s28 = sshll.u32 %s1336_s27, 4  ;;  %s60_s26 = int_to_ptr.vmem [resolvable:$true] %s59_s26  ;;  %s20_s28 = int_to_ptr.vmem [resolvable:$true] %s19_s28 }
  0x10   :  { %s1254_s29 = scalar_lea.vmem %s60_s26, 128  ;;  %p1259_p6 = scmp.lt.s32.totalorder %s60_s26, %s60_s26 }
  0x11   :  { %p1255_p5 = scmp.ne.s32.totalorder %s60_s26, %s1254_s29  ;;  %p1260_p7 = scmp.lt.s32.totalorder %s1254_s29, %s1254_s29 }
  0x13   :  { %p1261_p8 = por %p1260_p7, %p1259_p6 }
  0x15   :  { %p1262_p9 = pnand %p1261_p8, %p1255_p5 }
  0x17   :  { %1265 = shalt.err (!%p1262_p9)
}
  0x18   :  { %62 = dma.hbm_to_vmem [thread:$0]  %s2268_s3, 128, %s60_s26, [#allocation8]  }
  0x19   :  { %s1274_s7 = scalar_lea.vmem %s20_s28, 16  ;;  %s1278_s1 = scalar_lea.vmem %s20_s28, 32 }
  0x1a   :  { %p1275_p10 = scmp.ne.s32.totalorder %s20_s28, %s1274_s7  ;;  %p1279_p11 = scmp.lt.s32.totalorder %s20_s28, %s20_s28 }
  0x1b   :  { %p1280_p12 = scmp.lt.s32.totalorder %s1278_s1, %s1274_s7 }
  0x1d   :  { %p1281_p13 = por %p1280_p12, %p1279_p11 }
  0x1f   :  { %p1282_p0 = pnand %p1281_p13, %p1275_p10 }
  0x21   :  { %1285 = shalt.err (!%p1282_p0)
}
  0x22   :  { %22 = dma.hbm_to_vmem [thread:$0]  %s2265_s0, 16, %s20_s28, [#allocation3]  }
  0x23   :  { %s1337_s10 = smov [#allocation6]   ;;  %s1338_s12 = smov [#allocation9]  }
  0x24   :  { %s40_s11 = sshll.u32 %s1337_s10, 4  ;;  %s75_s13 = sshll.u32 %s1338_s12, 4  ;;  %s41_s11 = int_to_ptr.vmem [resolvable:$true] %s40_s11  ;;  %s76_s13 = int_to_ptr.vmem [resolvable:$true] %s75_s13 }
  0x25   :  { %s1294_s14 = scalar_lea.vmem %s41_s11, 256  ;;  %p1299_p2 = scmp.lt.s32.totalorder %s41_s11, %s41_s11 }
  0x26   :  { %p1295_p1 = scmp.ne.s32.totalorder %s41_s11, %s1294_s14  ;;  %p1300_p3 = scmp.lt.s32.totalorder %s1294_s14, %s1294_s14 }
  0x28   :  { %p1301_p4 = por %p1300_p3, %p1299_p2 }
  0x2a   :  { %p1302_p5 = pnand %p1301_p4, %p1295_p1 }
  0x2c   :  { %1305 = shalt.err (!%p1302_p5)
}
  0x2d   :  { %46 = dma.hbm_to_vmem [thread:$0]  %s2267_s2, 256, %s41_s11, [#allocation5], %s1333_s21, %s1333_s21, %s1334_s22  }
  0x2e   :  { %s1314_s0 = scalar_lea.vmem %s76_s13, 128  ;;  %p1319_p7 = scmp.lt.s32.totalorder %s76_s13, %s76_s13 }
  0x2f   :  { %p1315_p6 = scmp.ne.s32.totalorder %s76_s13, %s1314_s0  ;;  %p1320_p8 = scmp.lt.s32.totalorder %s1314_s0, %s1314_s0 }
  0x31   :  { %p1321_p9 = por %p1320_p8, %p1319_p7 }
  0x33   :  { %p1322_p10 = pnand %p1321_p9, %p1315_p6 }
  0x35   :  { %1325 = shalt.err (!%p1322_p10)
}
  0x36   :  { %78 = dma.hbm_to_vmem [thread:$0]  %s2269_s4, 128, %s76_s13, [#allocation8]  }
  0x37   :  { %1326 = dma.done.wait [#allocation3], 16  }
  0x38   :  { %1327 = vsyncadd [#allocation3], 4294967280 }
  0x39   :  { %1328 = dma.done.wait [#allocation5], 512  }
  0x3a   :  { %1329 = vsyncadd [#allocation5], 4294966784 }
  0x3b   :  { %1330 = dma.done.wait [#allocation8], 256  }
  0x3c   :  { %1331 = vsyncadd [#allocation8], 4294967040  ;;  %v129_v0 = vlaneseq  ;;  %v1339_v1 = vmov 0   ;;  %s1340_s2 = smov 127   ;;  %v1184_v3 = vld [vmem:[#allocation2] ss:$0 sm:$0xff] }
  0x3d   :  { %1224 = vset.pattern.permute.xlu0 %v1339_v1  ;;  %v1341_v4 = vmov 1   ;;  %v103_v13 = vld [vmem:[#allocation4] sm:$0xff]  ;;  %v104_v18 = vld [vmem:[#allocation4 + $0x8] sm:$0xff]  ;;  %v117_v19 = vld [vmem:[#allocation6 + $0x8] sm:$0xff]  ;;  %s1342_s4 = smov 126   ;;  %v2272_v54 = vmov 0.0  }
  0x3e   :  { %v1397_v2 = vand.u32 127, %v129_v0  ;;  %111 = vperm.xlu0 %1224, %v1184_v3   ;;  %v1401_v5 = vshrl.u32 %v129_v0, 7  ;;  %v126_v21 = vld [vmem:[#allocation9] sm:$0xff]  ;;  %v116_v25 = vld [vmem:[#allocation6] sm:$0xff]  ;;  %v124_v35 = vld [vmem:[#allocation7] sm:$0xff]  ;;  %s1344_s18 = smov 120  }
  0x3f   :  { %s1345_s19 = smov 124  }
  0x40   :  { %209 = vrot.lane.b32.xlu1 %v1397_v2, %s1340_s2  ;;  %v1404_v6 = vadd.s32 8, %v1401_v5  ;;  %v1407_v7 = vadd.s32 16, %v1401_v5  ;;  %v304_v8 = vrot.slane %v1401_v5, 1  ;;  %vm292_vm0 = vcmp.lt.s32.totalorder %v1401_v5, 7 }
  0x41   :  { %vm498_vm1 = vcmp.lt.s32.totalorder %v1401_v5, 6  ;;  %vm704_vm8 = vcmp.lt.s32.totalorder %v1401_v5, 4 }
  0x42   :  { %1225 = vset.pattern.permute.xlu0 %v1341_v4  ;;  %v305_v9 = vrot.slane %v1404_v6, 1  ;;  %v306_v10 = vrot.slane %v1407_v7, 1  ;;  %v511_v28 = vrot.slane %v1404_v6, 2  ;;  %v512_v29 = vrot.slane %v1407_v7, 2 }
  0x43   :  { %119 = vperm.xlu0 %1225, %v1184_v3   ;;  %v717_v50 = vrot.slane %v1404_v6, 4  ;;  %v718_v51 = vrot.slane %v1407_v7, 4  ;;  %v394_v60 = vand.u32 1, %v1404_v6 }
  0x44   :  { %v308_v11 = vsel %vm292_vm0, %v304_v8, %v305_v9  ;;  %v307_v12 = vsel %vm292_vm0, %v305_v9, %v306_v10  ;;  %v1446_v36 = vsel %vm498_vm1, %v511_v28, %v512_v29  ;;  %v399_v8 = vand.u32 1, %v1397_v2 }
  0x45   :  { %v309_v14 = vsub.s32 %v308_v11, %v1401_v5  ;;  %v310_v16 = vsub.s32 %v307_v12, %v1404_v6  ;;  %vm321_vm3 = vcmp.lt.s32.totalorder %v308_v11, 16  ;;  %vm322_vm5 = vcmp.lt.s32.totalorder %v307_v12, 16 }
  0x46   :  { %v516_v42 = vsub.s32 %v1446_v36, %v1404_v6  ;;  %v1503_v63 = vsel %vm704_vm8, %v717_v50, %v718_v51  ;;  %vm396_vm12 = vcmp.eq.s32.totalorder %v394_v60, 0  ;;  %vm1523_vm14 = vcmp.eq.s32.totalorder %v399_v8, 0 }
  0x47   :  { %v312_v20 = vsub.s32 0, %v309_v14  ;;  %v315_v23 = vsub.s32 0, %v310_v16  ;;  %v722_v11 = vsub.s32 %v1503_v63, %v1404_v6  ;;  %vm1533_vm15 = vmand %vm396_vm12, %vm1523_vm14 }
  0x48   :  { %v521_v53 = vsub.s32 0, %v516_v42 }
  0x49   :  { %v1188_v32 = vmin.u32 %v312_v20, %v309_v14  ;;  %v1189_v34 = vmin.u32 %v315_v23, %v310_v16  ;;  %v727_v29 = vsub.s32 0, %v722_v11 }
  0x4a   :  { %v1196_v3 = vmin.u32 %v521_v53, %v516_v42 }
  0x4b   :  { %vm317_vm2 = vcmp.eq.s32.totalorder %v1188_v32, 1  ;;  %vm318_vm4 = vcmp.eq.s32.totalorder %v1189_v34, 1 }
  0x4c   :  { %vm1459_vm6 = vmand %vm317_vm2, %vm321_vm3  ;;  %vm524_vm13 = vcmp.eq.s32.totalorder %v1196_v3, 2 }
  0x4d   :  { %vm324_vm7 = vmand %vm318_vm4, %vm322_vm5  ;;  %v1481_v55 = vsel %vm1459_vm6, 1.0, %v2272_v54 }
  0x4e   :  { %v1484_v56 = vsel %vm324_vm7, 1.0, %v2272_v54  ;;  %vm526_vm2 = vmand %vm1533_vm15, %vm524_vm13 }
  0xb2   :  { %v1423_v22 = vpop.permute.xlu1 %209 }
  0xb3   :  { %v211_v31 = vsub.s32 %v1423_v22, %v1397_v2  ;;  %vm218_vm10 = vcmp.lt.s32.totalorder %v1423_v22, 128 }
  0xb5   :  { %v213_v38 = vsub.s32 0, %v211_v31 }
  0xb7   :  { %v1185_v44 = vmin.u32 %v213_v38, %v211_v31  ;;  %v605_v38 = vand.u32 2, %v1397_v2 }
  0xb9   :  { %v112_v15 = vpop.permute.xlu0 %111  ;;  %vm215_vm9 = vcmp.eq.s32.totalorder %v1185_v44, 1  ;;  %vm1570_vm6 = vcmp.eq.s32.totalorder %v605_v38, 0 }
  0xba   :  { %v1419_v17 = vsub.f32 %v103_v13, %v112_v15  ;;  %v1425_v24 = vsub.f32 %v104_v18, %v112_v15  ;;  %v1451_v39 = vsub.f32 %v124_v35, %v112_v15  ;;  %vm219_vm11 = vmand %vm215_vm9, %vm218_vm10 }
  0xbb   :  { %v1518_v13 = vsel %vm219_vm11, 1.0, %v2272_v54  ;;  %vm734_vm11 = vcmp.lt.s32.totalorder %v1503_v63, 16 }
  0xbc   :  { %197 = vrot.lane.b32.xlu0 %v1419_v17, %s1340_s2  ;;  %v289_v46 = vrot.slane %v1419_v17, 1  ;;  %v290_v47 = vrot.slane %v1425_v24, 1  ;;  %v291_v48 = vrot.slane %v1451_v39, 1  ;;  %v229_v22 = vadd.f32 %v1518_v13, %v1518_v13 }
  0xbd   :  { %v496_v34 = vrot.slane %v1425_v24, 2 }
  0xbe   :  { %v120_v26 = vpop.permute.xlu0 %119  ;;  %v294_v59 = vsel %vm292_vm0, %v289_v46, %v290_v47  ;;  %v293_v62 = vsel %vm292_vm0, %v290_v47, %v291_v48  ;;  %v230_v35 = vrot.slane %v229_v22, 4 }
  0xbf   :  { %v1427_v27 = vsub.f32 %v117_v19, %v120_v26  ;;  %v1431_v30 = vsub.f32 %v126_v21, %v120_v26  ;;  %v1438_v33 = vsub.f32 %v116_v25, %v120_v26  ;;  %v295_v1 = vsub.f32 %v294_v59, %v1419_v17 }
  0xc0   :  { %199 = vrot.lane.b32.xlu0 %v1425_v24, %s1340_s2  ;;  %v296_v9 = vsub.f32 %v293_v62, %v1425_v24  ;;  %v600_v25 = vand.u32 2, %v1404_v6  ;;  %v497_v26 = vrot.slane %v1451_v39, 2  ;;  %v231_v43 = vadd.f32 %v230_v35, %v229_v22 }
  0xc1   :  { %205 = vrot.lane.b32.xlu1 %v1427_v27, %s1340_s2  ;;  %v299_v37 = vrot.slane %v1431_v30, 1  ;;  %v297_v40 = vrot.slane %v1438_v33, 1  ;;  %v298_v41 = vrot.slane %v1427_v27, 1  ;;  %v329_v10 = vmul.f32 %v1481_v55, %v295_v1 }
  0xc2   :  { %v330_v14 = vmul.f32 %v1484_v56, %v296_v9  ;;  %vm1549_vm4 = vcmp.eq.s32.totalorder %v600_v25, 0  ;;  %v151_v47 = vadd.f32 %v1427_v27, %v1438_v33  ;;  %v171_v48 = vmul.f32 %v1438_v33, %v1438_v33 }
  0xc3   :  { %v300_v45 = vsel %vm292_vm0, %v298_v41, %v299_v37  ;;  %v301_v49 = vsel %vm292_vm0, %v297_v40, %v298_v41  ;;  %v360_v15 = vmul.f32 %v329_v10, %v295_v1  ;;  %vm528_vm0 = vcmp.lt.s32.totalorder %v1446_v36, 16  ;;  %vm604_vm5 = vmand %vm1533_vm15, %vm1549_vm4 }
  0xc4   :  { %203 = vrot.lane.b32.xlu0 %v1438_v33, %s1340_s2  ;;  %v302_v52 = vsub.f32 %v301_v49, %v1438_v33  ;;  %v303_v57 = vsub.f32 %v300_v45, %v1427_v27  ;;  %v1527_v19 = vadd.f32 %v330_v14, %v329_v10  ;;  %v361_v20 = vmul.f32 %v330_v14, %v296_v9  ;;  %vm530_vm3 = vmand %vm526_vm2, %vm528_vm0 }
  0xc5   :  { %403 = vrot.lane.b32.xlu1 %v1419_v17, %s1342_s4  ;;  %v142_v37 = vadd.f32 %v1425_v24, %v1419_v17  ;;  %v1203_v40 = vmin.u32 %v727_v29, %v722_v11  ;;  %v499_v41 = vsel %vm498_vm1, %v496_v34, %v497_v26  ;;  %v1567_v42 = vsel %vm530_vm3, 1.0, %v2272_v54  ;;  %vm1582_vm9 = vmand %vm604_vm5, %vm1570_vm6 }
  0xc6   :  { %v331_v58 = vmul.f32 %v1481_v55, %v302_v52  ;;  %v332_v61 = vmul.f32 %v1484_v56, %v303_v57  ;;  %v382_v16 = vmul.f32 %v329_v10, %v302_v52  ;;  %v383_v21 = vmul.f32 %v330_v14, %v303_v57 }
  0xc7   :  { %v1542_v31 = vadd.f32 %v361_v20, %v360_v15  ;;  %v502_v44 = vsub.f32 %v499_v41, %v1425_v24  ;;  %v143_v45 = vrot.slane %v142_v37, 4  ;;  %vm730_vm7 = vcmp.eq.s32.totalorder %v1203_v40, 4 }
  0xc8   :  { %415 = vrot.lane.b32.xlu0 %v1397_v2, %s1342_s4  ;;  %v371_v0 = vmul.f32 %v331_v58, %v302_v52  ;;  %v1506_v4 = vadd.f32 %v332_v61, %v331_v58  ;;  %v372_v7 = vmul.f32 %v332_v61, %v303_v57  ;;  %v1544_v32 = vadd.f32 %v383_v21, %v382_v16  ;;  %vm732_vm10 = vmand %vm1582_vm9, %vm730_vm7 }
  0xc9   :  { %409 = vrot.lane.b32.xlu1 %v1438_v33, %s1342_s4  ;;  %v172_v49 = vmul.f32 %v1427_v27, %v1427_v27  ;;  %v1587_v52 = vmul.f32 %v1567_v42, %v502_v44  ;;  %v232_v53 = vrot.slane %v231_v43, 2  ;;  %v703_v58 = vrot.slane %v1451_v39, 4  ;;  %vm736_vm12 = vmand %vm732_vm10, %vm734_vm11 }
  0xca   :  { %v1515_v12 = vadd.f32 %v372_v7, %v371_v0  ;;  %v144_v59 = vadd.f32 %v143_v45, %v142_v37  ;;  %v152_v60 = vrot.slane %v151_v47, 4  ;;  %v182_v62 = vmul.f32 %v1438_v33, %v1419_v17 }
  0xcb   :  { %v1592_v57 = vmul.f32 %v1587_v52, %v502_v44  ;;  %v173_v61 = vadd.f32 %v172_v49, %v171_v48  ;;  %v183_v0 = vmul.f32 %v1427_v27, %v1425_v24  ;;  %v2271_v1 = vrot.slane %v1425_v24, 4 }
  0xcc   :  { %405 = vrot.lane.b32.xlu0 %v1425_v24, %s1342_s4  ;;  %v233_v3 = vadd.f32 %v232_v53, %v231_v43  ;;  %v145_v7 = vrot.slane %v144_v59, 2  ;;  %v153_v8 = vadd.f32 %v152_v60, %v151_v47  ;;  %v1612_v11 = vsel %vm736_vm12, 1.0, %v2272_v54 }
  0xcd   :  { %815 = vrot.lane.b32.xlu1 %v1419_v17, %s1344_s18  ;;  %v705_v63 = vsel %vm704_vm8, %v2271_v1, %v703_v58  ;;  %v174_v9 = vrot.slane %v173_v61, 4  ;;  %v184_v10 = vadd.f32 %v183_v0, %v182_v62  ;;  %v333_v15 = vadd.f32 %v1484_v56, %v1481_v55 }
  0xce   :  { %v234_v14 = vrot.slane %v233_v3, 1  ;;  %v708_v16 = vsub.f32 %v705_v63, %v1425_v24  ;;  %v146_v20 = vadd.f32 %v145_v7, %v144_v59  ;;  %v154_v21 = vrot.slane %v153_v8, 2 }
  0xcf   :  { %v175_v22 = vadd.f32 %v174_v9, %v173_v61  ;;  %v185_v25 = vrot.slane %v184_v10, 4  ;;  %v334_v35 = vrot.slane %v333_v15, 4  ;;  %v160_v56 = vmul.f32 %v1419_v17, %v1419_v17 }
  0xd0   :  { %621 = vrot.lane.b32.xlu0 %v1397_v2, %s1345_s19  ;;  %v1618_v26 = vmul.f32 %v1612_v11, %v708_v16  ;;  %v235_v29 = vadd.f32 %v234_v14, %v233_v3  ;;  %v147_v36 = vrot.slane %v146_v20, 1  ;;  %v155_v37 = vadd.f32 %v154_v21, %v153_v8 }
  0xd1   :  { %v176_v38 = vrot.slane %v175_v22, 2  ;;  %v186_v40 = vadd.f32 %v185_v25, %v184_v10  ;;  %v161_v41 = vmul.f32 %v1425_v24, %v1425_v24  ;;  %v335_v43 = vadd.f32 %v334_v35, %v333_v15 }
  0xd2   :  { %v1623_v55 = vmul.f32 %v1618_v26, %v708_v16  ;;  %v148_v44 = vadd.f32 %v147_v36, %v146_v20  ;;  %v156_v45 = vrot.slane %v155_v37, 1  ;;  %v1633_v49 = vsub.f32 %v1451_v39, %v1425_v24 }
  0xd3   :  { %v177_v47 = vadd.f32 %v176_v38, %v175_v22  ;;  %v187_v48 = vrot.slane %v186_v40, 2  ;;  %v162_v53 = vadd.f32 %v161_v41, %v160_v56  ;;  %v336_v58 = vrot.slane %v335_v43, 2 }
  0xd4   :  { %827 = vrot.lane.b32.xlu0 %v1397_v2, %s1344_s18  ;;  %v1637_v59 = vsub.f32 %v1431_v30, %v1427_v27  ;;  %v157_v60 = vadd.f32 %v156_v45, %v155_v37  ;;  %v1640_v0 = vmul.f32 0.0, %v1633_v49  ;;  %v510_v25 = vrot.slane %v1401_v5, 2 }
  0xd5   :  { %v178_v61 = vrot.slane %v177_v47, 1  ;;  %v188_v62 = vadd.f32 %v187_v48, %v186_v40  ;;  %v163_v3 = vrot.slane %v162_v53, 4  ;;  %v337_v7 = vadd.f32 %v336_v58, %v335_v43 }
  0xd6   :  { %v1644_v39 = vmul.f32 %v1640_v0, %v1637_v59  ;;  %v716_v36 = vrot.slane %v1401_v5, 4  ;;  %v393_v38 = vand.u32 1, %v1401_v5  ;;  %v505_v43 = vrot.slane %v1431_v30, 2 }
  0xd7   :  { %v179_v63 = vadd.f32 %v178_v61, %v177_v47  ;;  %v189_v8 = vrot.slane %v188_v62, 1  ;;  %v164_v9 = vadd.f32 %v163_v3, %v162_v53  ;;  %v338_v10 = vrot.slane %v337_v7, 1 }
  0xd8   :  { %411 = vrot.lane.b32.xlu0 %v1427_v27, %s1342_s4  ;;  %2286 = vst [vmem:[#allocation13_spill] sm:$0xff] %v1644_v39  ;;  %v720_v40 = vsel %vm704_vm8, %v716_v36, %v717_v50  ;;  %vm395_vm13 = vcmp.eq.s32.totalorder %v393_v38, 0  ;;  %v352_v45 = vrot.slane %v1506_v4, 4  ;;  %v599_v50 = vand.u32 2, %v1401_v5 }
  0xd9   :  { %v190_v14 = vadd.f32 %v189_v8, %v188_v62  ;;  %v165_v15 = vrot.slane %v164_v9, 2  ;;  %v339_v16 = vadd.f32 %v338_v10, %v337_v7  ;;  %v721_v41 = vsub.s32 %v720_v40, %v1401_v5  ;;  %vm1665_vm2 = vmand %vm395_vm13, %vm1523_vm14 }
  0xda   :  { %v353_v18 = vadd.f32 %v352_v45, %v1506_v4  ;;  %vm601_vm5 = vcmp.eq.s32.totalorder %v599_v50, 0  ;;  %vm733_vm13 = vcmp.lt.s32.totalorder %v720_v40, 16 }
  0xdb   :  { %v166_v20 = vadd.f32 %v165_v15, %v164_v9  ;;  %v724_v48 = vsub.s32 0, %v721_v41  ;;  %vm603_vm7 = vmand %vm1665_vm2, %vm601_vm5 }
  0xdc   :  { %609 = vrot.lane.b32.xlu0 %v1419_v17, %s1345_s19  ;;  %v354_v8 = vrot.slane %v353_v18, 2  ;;  %vm1699_vm11 = vmand %vm603_vm7, %vm1570_vm6 }
  0xdd   :  { %v167_v21 = vrot.slane %v166_v20, 1  ;;  %v1202_v61 = vmin.u32 %v724_v48, %v721_v41 }
  0xdf   :  { %v168_v22 = vadd.f32 %v167_v21, %v166_v20  ;;  %vm729_vm10 = vcmp.eq.s32.totalorder %v1202_v61, 4  ;;  %v363_v21 = vrot.slane %v1542_v31, 4 }
  0xe0   :  { %611 = vrot.lane.b32.xlu0 %v1425_v24, %s1345_s19  ;;  %vm731_vm12 = vmand %vm1699_vm11, %vm729_vm10 }
  0xe1   :  { %vm1709_vm6 = vmand %vm731_vm12, %vm733_vm13 }
  0xe4   :  { %615 = vrot.lane.b32.xlu0 %v1438_v33, %s1345_s19 }
  0xe8   :  { %617 = vrot.lane.b32.xlu0 %v1427_v27, %s1345_s19 }
  0xec   :  { %817 = vrot.lane.b32.xlu0 %v1425_v24, %s1344_s18 }
  0xf0   :  { %821 = vrot.lane.b32.xlu0 %v1438_v33, %s1344_s18 }
  0xf1   :  { %236 = vadd.xlane.f32.xlu1 %v235_v29  ;;  %v514_v29 = vsel %vm498_vm1, %v510_v25, %v511_v28  ;;  %v503_v28 = vrot.slane %v1438_v33, 2 }
  0xf2   :  { %v515_v35 = vsub.s32 %v514_v29, %v1401_v5  ;;  %vm527_vm4 = vcmp.lt.s32.totalorder %v514_v29, 16 }
  0xf4   :  { %v518_v37 = vsub.s32 0, %v515_v35 }
  0xf5   :  { %149 = vadd.xlane.f32.xlu1 %v148_v44  ;;  %v504_v44 = vrot.slane %v1427_v27, 2 }
  0xf6   :  { %v1195_v56 = vmin.u32 %v518_v37, %v515_v35 }
  0xf7   :  { %v506_v53 = vsel %vm498_vm1, %v504_v44, %v505_v43  ;;  %v507_v58 = vsel %vm498_vm1, %v503_v28, %v504_v44  ;;  %v364_v28 = vadd.f32 %v363_v21, %v1542_v31 }
  0xf8   :  { %vm523_vm0 = vcmp.eq.s32.totalorder %v1195_v56, 2  ;;  %v1681_v62 = vsub.f32 %v507_v58, %v1438_v33  ;;  %v1684_v3 = vsub.f32 %v506_v53, %v1427_v27  ;;  %v495_v56 = vrot.slane %v1419_v17, 2 }
  0xf9   :  { %158 = vadd.xlane.f32.xlu1 %v157_v60  ;;  %vm525_vm3 = vmand %vm1665_vm2, %vm523_vm0  ;;  %v374_v60 = vrot.slane %v1515_v12, 4 }
  0xfa   :  { %vm529_vm14 = vmand %vm525_vm3, %vm527_vm4  ;;  %v538_v10 = vmul.f32 %v1567_v42, %v1684_v3 }
  0xfb   :  { %v375_v7 = vadd.f32 %v374_v60, %v1515_v12  ;;  %v1691_v9 = vsel %vm529_vm14, 1.0, %v2272_v54  ;;  %v1726_v60 = vsel %vm1709_vm6, 1.0, %v2272_v54 }
  0xfc   :  { %v537_v4 = vmul.f32 %v1691_v9, %v1681_v62  ;;  %v578_v37 = vmul.f32 %v538_v10, %v1684_v3 }
  0xfd   :  { %180 = vadd.xlane.f32.xlu1 %v179_v63  ;;  %v343_v63 = vrot.slane %v1527_v19, 4 }
  0xfe   :  { %v557_v25 = vadd.f32 %v538_v10, %v537_v4 }
  0xff   :  { %v344_v15 = vadd.f32 %v343_v63, %v1527_v19  ;;  %v577_v19 = vmul.f32 %v537_v4, %v1681_v62  ;;  %v500_v4 = vsel %vm498_vm1, %v495_v56, %v496_v34 }
 0x100   :  { %v558_v45 = vrot.slane %v557_v25, 4 }
 0x101   :  { %191 = vadd.xlane.f32.xlu1 %v190_v14  ;;  %v376_v14 = vrot.slane %v375_v7, 2  ;;  %v345_v36 = vrot.slane %v344_v15, 2  ;;  %v579_v31 = vadd.f32 %v578_v37, %v577_v19 }
 0x103   :  { %v377_v35 = vadd.f32 %v376_v14, %v375_v7  ;;  %v346_v7 = vadd.f32 %v345_v36, %v344_v15  ;;  %v580_v37 = vrot.slane %v579_v31, 4 }
 0x105   :  { %340 = vadd.xlane.f32.xlu1 %v339_v16  ;;  %v355_v16 = vadd.f32 %v354_v8, %v353_v18  ;;  %v378_v61 = vrot.slane %v377_v35, 1  ;;  %v581_v54 = vadd.f32 %v580_v37, %v579_v31 }
 0x107   :  { %v356_v40 = vrot.slane %v355_v16, 1  ;;  %v1739_v19 = vadd.f32 %v378_v61, %v377_v35 }
 0x109   :  { %v1731_v8 = vadd.f32 %v356_v40, %v355_v16  ;;  %v347_v16 = vrot.slane %v346_v7, 1  ;;  %v501_v40 = vsub.f32 %v500_v4, %v1419_v17 }
 0x10b   :  { %v535_v4 = vmul.f32 %v1691_v9, %v501_v40 }
 0x10f   :  { %169 = vadd.xlane.f32.xlu0 %v168_v22  ;;  %v385_v22 = vrot.slane %v1544_v32, 4 }
 0x111   :  { %v386_v44 = vadd.f32 %v385_v22, %v1544_v32  ;;  %v559_v22 = vadd.f32 %v558_v45, %v557_v25 }
 0x113   :  { %v387_v21 = vrot.slane %v386_v44, 2 }
 0x115   :  { %v388_v45 = vadd.f32 %v387_v21, %v386_v44 }
 0x125   :  { %823 = vrot.lane.b32.xlu0 %v1427_v27, %s1344_s18 }
 0x12e   :  { %v198_v20 = vpop.permute.xlu0 %197 }
 0x12f   :  { %v201_v46 = vsub.f32 %v198_v20, %v1419_v17  ;;  %v365_v20 = vrot.slane %v364_v28, 2 }
 0x131   :  { %v225_v41 = vmul.f32 %v1518_v13, %v201_v46  ;;  %v366_v25 = vadd.f32 %v365_v20, %v364_v28  ;;  %v1746_v20 = vadd.f32 %v347_v16, %v346_v7 }
 0x132   :  { %v200_v43 = vpop.permute.xlu0 %199 }
 0x133   :  { %v202_v48 = vsub.f32 %v200_v43, %v1425_v24  ;;  %v206_v53 = vpop.permute.xlu1 %205  ;;  %v256_v10 = vmul.f32 %v225_v41, %v201_v46 }
 0x134   :  { %v208_v18 = vsub.f32 %v206_v53, %v1427_v27 }
 0x135   :  { %v226_v32 = vmul.f32 %v1518_v13, %v202_v48 }
 0x136   :  { %v204_v14 = vpop.permute.xlu0 %203  ;;  %v228_v15 = vmul.f32 %v1518_v13, %v208_v18 }
 0x137   :  { %v238_v29 = vadd.f32 %v226_v32, %v225_v41  ;;  %v257_v43 = vmul.f32 %v226_v32, %v202_v48  ;;  %v207_v36 = vsub.f32 %v204_v14, %v1438_v33  ;;  %v279_v58 = vmul.f32 %v226_v32, %v208_v18 }
 0x138   :  { %v560_v48 = vrot.slane %v559_v22, 2  ;;  %v268_v38 = vmul.f32 %v228_v15, %v208_v18 }
 0x139   :  { %v258_v53 = vadd.f32 %v257_v43, %v256_v10  ;;  %v227_v34 = vmul.f32 %v1518_v13, %v207_v36  ;;  %v278_v46 = vmul.f32 %v225_v41, %v207_v36  ;;  %v239_v56 = vrot.slane %v238_v29, 4 }
 0x13a   :  { %v416_v1 = vpop.permute.xlu0 %415  ;;  %v561_v37 = vadd.f32 %v560_v48, %v559_v22 }
 0x13b   :  { %v259_v50 = vrot.slane %v258_v53, 4  ;;  %v247_v63 = vadd.f32 %v228_v15, %v227_v34  ;;  %v267_v14 = vmul.f32 %v227_v34, %v207_v36  ;;  %v417_v35 = vsub.s32 %v416_v1, %v1397_v2  ;;  %v404_v34 = vpop.permute.xlu1 %403 }
 0x13c   :  { %v240_v61 = vadd.f32 %v239_v56, %v238_v29  ;;  %v280_v43 = vadd.f32 %v279_v58, %v278_v46  ;;  %v367_v15 = vrot.slane %v366_v25, 1  ;;  %v389_v36 = vrot.slane %v388_v45, 1 }
 0x13d   :  { %v269_v10 = vadd.f32 %v268_v38, %v267_v14  ;;  %v248_v13 = vrot.slane %v247_v63, 4  ;;  %v419_v32 = vsub.s32 0, %v417_v35  ;;  %v260_v44 = vadd.f32 %v259_v50, %v258_v53 }
 0x13e   :  { %v406_v39 = vpop.permute.xlu0 %405  ;;  %v241_v28 = vrot.slane %v240_v61, 2  ;;  %v582_v56 = vrot.slane %v581_v54, 2  ;;  %v281_v58 = vrot.slane %v280_v43, 4  ;;  %v1749_v46 = vadd.f32 %v1587_v52, %v535_v4 }
 0x13f   :  { %v249_v18 = vadd.f32 %v248_v13, %v247_v63  ;;  %v270_v21 = vrot.slane %v269_v10, 4  ;;  %v1192_v29 = vmin.u32 %v419_v32, %v417_v35  ;;  %v566_v14 = vmul.f32 %v535_v4, %v501_v40 }
 0x140   :  { %v242_v31 = vadd.f32 %v241_v28, %v240_v61  ;;  %v261_v7 = vrot.slane %v260_v44, 2  ;;  %v1757_v53 = vadd.f32 %v367_v15, %v366_v25  ;;  %v1759_v48 = vadd.f32 %v389_v36, %v388_v45  ;;  %v410_v28 = vpop.permute.xlu1 %409 }
 0x141   :  { %v250_v38 = vrot.slane %v249_v18, 2  ;;  %vm421_vm1 = vcmp.eq.s32.totalorder %v1192_v29, 2  ;;  %v271_v63 = vadd.f32 %v270_v21, %v269_v10  ;;  %vm424_vm4 = vcmp.lt.s32.totalorder %v416_v1, 128 }
 0x142   :  { %v1751_v41 = vpop.permute.xlu0 %621  ;;  %v243_v50 = vrot.slane %v242_v31, 1  ;;  %vm422_vm0 = vmand %vm1665_vm2, %vm421_vm1  ;;  %v539_v35 = vadd.f32 %v1567_v42, %v1691_v9  ;;  %v562_v61 = vrot.slane %v561_v37, 1  ;;  %v282_v10 = vadd.f32 %v281_v58, %v280_v43 }
 0x143   :  { %v623_v16 = vsub.s32 %v1751_v41, %v1397_v2  ;;  %v251_v22 = vadd.f32 %v250_v38, %v249_v18  ;;  %vm423_vm3 = vmand %vm1533_vm15, %vm421_vm1  ;;  %v1765_v13 = vadd.f32 %v582_v56, %v581_v54  ;;  %v1768_v32 = vmul.f32 %v535_v4, %v1681_v62 }
 0x144   :  { %v244_v40 = vadd.f32 %v243_v50, %v242_v31  ;;  %vm425_vm14 = vmand %vm422_vm0, %vm424_vm4  ;;  %v2293_v25 = vmov 0.0   ;;  %v262_v18 = vadd.f32 %v261_v7, %v260_v44  ;;  %v272_v21 = vrot.slane %v271_v63, 2 }
 0x145   :  { %v625_v47 = vsub.s32 0, %v623_v16  ;;  %vm426_vm2 = vmand %vm423_vm3, %vm424_vm4  ;;  %v1193_v45 = vsel %vm425_vm14, 1.0, %v2293_v25  ;;  %v252_v1 = vrot.slane %v251_v22, 1  ;;  %v407_v42 = vsub.f32 %v404_v34, %v1419_v17 }
 0x146   :  { %245 = vadd.xlane.f32.xlu0 %v244_v40  ;;  %v1771_v23 = vpop.permute.xlu0 %827  ;;  %v1194_v9 = vsel %vm426_vm2, 1.0, %v2293_v25  ;;  %v408_v54 = vsub.f32 %v406_v39, %v1425_v24  ;;  %v540_v62 = vrot.slane %v539_v35, 4  ;;  %v549_v4 = vrot.slane %v1749_v46, 4 }
 0x147   :  { %v1199_v43 = vmin.u32 %v625_v47, %v623_v16  ;;  %v435_v15 = vadd.f32 %v1194_v9, %v1193_v45  ;;  %v1778_v36 = vadd.f32 %v1592_v57, %v566_v14  ;;  %v431_v29 = vmul.f32 %v1193_v45, %v407_v42 }
 0x148   :  { %v413_v31 = vsub.f32 %v410_v28, %v1438_v33  ;;  %v432_v56 = vmul.f32 %v1194_v9, %v408_v54  ;;  %v283_v44 = vrot.slane %v282_v10, 2  ;;  %v253_v34 = vadd.f32 %v252_v1, %v251_v22 }
 0x149   :  { %vm627_vm15 = vcmp.eq.s32.totalorder %v1199_v43, 4  ;;  %v263_v58 = vrot.slane %v262_v18, 1  ;;  %v273_v39 = vadd.f32 %v272_v21, %v271_v63  ;;  %v436_v16 = vrot.slane %v435_v15, 4 }
 0x14a   :  { %358 = vadd.xlane.f32.xlu0 %v1731_v8  ;;  %v412_v38 = vpop.permute.xlu0 %411  ;;  %v433_v50 = vmul.f32 %v1193_v45, %v413_v31  ;;  %v589_v57 = vmul.f32 %v1587_v52, %v1684_v3  ;;  %254 = vadd.xlane.f32.xlu1 %v253_v34  ;;  %v1785_v14 = vadd.f32 %v540_v62, %v539_v35  ;;  %v710_v47 = vrot.slane %v1427_v27, 4  ;;  %vm628_vm5 = vmand %vm1699_vm11, %vm627_vm15 }
 0x14b   :  { %v414_v7 = vsub.f32 %v412_v38, %v1427_v27  ;;  %v1787_v40 = vadd.f32 %v562_v61, %v561_v37  ;;  %v701_v8 = vrot.slane %v1419_v17, 4  ;;  %v462_v22 = vmul.f32 %v431_v29, %v407_v42  ;;  %vm1797_vm7 = vmand %vm1582_vm9, %vm627_vm15 }
 0x14c   :  { %v463_v28 = vmul.f32 %v432_v56, %v408_v54  ;;  %v284_v45 = vadd.f32 %v283_v44, %v282_v10  ;;  %v444_v1 = vadd.f32 %v432_v56, %v431_v29  ;;  %v264_v3 = vadd.f32 %v263_v58, %v262_v18 }
 0x14d   :  { %v434_v63 = vmul.f32 %v1194_v9, %v414_v7  ;;  %v274_v35 = vrot.slane %v273_v39, 1  ;;  %v437_v61 = vadd.f32 %v436_v16, %v435_v15  ;;  %v473_v21 = vmul.f32 %v433_v50, %v413_v31 }
 0x14e   :  { %380 = vadd.xlane.f32.xlu0 %v1739_v19  ;;  %v1802_v37 = vpop.permute.xlu0 %609  ;;  %vm630_vm10 = vcmp.lt.s32.totalorder %v1751_v41, 128  ;;  %265 = vadd.xlane.f32.xlu1 %v264_v3  ;;  %v1811_v19 = vadd.f32 %v549_v4, %v1749_v46  ;;  %v569_v18 = vrot.slane %v1778_v36, 4  ;;  %v464_v62 = vadd.f32 %v463_v28, %v462_v22 }
 0x14f   :  { %v453_v42 = vadd.f32 %v434_v63, %v433_v50  ;;  %v474_v10 = vmul.f32 %v434_v63, %v414_v7  ;;  %vm1805_vm12 = vmand %vm628_vm5, %vm630_vm10  ;;  %v438_v54 = vrot.slane %v437_v61, 2  ;;  %v285_v15 = vrot.slane %v284_v45, 1 }
 0x150   :  { %vm632_vm13 = vmand %vm1797_vm7, %vm630_vm10  ;;  %v485_v34 = vmul.f32 %v432_v56, %v414_v7  ;;  %v275_v38 = vadd.f32 %v274_v35, %v273_v39  ;;  %v445_v16 = vrot.slane %v444_v1, 4  ;;  %v484_v63 = vmul.f32 %v431_v29, %v413_v31 }
 0x151   :  { %v475_v41 = vadd.f32 %v474_v10, %v473_v21  ;;  %v454_v44 = vrot.slane %v453_v42, 4  ;;  %v439_v50 = vadd.f32 %v438_v54, %v437_v61  ;;  %v542_v43 = vrot.slane %v1785_v14, 2 }
 0x152   :  { %v612_v58 = vpop.permute.xlu0 %611  ;;  %v1818_v46 = vadd.f32 %v589_v57, %v1768_v32  ;;  %v1823_v4 = vsel %vm1805_vm12, 1.0, %v2293_v25  ;;  %v1826_v22 = vsel %vm632_vm13, 1.0, %v2293_v25  ;;  %276 = vadd.xlane.f32.xlu1 %v275_v38  ;;  %v465_v7 = vrot.slane %v464_v62, 4 }
 0x153   :  { %v455_v3 = vadd.f32 %v454_v44, %v453_v42  ;;  %v440_v56 = vrot.slane %v439_v50, 1  ;;  %v476_v39 = vrot.slane %v475_v41, 4  ;;  %v2298_v29 = vand.u32 4, %v1404_v6 }
 0x154   :  { %v829_v32 = vsub.s32 %v1771_v23, %v1397_v2  ;;  %v286_v57 = vadd.f32 %v285_v15, %v284_v45  ;;  %v2301_v52 = vand.u32 4, %v1401_v5  ;;  %v486_v61 = vadd.f32 %v485_v34, %v484_v63 }
 0x155   :  { %vm1830_vm6 = vcmp.eq.s32.totalorder %v2298_v29, 0  ;;  %v456_v28 = vrot.slane %v455_v3, 2  ;;  %v441_v21 = vadd.f32 %v440_v56, %v439_v50  ;;  %v477_v10 = vadd.f32 %v476_v39, %v475_v41 }
 0x156   :  { %vm1838_vm1 = vcmp.eq.s32.totalorder %v2301_v52, 0  ;;  %v616_v42 = vpop.permute.xlu0 %615  ;;  %v446_v6 = vadd.f32 %v445_v16, %v444_v1  ;;  %v641_v9 = vadd.f32 %v1826_v22, %v1823_v4  ;;  %v2304_v45 = vrot.slane %v1431_v30, 4  ;;  %287 = vadd.xlane.f32.xlu1 %v286_v57 }
 0x157   :  { %v1845_v54 = vsub.f32 %v616_v42, %v1438_v33  ;;  %v457_v44 = vadd.f32 %v456_v28, %v455_v3  ;;  %442 = vadd.xlane.f32.xlu0 %v441_v21  ;;  %v478_v34 = vrot.slane %v477_v10, 2  ;;  %v543_v41 = vadd.f32 %v542_v43, %v1785_v14  ;;  %vm809_vm3 = vmand %vm1699_vm11, %vm1838_vm1 }
 0x158   :  { %v712_v15 = vsel %vm704_vm8, %v710_v47, %v2304_v45  ;;  %v2305_v1 = vrot.slane %v1438_v33, 4  ;;  %v2306_v50 = vrot.slane %v1425_v24, 4  ;;  %v2307_v16 = vand.u32 4, %v1397_v2 }
 0x159   :  { %v831_v14 = vsub.s32 0, %v829_v32  ;;  %v458_v43 = vrot.slane %v457_v44, 1  ;;  %v466_v3 = vadd.f32 %v465_v7, %v464_v62  ;;  %v551_v56 = vrot.slane %v1811_v19, 2 }
 0x15a   :  { %v713_v38 = vsel %vm704_vm8, %v2305_v1, %v710_v47  ;;  %v706_v30 = vsel %vm704_vm8, %v701_v8, %v2306_v50  ;;  %vm1868_vm0 = vcmp.eq.s32.totalorder %v2307_v16, 0  ;;  %v639_v47 = vmul.f32 %v1823_v4, %v1845_v54  ;;  %v618_v39 = vpop.permute.xlu0 %617  ;;  %349 = vadd.xlane.f32.xlu1 %v1746_v20  ;;  %vm810_vm8 = vmand %vm1582_vm9, %vm1830_vm6 }
 0x15b   :  { %v479_v29 = vadd.f32 %v478_v34, %v477_v10  ;;  %v447_v57 = vrot.slane %v446_v6, 2  ;;  %v487_v28 = vrot.slane %v486_v61, 4  ;;  %v1876_v8 = vsub.f32 %v618_v39, %v1427_v27  ;;  %vm1919_vm14 = vmand %vm810_vm8, %vm1868_vm0 }
 0x15c   :  { %v459_v52 = vadd.f32 %v458_v43, %v457_v44  ;;  %v642_v21 = vrot.slane %v641_v9, 4  ;;  %v1879_v42 = vadd.f32 %v569_v18, %v1778_v36  ;;  %v544_v7 = vrot.slane %v543_v41, 1  ;;  %vm1934_vm2 = vmand %vm809_vm3, %vm1868_vm0 }
 0x15d   :  { %v480_v62 = vrot.slane %v479_v29, 1  ;;  %v1883_v45 = vsub.f32 %v713_v38, %v1438_v33  ;;  %v1886_v1 = vsub.f32 %v712_v15, %v1427_v27  ;;  %v1206_v10 = vmin.u32 %v831_v14, %v829_v32 }
 0x15e   :  { %v613_v34 = vsub.f32 %v1802_v37, %v1419_v17  ;;  %v614_v44 = vsub.f32 %v612_v58, %v1425_v24  ;;  %v640_v36 = vmul.f32 %v1826_v22, %v1876_v8  ;;  %460 = vadd.xlane.f32.xlu0 %v459_v52  ;;  %v679_v20 = vmul.f32 %v639_v47, %v1845_v54 }
 0x15f   :  { %v448_v18 = vadd.f32 %v447_v57, %v446_v6  ;;  %v467_v50 = vrot.slane %v466_v3, 2  ;;  %v488_v16 = vadd.f32 %v487_v28, %v486_v61  ;;  %v481_v15 = vadd.f32 %v480_v62, %v479_v29  ;;  %369 = vadd.xlane.f32.xlu1 %v1757_v53 }
 0x160   :  { %v659_v38 = vadd.f32 %v640_v36, %v639_v47  ;;  %v680_v43 = vmul.f32 %v640_v36, %v1876_v8  ;;  %v643_v39 = vadd.f32 %v642_v21, %v641_v9  ;;  %v545_v37 = vadd.f32 %v544_v7, %v543_v41 }
 0x161   :  { %v591_v58 = vrot.slane %v1818_v46, 4  ;;  %v743_v32 = vmul.f32 %v1726_v60, %v1883_v45  ;;  %v744_v61 = vmul.f32 %v1612_v11, %v1886_v1  ;;  %v638_v6 = vmul.f32 %v1826_v22, %v614_v44 }
 0x162   :  { %v681_v9 = vadd.f32 %v680_v43, %v679_v20  ;;  %482 = vadd.xlane.f32.xlu0 %v481_v15  ;;  %v660_v14 = vrot.slane %v659_v38, 4  ;;  %v745_v53 = vadd.f32 %v1612_v11, %v1726_v60  ;;  %vm833_vm4 = vcmp.eq.s32.totalorder %v1206_v10, 8 }
 0x163   :  { %v449_v41 = vrot.slane %v448_v18, 1  ;;  %v468_v47 = vadd.f32 %v467_v50, %v466_v3  ;;  %v489_v29 = vrot.slane %v488_v16, 2  ;;  %v637_v22 = vmul.f32 %v1823_v4, %v613_v34  ;;  %391 = vadd.xlane.f32.xlu1 %v1759_v48  ;;  %vm1944_vm9 = vmand %vm1934_vm2, %vm833_vm4 }
 0x164   :  { %v644_v28 = vrot.slane %v643_v39, 2  ;;  %v661_v52 = vadd.f32 %v660_v14, %v659_v38  ;;  %v1925_v11 = vsub.f32 %v706_v30, %v1419_v17  ;;  %v552_v4 = vadd.f32 %v551_v56, %v1811_v19  ;;  %vm1953_vm15 = vmand %vm1919_vm14, %vm833_vm4 }
 0x165   :  { %v682_v31 = vrot.slane %v681_v9, 4  ;;  %v763_v3 = vadd.f32 %v744_v61, %v743_v32  ;;  %v783_v30 = vmul.f32 %v743_v32, %v1883_v45  ;;  %vm836_vm11 = vcmp.lt.s32.totalorder %v1771_v23, 128 }
 0x166   :  { %v669_v35 = vmul.f32 %v638_v6, %v614_v44  ;;  %546 = vadd.xlane.f32.xlu0 %v545_v37  ;;  %v746_v63 = vrot.slane %v745_v53, 4  ;;  %v784_v48 = vmul.f32 %v744_v61, %v1886_v1  ;;  %v650_v56 = vadd.f32 %v638_v6, %v637_v22  ;;  %vm1961_vm5 = vmand %vm1944_vm9, %vm836_vm11 }
 0x167   :  { %v450_v21 = vadd.f32 %v449_v41, %v448_v18  ;;  %v469_v62 = vrot.slane %v468_v47, 1  ;;  %v490_v7 = vadd.f32 %v489_v29, %v488_v16  ;;  %v668_v36 = vmul.f32 %v637_v22, %v613_v34  ;;  %vm838_vm7 = vmand %vm1953_vm15, %vm836_vm11 }
 0x168   :  { %v645_v20 = vadd.f32 %v644_v28, %v643_v39  ;;  %v662_v50 = vrot.slane %v661_v52, 2  ;;  %v683_v38 = vadd.f32 %v682_v31, %v681_v9  ;;  %v2320_v44 = vrot.slane %v1765_v13, 1 }
 0x169   :  { %451 = vadd.xlane.f32.xlu1 %v450_v21  ;;  %v571_v18 = vrot.slane %v1879_v42, 2  ;;  %v592_v34 = vadd.f32 %v591_v58, %v1818_v46  ;;  %v741_v16 = vmul.f32 %v1726_v60, %v1925_v11  ;;  %v670_v15 = vadd.f32 %v669_v35, %v668_v36 }
 0x16a   :  { %v585_v43 = vadd.f32 %v2320_v44, %v1765_v13  ;;  %564 = vadd.xlane.f32.xlu0 %v1787_v40  ;;  %v747_v39 = vadd.f32 %v746_v63, %v745_v53  ;;  %v764_v37 = vrot.slane %v763_v3, 4  ;;  %v785_v32 = vadd.f32 %v784_v48, %v783_v30 }
 0x16b   :  { %v691_v13 = vmul.f32 %v638_v6, %v1876_v8  ;;  %v470_v61 = vadd.f32 %v469_v62, %v468_v47  ;;  %v491_v9 = vrot.slane %v490_v7, 1  ;;  %v651_v14 = vrot.slane %v650_v56, 4  ;;  %v818_v62 = vpop.permute.xlu0 %817 }
 0x16c   :  { %v553_v46 = vrot.slane %v552_v4, 1  ;;  %v646_v58 = vrot.slane %v645_v20, 1  ;;  %v663_v41 = vadd.f32 %v662_v50, %v661_v52  ;;  %v684_v60 = vrot.slane %v683_v38, 2 }
 0x16d   :  { %v1981_v23 = vsel %vm1961_vm5, 1.0, %v2293_v25  ;;  %v1984_v29 = vsel %vm838_vm7, 1.0, %v2293_v25  ;;  %v690_v40 = vmul.f32 %v637_v22, %v1845_v54  ;;  %471 = vadd.xlane.f32.xlu1 %v470_v61  ;;  %v572_v8 = vadd.f32 %v571_v18, %v1879_v42 }
 0x16e   :  { %586 = vadd.xlane.f32.xlu0 %v585_v43  ;;  %v593_v6 = vrot.slane %v592_v34, 2  ;;  %v748_v53 = vrot.slane %v747_v39, 2  ;;  %v765_v47 = vadd.f32 %v764_v37, %v763_v3  ;;  %v786_v57 = vrot.slane %v785_v32, 4 }
 0x16f   :  { %v671_v28 = vrot.slane %v670_v15, 4  ;;  %v692_v52 = vadd.f32 %v691_v13, %v690_v40  ;;  %v492_v31 = vadd.f32 %v491_v9, %v490_v7  ;;  %v652_v30 = vadd.f32 %v651_v14, %v650_v56 }
 0x170   :  { %v847_v12 = vadd.f32 %v1984_v29, %v1981_v23  ;;  %v647_v35 = vadd.f32 %v646_v58, %v645_v20  ;;  %v664_v63 = vrot.slane %v663_v41, 1  ;;  %v685_v48 = vadd.f32 %v684_v60, %v683_v38 }
 0x171   :  { %493 = vadd.xlane.f32.xlu1 %v492_v31  ;;  %v573_v54 = vrot.slane %v572_v8, 1  ;;  %v754_v22 = vadd.f32 %v1618_v26, %v741_v16  ;;  %v772_v42 = vmul.f32 %v741_v16, %v1925_v11  ;;  %v554_v19 = vadd.f32 %v553_v46, %v552_v4 }
 0x172   :  { %648 = vadd.xlane.f32.xlu0 %v647_v35  ;;  %v594_v3 = vadd.f32 %v593_v6, %v592_v34  ;;  %v749_v21 = vadd.f32 %v748_v53, %v747_v39  ;;  %v653_v36 = vrot.slane %v652_v30, 2  ;;  %v672_v7 = vadd.f32 %v671_v28, %v670_v15  ;;  %v816_v39 = vpop.permute.xlu1 %815 }
 0x173   :  { %v766_v56 = vrot.slane %v765_v47, 2  ;;  %v693_v50 = vrot.slane %v692_v52, 4  ;;  %v665_v10 = vadd.f32 %v664_v63, %v663_v41  ;;  %v686_v44 = vrot.slane %v685_v48, 1 }
 0x174   :  { %v787_v20 = vadd.f32 %v786_v57, %v785_v32  ;;  %v848_v43 = vrot.slane %v847_v12, 4  ;;  %v574_v38 = vadd.f32 %v573_v54, %v572_v8  ;;  %v755_v18 = vrot.slane %v754_v22, 4 }
 0x175   :  { %555 = vadd.xlane.f32.xlu1 %v554_v19  ;;  %v774_v37 = vadd.f32 %v1623_v55, %v772_v42  ;;  %v820_v11 = vsub.f32 %v818_v62, %v1425_v24  ;;  %v750_v4 = vrot.slane %v749_v21, 1  ;;  %v794_v34 = vmul.f32 %v741_v16, %v1883_v45 }
 0x176   :  { %666 = vadd.xlane.f32.xlu0 %v665_v10  ;;  %v795_v15 = vmul.f32 %v1618_v26, %v1886_v1  ;;  %v595_v13 = vrot.slane %v594_v3, 1  ;;  %v654_v61 = vadd.f32 %v653_v36, %v652_v30  ;;  %v673_v9 = vrot.slane %v672_v7, 2 }
 0x177   :  { %v694_v32 = vadd.f32 %v693_v50, %v692_v52  ;;  %v687_v14 = vadd.f32 %v686_v44, %v685_v48  ;;  %v767_v46 = vadd.f32 %v766_v56, %v765_v47  ;;  %v788_v58 = vrot.slane %v787_v20, 2 }
 0x178   :  { %v849_v41 = vadd.f32 %v848_v43, %v847_v12  ;;  %v756_v55 = vadd.f32 %v755_v18, %v754_v22  ;;  %v775_v60 = vrot.slane %v774_v37, 4  ;;  %v819_v40 = vsub.f32 %v816_v39, %v1419_v17 }
 0x179   :  { %575 = vadd.xlane.f32.xlu1 %v574_v38  ;;  %v1999_v8 = vmul.f32 %v1984_v29, %v820_v11  ;;  %v751_v45 = vadd.f32 %v750_v4, %v749_v21  ;;  %v796_v26 = vadd.f32 %v795_v15, %v794_v34  ;;  %v596_v1 = vadd.f32 %v595_v13, %v594_v3 }
 0x17a   :  { %688 = vadd.xlane.f32.xlu0 %v687_v14  ;;  %v655_v16 = vrot.slane %v654_v61, 1  ;;  %v674_v6 = vadd.f32 %v673_v9, %v672_v7  ;;  %v695_v53 = vrot.slane %v694_v32, 2  ;;  %v2002_v57 = vmul.f32 %v1981_v23, %v819_v40 }
 0x17b   :  { %v768_v47 = vrot.slane %v767_v46, 1  ;;  %v789_v28 = vadd.f32 %v788_v58, %v787_v20  ;;  %v850_v52 = vrot.slane %v849_v41, 2  ;;  %v757_v30 = vrot.slane %v756_v55, 2 }
 0x17c   :  { %v856_v31 = vadd.f32 %v1999_v8, %v2002_v57  ;;  %v776_v12 = vadd.f32 %v775_v60, %v774_v37  ;;  %v797_v35 = vrot.slane %v796_v26, 4  ;;  %v875_v63 = vmul.f32 %v1999_v8, %v820_v11 }
 0x17d   :  { %597 = vadd.xlane.f32.xlu1 %v596_v1  ;;  %v656_v48 = vadd.f32 %v655_v16, %v654_v61  ;;  %v675_v54 = vrot.slane %v674_v6, 1  ;;  %v696_v22 = vadd.f32 %v695_v53, %v694_v32  ;;  %v769_v42 = vadd.f32 %v768_v47, %v767_v46  ;;  %v822_v16 = vpop.permute.xlu0 %821 }
 0x17e   :  { %752 = vadd.xlane.f32.xlu0 %v751_v45  ;;  %v790_v19 = vrot.slane %v789_v28, 1  ;;  %v851_v3 = vadd.f32 %v850_v52, %v849_v41  ;;  %v874_v21 = vmul.f32 %v2002_v57, %v819_v40  ;;  %v758_v62 = vadd.f32 %v757_v30, %v756_v55 }
 0x17f   :  { %v777_v36 = vrot.slane %v776_v12, 2  ;;  %v798_v7 = vadd.f32 %v797_v35, %v796_v26  ;;  %v676_v50 = vadd.f32 %v675_v54, %v674_v6  ;;  %v697_v10 = vrot.slane %v696_v22, 1 }
 0x180   :  { %v876_v56 = vadd.f32 %v875_v63, %v874_v21  ;;  %v857_v44 = vrot.slane %v856_v31, 4  ;;  %v791_v20 = vadd.f32 %v790_v19, %v789_v28  ;;  %v852_v43 = vrot.slane %v851_v3, 1 }
 0x181   :  { %657 = vadd.xlane.f32.xlu1 %v656_v48  ;;  %v759_v38 = vrot.slane %v758_v62, 1  ;;  %v778_v18 = vadd.f32 %v777_v36, %v776_v12  ;;  %v698_v11 = vadd.f32 %v697_v10, %v696_v22  ;;  %v799_v4 = vrot.slane %v798_v7, 2 }
 0x182   :  { %770 = vadd.xlane.f32.xlu0 %v769_v42  ;;  %v877_v37 = vrot.slane %v876_v56, 4  ;;  %v858_v34 = vadd.f32 %v857_v44, %v856_v31  ;;  %v853_v15 = vadd.f32 %v852_v43, %v851_v3  ;;  %v907_v14 = vsub.f32 %v1425_v24, %v1419_v17 }
 0x183   :  { %v760_v39 = vadd.f32 %v759_v38, %v758_v62  ;;  %v779_v13 = vrot.slane %v778_v18, 1  ;;  %v800_v61 = vadd.f32 %v799_v4, %v798_v7  ;;  %v1209_v46 = vsel %vm1934_vm2, 1.0, %v2293_v25  ;;  %v2321_v62 = vld [vmem:[#allocation13_spill] sm:$0xff] }
 0x184   :  { %v859_v9 = vrot.slane %v858_v34, 2  ;;  %v878_v32 = vadd.f32 %v877_v37, %v876_v56  ;;  %v930_v40 = vmul.f32 %v1209_v46, %v907_v14  ;;  %v962_v24 = vmul.f32 %v1640_v0, %v1633_v49 }
 0x185   :  { %677 = vadd.xlane.f32.xlu1 %v676_v50  ;;  %v780_v58 = vadd.f32 %v779_v13, %v778_v18  ;;  %v801_v41 = vrot.slane %v800_v61, 1  ;;  %v909_v28 = vsub.f32 %v1427_v27, %v1438_v33  ;;  %v825_v52 = vsub.f32 %v822_v16, %v1438_v33 }
 0x186   :  { %792 = vadd.xlane.f32.xlu0 %v791_v20  ;;  %v860_v55 = vadd.f32 %v859_v9, %v858_v34  ;;  %v879_v60 = vrot.slane %v878_v32, 2  ;;  %v961_v6 = vmul.f32 %v930_v40, %v907_v14  ;;  %v943_v17 = vadd.f32 %v1640_v0, %v930_v40 }
 0x187   :  { %v802_v45 = vadd.f32 %v801_v41, %v800_v61  ;;  %v983_v63 = vmul.f32 %v930_v40, %v909_v28  ;;  %v932_v48 = vmul.f32 %v1209_v46, %v909_v28  ;;  %v933_v54 = vmul.f32 0.0, %v1637_v59 }
 0x188   :  { %v861_v26 = vrot.slane %v860_v55, 1  ;;  %v880_v1 = vadd.f32 %v879_v60, %v878_v32  ;;  %v944_v30 = vrot.slane %v943_v17, 4  ;;  %v963_v12 = vadd.f32 %v962_v24, %v961_v6 }
 0x189   :  { %699 = vadd.xlane.f32.xlu1 %v698_v11  ;;  %v845_v22 = vmul.f32 %v1981_v23, %v825_v52  ;;  %v896_v19 = vmul.f32 %v2002_v57, %v825_v52  ;;  %v935_v21 = vrot.slane %v1209_v46, 4  ;;  %v985_v36 = vadd.f32 %v2321_v62, %v983_v63 }
 0x18a   :  { %854 = vadd.xlane.f32.xlu0 %v853_v15  ;;  %v862_v53 = vadd.f32 %v861_v26, %v860_v55  ;;  %v881_v47 = vrot.slane %v880_v1, 1  ;;  %v945_v0 = vadd.f32 %v944_v30, %v943_v17  ;;  %v964_v42 = vrot.slane %v963_v12, 4 }
 0x18b   :  { %v952_v7 = vadd.f32 %v933_v54, %v932_v48  ;;  %v972_v56 = vmul.f32 %v932_v48, %v909_v28  ;;  %v973_v50 = vmul.f32 %v933_v54, %v1637_v59  ;;  %v885_v10 = vmul.f32 %v845_v22, %v825_v52 }
 0x18c   :  { %v882_v31 = vadd.f32 %v881_v47, %v880_v1  ;;  %v936_v18 = vadd.f32 %v1209_v46, %v935_v21  ;;  %v946_v57 = vrot.slane %v945_v0, 2  ;;  %v965_v37 = vadd.f32 %v964_v42, %v963_v12 }
 0x18d   :  { %761 = vadd.xlane.f32.xlu1 %v760_v39  ;;  %v953_v11 = vrot.slane %v952_v7, 4  ;;  %v974_v15 = vadd.f32 %v973_v50, %v972_v56  ;;  %vm995_vm10 = vcmp.eq.s32.totalorder %v1401_v5, 0  ;;  %vm994_vm12 = vcmp.eq.s32.totalorder %v1397_v2, 0 }
 0x18e   :  { %v937_v59 = vrot.slane %v936_v18, 2  ;;  %v947_v9 = vadd.f32 %v946_v57, %v945_v0  ;;  %v966_v32 = vrot.slane %v965_v37, 2  ;;  %vm999_vm13 = vcmp.eq.s32.totalorder %v1401_v5, 1  ;;  %vm996_vm6 = vmand %vm994_vm12, %vm995_vm10 }
 0x18f   :  { %v975_v46 = vrot.slane %v974_v15, 4  ;;  %vm1003_vm1 = vcmp.eq.s32.totalorder %v1401_v5, 2  ;;  %vm1000_vm0 = vmand %vm994_vm12, %vm999_vm13  ;;  %vm1007_vm8 = vcmp.eq.s32.totalorder %v1401_v5, 3  ;;  %vm1011_vm14 = vcmp.eq.s32.totalorder %v1401_v5, 4 }
 0x190   :  { %v938_v1 = vadd.f32 %v937_v59, %v936_v18  ;;  %v948_v16 = vrot.slane %v947_v9, 1  ;;  %v967_v6 = vadd.f32 %v966_v32, %v965_v37  ;;  %vm1004_vm3 = vmand %vm994_vm12, %vm1003_vm1  ;;  %vm1015_vm9 = vcmp.eq.s32.totalorder %v1401_v5, 5 }
 0x191   :  { %781 = vadd.xlane.f32.xlu1 %v780_v58  ;;  %v954_v58 = vadd.f32 %v953_v11, %v952_v7  ;;  %v976_v52 = vadd.f32 %v975_v46, %v974_v15  ;;  %vm1008_vm4 = vmand %vm994_vm12, %vm1007_vm8  ;;  %vm1019_vm11 = vcmp.eq.s32.totalorder %v1397_v2, 1 }
 0x192   :  { %v949_v30 = vadd.f32 %v948_v16, %v947_v9  ;;  %v968_v12 = vrot.slane %v967_v6, 1  ;;  %vm1012_vm2 = vmand %vm994_vm12, %vm1011_vm14 }
 0x193   :  { %v955_v47 = vrot.slane %v954_v58, 2  ;;  %v977_v54 = vrot.slane %v976_v52, 2  ;;  %vm1016_vm15 = vmand %vm994_vm12, %vm1015_vm9 }
 0x194   :  { %v969_v0 = vadd.f32 %v968_v12, %v967_v6  ;;  %vm1020_vm5 = vmand %vm1019_vm11, %vm995_vm10 }
 0x195   :  { %803 = vadd.xlane.f32.xlu1 %v802_v45  ;;  %v956_v48 = vadd.f32 %v955_v47, %v954_v58  ;;  %vm1023_vm7 = vmand %vm1019_vm11, %vm999_vm13 }
 0x196   :  { %vm1026_vm12 = vmand %vm1019_vm11, %vm1003_vm1 }
 0x198   :  { %v2016_v51 = vpop.xlane.xlu0 %169 }
 0x199   :  { %863 = vadd.xlane.f32.xlu1 %v862_v53 }
 0x19c   :  { %v824_v35 = vpop.permute.xlu0 %823 }
 0x19d   :  { %883 = vadd.xlane.f32.xlu1 %v882_v31  ;;  %v826_v49 = vsub.f32 %v824_v35, %v1427_v27  ;;  %v939_v31 = vrot.slane %v938_v1, 1 }
 0x19f   :  { %v846_v3 = vmul.f32 %v1984_v29, %v826_v49  ;;  %v897_v33 = vmul.f32 %v1999_v8, %v826_v49  ;;  %v986_v29 = vrot.slane %v985_v36, 4 }
 0x1a1   :  { %v865_v44 = vadd.f32 %v846_v3, %v845_v22  ;;  %v886_v23 = vmul.f32 %v846_v3, %v826_v49  ;;  %v898_v20 = vadd.f32 %v897_v33, %v896_v19  ;;  %v987_v14 = vadd.f32 %v986_v29, %v985_v36  ;;  %v237_v22 = vpop.xlane.xlu1 %236 }
 0x1a2   :  { %v940_v49 = vadd.f32 %v939_v31, %v938_v1  ;;  %v957_v19 = vrot.slane %v956_v48, 1  ;;  %v978_v3 = vadd.f32 %v977_v54, %v976_v52 }
 0x1a3   :  { %v887_v27 = vadd.f32 %v886_v23, %v885_v10  ;;  %v899_v43 = vrot.slane %v898_v20, 4  ;;  %v866_v38 = vrot.slane %v865_v44, 4  ;;  %v988_v53 = vrot.slane %v987_v14, 2 }
 0x1a4   :  { %v958_v62 = vadd.f32 %v957_v19, %v956_v48  ;;  %v979_v36 = vrot.slane %v978_v3, 1  ;;  %v997_v10 = vsel %vm996_vm6, 2048.0, %v2293_v25  ;;  %vm1029_vm6 = vmand %vm1019_vm11, %vm1007_vm8 }
 0x1a5   :  { %v900_v8 = vadd.f32 %v899_v43, %v898_v20  ;;  %v867_v4 = vadd.f32 %v866_v38, %v865_v44  ;;  %v888_v34 = vrot.slane %v887_v27, 4  ;;  %v989_v63 = vadd.f32 %v988_v53, %v987_v14  ;;  %v150_v33 = vpop.xlane.xlu1 %149 }
 0x1a6   :  { %v980_v7 = vadd.f32 %v979_v36, %v978_v3  ;;  %v1001_v44 = vsel %vm1000_vm0, %v150_v33, 0.0  ;;  %vm1032_vm0 = vmand %vm1019_vm11, %vm1011_vm14 }
 0x1a7   :  { %v901_v39 = vrot.slane %v900_v8, 2  ;;  %v868_v13 = vrot.slane %v867_v4, 2  ;;  %v889_v61 = vadd.f32 %v888_v34, %v887_v27  ;;  %v990_v42 = vrot.slane %v989_v63, 1 }
 0x1a8   :  { %v1002_v20 = vadd.f32 %v1001_v44, %v997_v10  ;;  %v1009_v27 = vsel %vm1008_vm4, %v2016_v51, 0.0 }
 0x1a9   :  { %v902_v41 = vadd.f32 %v901_v39, %v900_v8  ;;  %v869_v55 = vadd.f32 %v868_v13, %v867_v4  ;;  %v890_v60 = vrot.slane %v889_v61, 2  ;;  %v991_v21 = vadd.f32 %v990_v42, %v989_v63  ;;  %v159_v56 = vpop.xlane.xlu1 %158 }
 0x1aa   :  { %v1005_v23 = vsel %vm1004_vm3, %v159_v56, 0.0  ;;  %v1021_v4 = vsel %vm1020_vm5, %v237_v22, 0.0  ;;  %vm1038_vm3 = vcmp.eq.s32.totalorder %v1397_v2, 2 }
 0x1ab   :  { %v903_v40 = vrot.slane %v902_v41, 1  ;;  %v870_v45 = vrot.slane %v869_v55, 1  ;;  %v891_v26 = vadd.f32 %v890_v60, %v889_v61  ;;  %v1006_v43 = vadd.f32 %v1005_v23, %v1002_v20  ;;  %vm1039_vm4 = vmand %vm1038_vm3, %vm995_vm10 }
 0x1ac   :  { %vm1045_vm5 = vmand %vm1038_vm3, %vm1003_vm1 }
 0x1ad   :  { %v904_v17 = vadd.f32 %v903_v40, %v902_v41  ;;  %v871_v24 = vadd.f32 %v870_v45, %v869_v55  ;;  %v892_v28 = vrot.slane %v891_v26, 1  ;;  %v181_v50 = vpop.xlane.xlu1 %180  ;;  %v1010_v25 = vadd.f32 %v1009_v27, %v1006_v43 }
 0x1ae   :  { %v1013_v57 = vsel %vm1012_vm2, %v181_v50, 0.0  ;;  %vm1035_vm2 = vmand %vm1019_vm11, %vm1015_vm9 }
 0x1af   :  { %905 = vadd.xlane.f32.xlu1 %v904_v17  ;;  %872 = vadd.xlane.f32.xlu0 %v871_v24  ;;  %v893_v35 = vadd.f32 %v892_v28, %v891_v26  ;;  %v1014_v51 = vadd.f32 %v1013_v57, %v1010_v25  ;;  %vm1048_vm11 = vmand %vm1038_vm3, %vm1007_vm8 }
 0x1b1   :  { %v192_v38 = vpop.xlane.xlu1 %191 }
 0x1b2   :  { %v1017_v29 = vsel %vm1016_vm15, %v192_v38, 0.0  ;;  %vm1042_vm15 = vmand %vm1038_vm3, %vm999_vm13 }
 0x1b3   :  { %950 = vadd.xlane.f32.xlu1 %v949_v30  ;;  %894 = vadd.xlane.f32.xlu0 %v893_v35  ;;  %v1018_v11 = vadd.f32 %v1017_v29, %v1014_v51 }
 0x1b5   :  { %v341_v18 = vpop.xlane.xlu1 %340  ;;  %v1022_v39 = vadd.f32 %v1021_v4, %v1018_v11 }
 0x1b6   :  { %v1040_v40 = vsel %vm1039_vm4, %v341_v18, 0.0 }
 0x1b7   :  { %970 = vadd.xlane.f32.xlu1 %v969_v0  ;;  %941 = vadd.xlane.f32.xlu0 %v940_v49 }
 0x1bb   :  { %992 = vadd.xlane.f32.xlu1 %v991_v21  ;;  %959 = vadd.xlane.f32.xlu0 %v958_v62 }
 0x1bf   :  { %981 = vadd.xlane.f32.xlu0 %v980_v7 }
 0x1cf   :  { %v246_v37 = vpop.xlane.xlu0 %245 }
 0x1d0   :  { %v1024_v34 = vsel %vm1023_vm7, %v246_v37, 0.0  ;;  %vm1051_vm7 = vmand %vm1038_vm3, %vm1011_vm14 }
 0x1d1   :  { %v1025_v59 = vadd.f32 %v1024_v34, %v1022_v39 }
 0x1d3   :  { %v255_v8 = vpop.xlane.xlu1 %254  ;;  %v359_v15 = vpop.xlane.xlu0 %358 }
 0x1d4   :  { %v1027_v61 = vsel %vm1026_vm12, %v255_v8, 0.0  ;;  %v1046_v24 = vsel %vm1045_vm5, %v359_v15, 0.0  ;;  %vm1057_vm12 = vcmp.eq.s32.totalorder %v1397_v2, 3  ;;  %vm1076_vm5 = vcmp.eq.s32.totalorder %v1397_v2, 4 }
 0x1d5   :  { %v1028_v32 = vadd.f32 %v1027_v61, %v1025_v59  ;;  %vm1061_vm4 = vmand %vm1057_vm12, %vm999_vm13 }
 0x1d7   :  { %v266_v13 = vpop.xlane.xlu1 %265  ;;  %v381_v58 = vpop.xlane.xlu0 %380 }
 0x1d8   :  { %v1030_v9 = vsel %vm1029_vm6, %v266_v13, 0.0  ;;  %vm1054_vm6 = vmand %vm1038_vm3, %vm1015_vm9  ;;  %v1052_v35 = vsel %vm1051_vm7, %v381_v58, 0.0 }
 0x1d9   :  { %v1031_v55 = vadd.f32 %v1030_v9, %v1028_v32  ;;  %vm1064_vm3 = vmand %vm1057_vm12, %vm1003_vm1 }
 0x1da   :  { %vm1073_vm7 = vmand %vm1057_vm12, %vm1015_vm9 }
 0x1db   :  { %v277_v14 = vpop.xlane.xlu1 %276 }
 0x1dc   :  { %v1033_v41 = vsel %vm1032_vm0, %v277_v14, 0.0  ;;  %vm1058_vm0 = vmand %vm1057_vm12, %vm995_vm10 }
 0x1dd   :  { %v1034_v60 = vadd.f32 %v1033_v41, %v1031_v55 }
 0x1df   :  { %v288_v46 = vpop.xlane.xlu1 %287 }
 0x1e0   :  { %v443_v45 = vpop.xlane.xlu0 %442  ;;  %v1036_v26 = vsel %vm1035_vm2, %v288_v46, 0.0  ;;  %vm1067_vm2 = vmand %vm1057_vm12, %vm1007_vm8 }
 0x1e1   :  { %v1037_v1 = vadd.f32 %v1036_v26, %v1034_v60  ;;  %v1059_v49 = vsel %vm1058_vm0, %v443_v45, 0.0  ;;  %vm1083_vm0 = vmand %vm1076_vm5, %vm1003_vm1 }
 0x1e3   :  { %v350_v16 = vpop.xlane.xlu1 %349  ;;  %v1041_v6 = vadd.f32 %v1040_v40, %v1037_v1 }
 0x1e4   :  { %v1043_v53 = vsel %vm1042_vm15, %v350_v16, 0.0  ;;  %vm1070_vm15 = vmand %vm1057_vm12, %vm1011_vm14 }
 0x1e5   :  { %v1044_v17 = vadd.f32 %v1043_v53, %v1041_v6  ;;  %vm1086_vm12 = vmand %vm1076_vm5, %vm1007_vm8 }
 0x1e7   :  { %v461_v47 = vpop.xlane.xlu0 %460  ;;  %v1047_v52 = vadd.f32 %v1046_v24, %v1044_v17 }
 0x1e8   :  { %v370_v28 = vpop.xlane.xlu1 %369  ;;  %v1065_v21 = vsel %vm1064_vm3, %v461_v47, 0.0  ;;  %vm1095_vm3 = vcmp.eq.s32.totalorder %v1397_v2, 5 }
 0x1e9   :  { %v1049_v31 = vsel %vm1048_vm11, %v370_v28, 0.0  ;;  %vm1077_vm11 = vmand %vm1076_vm5, %vm995_vm10 }
 0x1ea   :  { %v1050_v30 = vadd.f32 %v1049_v31, %v1047_v52 }
 0x1eb   :  { %v483_v12 = vpop.xlane.xlu0 %482 }
 0x1ec   :  { %v392_v63 = vpop.xlane.xlu1 %391  ;;  %v1053_v48 = vadd.f32 %v1052_v35, %v1050_v30  ;;  %v1071_v10 = vsel %vm1070_vm15, %v483_v12, 0.0  ;;  %vm1096_vm15 = vmand %vm1095_vm3, %vm995_vm10 }
 0x1ed   :  { %v1055_v54 = vsel %vm1054_vm6, %v392_v63, 0.0  ;;  %vm1080_vm6 = vmand %vm1076_vm5, %vm999_vm13 }
 0x1ee   :  { %v1056_v22 = vadd.f32 %v1055_v54, %v1053_v48 }
 0x1ef   :  { %v547_v19 = vpop.xlane.xlu0 %546 }
 0x1f0   :  { %v1060_v42 = vadd.f32 %v1059_v49, %v1056_v22  ;;  %v1078_v20 = vsel %vm1077_vm11, %v547_v19, 0.0  ;;  %vm1099_vm11 = vmand %vm1095_vm3, %vm999_vm13 }
 0x1f2   :  { %v452_v0 = vpop.xlane.xlu1 %451 }
 0x1f3   :  { %v1062_v3 = vsel %vm1061_vm4, %v452_v0, 0.0  ;;  %v565_v50 = vpop.xlane.xlu0 %564  ;;  %vm1089_vm4 = vmand %vm1076_vm5, %vm1011_vm14 }
 0x1f4   :  { %v1063_v33 = vadd.f32 %v1062_v3, %v1060_v42  ;;  %v1084_v37 = vsel %vm1083_vm0, %v565_v50, 0.0  ;;  %vm1111_vm0 = vmand %vm1095_vm3, %vm1015_vm9 }
 0x1f6   :  { %v472_v62 = vpop.xlane.xlu1 %471  ;;  %v1066_v36 = vadd.f32 %v1065_v21, %v1063_v33 }
 0x1f7   :  { %v1068_v7 = vsel %vm1067_vm2, %v472_v62, 0.0  ;;  %v587_v38 = vpop.xlane.xlu0 %586  ;;  %vm1092_vm2 = vmand %vm1076_vm5, %vm1015_vm9 }
 0x1f8   :  { %v1069_v56 = vadd.f32 %v1068_v7, %v1066_v36  ;;  %v1090_v15 = vsel %vm1089_vm4, %v587_v38, 0.0  ;;  %vm1102_vm5 = vmand %vm1095_vm3, %vm1003_vm1 }
 0x1fa   :  { %v494_v44 = vpop.xlane.xlu1 %493  ;;  %v1072_v23 = vadd.f32 %v1071_v10, %v1069_v56 }
 0x1fb   :  { %v1074_v27 = vsel %vm1073_vm7, %v494_v44, 0.0  ;;  %v649_v4 = vpop.xlane.xlu0 %648  ;;  %vm1105_vm7 = vmand %vm1095_vm3, %vm1007_vm8 }
 0x1fc   :  { %v1075_v43 = vadd.f32 %v1074_v27, %v1072_v23  ;;  %v1097_v9 = vsel %vm1096_vm15, %v649_v4, 0.0 }
 0x1fe   :  { %v556_v25 = vpop.xlane.xlu1 %555  ;;  %v1079_v18 = vadd.f32 %v1078_v20, %v1075_v43 }
 0x1ff   :  { %v1081_v57 = vsel %vm1080_vm6, %v556_v25, 0.0  ;;  %v667_v32 = vpop.xlane.xlu0 %666  ;;  %vm1108_vm6 = vmand %vm1095_vm3, %vm1011_vm14 }
 0x200   :  { %v1082_v51 = vadd.f32 %v1081_v57, %v1079_v18  ;;  %v1103_v60 = vsel %vm1102_vm5, %v667_v32, 0.0 }
 0x202   :  { %v576_v29 = vpop.xlane.xlu1 %575  ;;  %v1085_v11 = vadd.f32 %v1084_v37, %v1082_v51 }
 0x203   :  { %v1087_v8 = vsel %vm1086_vm12, %v576_v29, 0.0  ;;  %v689_v26 = vpop.xlane.xlu0 %688  ;;  %vm1114_vm12 = vcmp.eq.s32.totalorder %v1397_v2, 6 }
 0x204   :  { %v1088_v34 = vadd.f32 %v1087_v8, %v1085_v11  ;;  %v1109_v6 = vsel %vm1108_vm6, %v689_v26, 0.0  ;;  %vm1115_vm4 = vmand %vm1114_vm12, %vm995_vm10 }
 0x205   :  { %vm1121_vm3 = vmand %vm1114_vm12, %vm1003_vm1 }
 0x206   :  { %v598_v39 = vpop.xlane.xlu1 %597  ;;  %v1091_v13 = vadd.f32 %v1090_v15, %v1088_v34  ;;  %vm1124_vm15 = vmand %vm1114_vm12, %vm1007_vm8 }
 0x207   :  { %v1093_v61 = vsel %vm1092_vm2, %v598_v39, 0.0  ;;  %v753_v17 = vpop.xlane.xlu0 %752  ;;  %vm1118_vm2 = vmand %vm1114_vm12, %vm999_vm13 }
 0x208   :  { %v1094_v59 = vadd.f32 %v1093_v61, %v1091_v13  ;;  %v1116_v28 = vsel %vm1115_vm4, %v753_v17, 0.0  ;;  %vm1130_vm5 = vmand %vm1114_vm12, %vm1015_vm9 }
 0x20a   :  { %v658_v14 = vpop.xlane.xlu1 %657  ;;  %v1098_v58 = vadd.f32 %v1097_v9, %v1094_v59 }
 0x20b   :  { %v1100_v41 = vsel %vm1099_vm11, %v658_v14, 0.0  ;;  %v771_v12 = vpop.xlane.xlu0 %770  ;;  %vm1127_vm11 = vmand %vm1114_vm12, %vm1011_vm14 }
 0x20c   :  { %v1101_v55 = vadd.f32 %v1100_v41, %v1098_v58  ;;  %v1122_v48 = vsel %vm1121_vm3, %v771_v12, 0.0 }
 0x20e   :  { %v678_v46 = vpop.xlane.xlu1 %677  ;;  %v1104_v40 = vadd.f32 %v1103_v60, %v1101_v55 }
 0x20f   :  { %v1106_v45 = vsel %vm1105_vm7, %v678_v46, 0.0  ;;  %v793_v49 = vpop.xlane.xlu0 %792  ;;  %vm1133_vm7 = vcmp.eq.s32.totalorder %v1397_v2, 7 }
 0x210   :  { %v1107_v1 = vadd.f32 %v1106_v45, %v1104_v40  ;;  %v1128_v19 = vsel %vm1127_vm11, %v793_v49, 0.0  ;;  %vm1134_vm6 = vmand %vm1133_vm7, %vm995_vm10 }
 0x211   :  { %vm1140_vm12 = vmand %vm1133_vm7, %vm1003_vm1 }
 0x212   :  { %v700_v16 = vpop.xlane.xlu1 %699  ;;  %v1110_v53 = vadd.f32 %v1109_v6, %v1107_v1  ;;  %vm1143_vm4 = vmand %vm1133_vm7, %vm1007_vm8 }
 0x213   :  { %v1112_v47 = vsel %vm1111_vm0, %v700_v16, 0.0  ;;  %v855_v62 = vpop.xlane.xlu0 %854  ;;  %vm1137_vm0 = vmand %vm1133_vm7, %vm999_vm13 }
 0x214   :  { %v1113_v24 = vadd.f32 %v1112_v47, %v1110_v53  ;;  %v1135_v7 = vsel %vm1134_vm6, %v855_v62, 0.0  ;;  %vm1149_vm3 = vmand %vm1133_vm7, %vm1015_vm9 }
 0x216   :  { %v762_v52 = vpop.xlane.xlu1 %761  ;;  %v1117_v31 = vadd.f32 %v1116_v28, %v1113_v24 }
 0x217   :  { %v1119_v30 = vsel %vm1118_vm2, %v762_v52, 0.0  ;;  %vm1146_vm2 = vmand %vm1133_vm7, %vm1011_vm14 }
 0x218   :  { %v1120_v35 = vadd.f32 %v1119_v30, %v1117_v31 }
 0x21a   :  { %v782_v63 = vpop.xlane.xlu1 %781  ;;  %v1123_v54 = vadd.f32 %v1122_v48, %v1120_v35 }
 0x21b   :  { %v1125_v22 = vsel %vm1124_vm15, %v782_v63, 0.0  ;;  %vm1152_vm15 = vcmp.eq.s32.totalorder %v1397_v2, 8 }
 0x21c   :  { %v1126_v0 = vadd.f32 %v1125_v22, %v1123_v54  ;;  %vm1153_vm11 = vmand %vm1152_vm15, %vm995_vm10 }
 0x21d   :  { %vm1159_vm7 = vmand %vm1152_vm15, %vm1003_vm1 }
 0x21e   :  { %v804_v42 = vpop.xlane.xlu1 %803  ;;  %v1129_v3 = vadd.f32 %v1128_v19, %v1126_v0  ;;  %vm1162_vm10 = vmand %vm1152_vm15, %vm1007_vm8  ;;  %vm1171_vm8 = vcmask 70656  }
 0x21f   :  { %v1131_v33 = vsel %vm1130_vm5, %v804_v42, 0.0  ;;  %vm1156_vm5 = vmand %vm1152_vm15, %vm999_vm13 }
 0x220   :  { %v1132_v36 = vadd.f32 %v1131_v33, %v1129_v3  ;;  %vm1165_vm13 = vmand %vm1152_vm15, %vm1011_vm14 }
 0x221   :  { %vm1168_vm1 = vmand %vm1152_vm15, %vm1015_vm9 }
 0x222   :  { %v864_v21 = vpop.xlane.xlu1 %863  ;;  %v1136_v56 = vadd.f32 %v1135_v7, %v1132_v36 }
 0x223   :  { %v1138_v10 = vsel %vm1137_vm0, %v864_v21, 0.0 }
 0x224   :  { %v1139_v44 = vadd.f32 %v1138_v10, %v1136_v56 }
 0x226   :  { %v884_v50 = vpop.xlane.xlu1 %883 }
 0x227   :  { %v1144_v38 = vsel %vm1143_vm4, %v884_v50, 0.0 }
 0x238   :  { %v906_v23 = vpop.xlane.xlu1 %905  ;;  %v873_v20 = vpop.xlane.xlu0 %872 }
 0x239   :  { %v1141_v27 = vsel %vm1140_vm12, %v873_v20, 0.0  ;;  %v1150_v29 = vsel %vm1149_vm3, %v906_v23, 0.0 }
 0x23a   :  { %v1142_v43 = vadd.f32 %v1141_v27, %v1139_v44 }
 0x23c   :  { %v951_v25 = vpop.xlane.xlu1 %950  ;;  %v1145_v18 = vadd.f32 %v1144_v38, %v1142_v43  ;;  %v895_v57 = vpop.xlane.xlu0 %894 }
 0x23d   :  { %v1147_v51 = vsel %vm1146_vm2, %v895_v57, 0.0  ;;  %v1157_v39 = vsel %vm1156_vm5, %v951_v25, 0.0 }
 0x23e   :  { %v1148_v37 = vadd.f32 %v1147_v51, %v1145_v18 }
 0x240   :  { %v1151_v11 = vadd.f32 %v1150_v29, %v1148_v37  ;;  %v942_v8 = vpop.xlane.xlu0 %941  ;;  %v971_v34 = vpop.xlane.xlu1 %970 }
 0x241   :  { %v1154_v4 = vsel %vm1153_vm11, %v942_v8, 0.0  ;;  %v1163_v32 = vsel %vm1162_vm10, %v971_v34, 0.0 }
 0x242   :  { %v1155_v15 = vadd.f32 %v1154_v4, %v1151_v11 }
 0x244   :  { %v1158_v13 = vadd.f32 %v1157_v39, %v1155_v15  ;;  %v960_v61 = vpop.xlane.xlu0 %959  ;;  %v993_v14 = vpop.xlane.xlu1 %992 }
 0x245   :  { %v1160_v59 = vsel %vm1159_vm7, %v960_v61, 0.0  ;;  %v1169_v46 = vsel %vm1168_vm1, %v993_v14, 0.0 }
 0x246   :  { %v1161_v9 = vadd.f32 %v1160_v59, %v1158_v13 }
 0x248   :  { %v1164_v58 = vadd.f32 %v1163_v32, %v1161_v9  ;;  %v982_v41 = vpop.xlane.xlu0 %981 }
 0x249   :  { %v1166_v55 = vsel %vm1165_vm13, %v982_v41, 0.0 }
 0x24a   :  { %v1167_v60 = vadd.f32 %v1166_v55, %v1164_v58 }
 0x24c   :  { %v1170_v40 = vadd.f32 %v1169_v46, %v1167_v60 }
 0x24e   :  { %1172 = vst.msk [vmem:[%s2270_s5] sm:$0x3f] %vm1171_vm8, %v1170_v40 }
 0x24f   :  { %1177 = vsyncpa [#allocation3], 1 }
 0x250   :  { %1178 = vsyncpa [#allocation5], 1 }
 0x251   :  { %1179 = vsyncpa [#allocation8], 1 }

</bundles_post_ra>
